<compile_context>
chip_gen: v7x
topology: tpu7x:2x2x1
jax: 0.10.0
libtpu: 0.0.40
codegen_flags: <defaults>
</compile_context>

<pallas_src>
import math
from functools import partial

import jax
import jax.numpy as jnp
from jax.experimental import pallas as pl
from jax.experimental.pallas import tpu as pltpu

# ----- synthetic config (PropertyPredConfig) -----
D_MODEL    = 32      # config.dim_embed
NUM_HEADS  = 4       # config.num_head
D_HIDDEN   = 64      # config.dim_tf_hidden
NUM_LAYERS = 2       # config.num_layers
INIT_RANGE = 0.02    # config.init_range
NUM_TOKENS = 50
NUM_LABELS = 3       # classification, num_labels > 1 -> softmax output activation
LN_EPS     = 1e-5    # nn.TransformerEncoderLayer / nn.LayerNorm default
NEG_INF    = -1e9

# SPECIAL_TOKENS (synthetic, deterministic)
CLS_ID = 1
PAD_ID = 0

NT_PAD = 64              # embedding-table rows padded up (sublane-aligned K dim)
VEC_W  = 3 * D_MODEL     # packed bias/LN vector row width (= max vector length)
VROWS_PER_LAYER = 8      # [b_qkv, b_o, ln1_g, ln1_b, b1, b2, ln2_g, ln2_b]


# --------------------------------------------------------------------------
# Fused Pallas kernel: embedding + both encoder layers + classifier head for
# one batch tile (BT rows) per grid step.  Only (BT, NUM_LABELS) leaves VMEM.
# --------------------------------------------------------------------------
def fused_forward_kernel(ids_ref, bias_ref, table_ref, pos_ref,
                         wqkv_ref, wo_ref, w1_ref, w2_ref,
                         cw1_ref, cw2_ref, vecs_ref, o_ref,
                         *, bt, s_pad, num_heads, num_layers,
                         d_model, d_hidden, nt_pad, num_labels):
    D = d_model
    dh = D // num_heads
    M = bt * s_pad

    # In-kernel embedding lookup as a one-hot matmul (MXU-friendly, no gather).
    # sqrt(d_model) scale is pre-folded into the table at trace time.
    ids = ids_ref[...]                                               # (M, 1) int32
    tok = jax.lax.broadcasted_iota(jnp.int32, (M, nt_pad), 1)
    onehot = (ids == tok).astype(jnp.float32)                        # (M, nt_pad)
    x = jnp.dot(onehot, table_ref[...],
                preferred_element_type=jnp.float32) + pos_ref[...]   # (M, D)

    biasv = bias_ref[...]                                            # (M, s_pad)
    vecsv = vecs_ref[...]                                            # (L*8+2, VEC_W)

    def vrow(i, w):                                                  # (1, w)
        return vecsv[i:i + 1, 0:w]

    def layer_norm(y, g, b):
        mu = jnp.mean(y, axis=-1, keepdims=True)
        var = jnp.mean((y - mu) ** 2, axis=-1, keepdims=True)
        return (y - mu) * jax.lax.rsqrt(var + LN_EPS) * g + b

    # Static (unrolled) loop over layers; stacked weights stay VMEM-resident.
    for l in range(num_layers):
        vb = l * VROWS_PER_LAYER
        wqkv_l = wqkv_ref[l]                                         # (D, 3D)
        wo_l = wo_ref[l]                                             # (D, D)

        # Fused QKV projection over all bt*s_pad rows at once.  The 1/sqrt(dh)
        # softmax scale is pre-folded into the Q columns of wqkv / b_qkv.
        qkv = jnp.dot(x, wqkv_l, preferred_element_type=jnp.float32) + vrow(vb + 0, 3 * D)

        # Attention per (batch row, head): NT dot_general (no kh.T materialized)
        # and per-head accumulation into Wo row slices (no lane concat).
        attn_rows = []
        for r in range(bt):
            o0 = r * s_pad                                           # sublane-aligned
            rowqkv = qkv[o0:o0 + s_pad, :]                           # (s_pad, 3D)
            bias2d = biasv[o0:o0 + s_pad, :]                         # (s_pad, s_pad)
            acc = None
            for h in range(num_heads):
                lo = h * dh
                qh = rowqkv[:, lo:lo + dh]
                kh = rowqkv[:, D + lo:D + lo + dh]
                vh = rowqkv[:, 2 * D + lo:2 * D + lo + dh]
                sc = jax.lax.dot_general(qh, kh, (((1,), (1,)), ((), ())),
                                         preferred_element_type=jnp.float32)
                sc = sc + bias2d
                sc = sc - jnp.max(sc, axis=-1, keepdims=True)        # stable softmax
                p = jnp.exp(sc)
                p = p / jnp.sum(p, axis=-1, keepdims=True)           # exact divide
                ctx = jnp.dot(p, vh, preferred_element_type=jnp.float32)
                part = jnp.dot(ctx, wo_l[lo:lo + dh, :],
                               preferred_element_type=jnp.float32)   # (s_pad, D)
                acc = part if acc is None else acc + part
            attn_rows.append(acc)
        attn_out = jnp.concatenate(attn_rows, axis=0) + vrow(vb + 1, D)   # (M, D)

        # Post-norm residual + feed-forward (ReLU), all over M rows at once.
        h1 = layer_norm(x + attn_out, vrow(vb + 2, D), vrow(vb + 3, D))
        ff = jnp.dot(h1, w1_ref[l], preferred_element_type=jnp.float32) + vrow(vb + 4, d_hidden)
        ff = jnp.maximum(ff, 0.0)
        ff = jnp.dot(ff, w2_ref[l], preferred_element_type=jnp.float32) + vrow(vb + 5, D)
        x = layer_norm(h1 + ff, vrow(vb + 6, D), vrow(vb + 7, D))

    # CLS rows (row 0 of each batch element) -> classifier head (Dropout = id).
    cls = jnp.concatenate([x[r * s_pad:r * s_pad + 1, :] for r in range(bt)], axis=0)
    cb = num_layers * VROWS_PER_LAYER
    hc = jnp.dot(cls, cw1_ref[...], preferred_element_type=jnp.float32) + vrow(cb + 0, D // 2)
    hc = jnp.maximum(hc, 0.0)
    logits = jnp.dot(hc, cw2_ref[...], preferred_element_type=jnp.float32) + vrow(cb + 1, num_labels)

    # Output activation: exact softmax over labels (classification, >1 label).
    z = logits - jnp.max(logits, axis=-1, keepdims=True)
    e = jnp.exp(z)
    o_ref[...] = e / jnp.sum(e, axis=-1, keepdims=True)


def fused_forward(ids_flat, bias_big, table, pos_tiled, mats, vecs, *, bt, s_pad, bp):
    wqkv, wo, w1, w2, cw1, cw2 = mats
    m = bt * s_pad

    def full_spec(arr):
        nd = arr.ndim
        return pl.BlockSpec(arr.shape, lambda i, _nd=nd: (0,) * _nd)

    kernel = partial(fused_forward_kernel, bt=bt, s_pad=s_pad,
                     num_heads=NUM_HEADS, num_layers=NUM_LAYERS,
                     d_model=D_MODEL, d_hidden=D_HIDDEN,
                     nt_pad=NT_PAD, num_labels=NUM_LABELS)

    return pl.pallas_call(
        kernel,
        out_shape=jax.ShapeDtypeStruct((bp, NUM_LABELS), jnp.float32),
        grid=(bp // bt,),
        in_specs=[pl.BlockSpec((m, 1), lambda i: (i, 0)),         # token ids
                  pl.BlockSpec((m, s_pad), lambda i: (i, 0)),     # key-padding bias
                  full_spec(table), full_spec(pos_tiled),
                  full_spec(wqkv), full_spec(wo), full_spec(w1), full_spec(w2),
                  full_spec(cw1), full_spec(cw2), full_spec(vecs)],
        out_specs=pl.BlockSpec((bt, NUM_LABELS), lambda i: (i, 0)),
        # TODO(synk): on v7x switch this axis to pltpu.CORE_PARALLEL to shard
        # batch tiles across the two TensorCores; "parallel" is safe everywhere.
        compiler_params=pltpu.CompilerParams(dimension_semantics=("parallel",)),
    )(ids_flat, bias_big, table, pos_tiled, wqkv, wo, w1, w2, cw1, cw2, vecs)


# --------------------------------------------------------------------------
# Parameter init (deterministic, synthetic), stacked per-layer weights.
# --------------------------------------------------------------------------
def sinusoidal_pos_enc(max_len, d_model):
    pos = jnp.arange(max_len, dtype=jnp.float32)[:, None]
    div = jnp.exp(jnp.arange(0, d_model, 2, dtype=jnp.float32)
                  * (-math.log(10000.0) / d_model))
    pe = jnp.zeros((max_len, d_model), jnp.float32)
    pe = pe.at[:, 0::2].set(jnp.sin(pos * div))
    pe = pe.at[:, 1::2].set(jnp.cos(pos * div))
    return pe


def init_params(key, max_len=64):
    ks = iter(jax.random.split(key, 16))
    nrm = lambda shape: (INIT_RANGE * jax.random.normal(next(ks), shape)).astype(jnp.float32)
    L, D, H = NUM_LAYERS, D_MODEL, D_HIDDEN
    return {
        "embedding": nrm((NUM_TOKENS, D)),
        "pos_enc": sinusoidal_pos_enc(max_len, D),
        # transformer encoder layers (stacked along leading L axis)
        "w_qkv": nrm((L, D, 3 * D)), "b_qkv": jnp.zeros((L, 3 * D), jnp.float32),
        "w_o":   nrm((L, D, D)),     "b_o":   jnp.zeros((L, D), jnp.float32),
        "ln1_g": jnp.ones((L, D), jnp.float32), "ln1_b": jnp.zeros((L, D), jnp.float32),
        "w1":    nrm((L, D, H)),     "b1":    jnp.zeros((L, H), jnp.float32),
        "w2":    nrm((L, H, D)),     "b2":    jnp.zeros((L, D), jnp.float32),
        "ln2_g": jnp.ones((L, D), jnp.float32), "ln2_b": jnp.zeros((L, D), jnp.float32),
        # classifier head
        "cls_w1": nrm((D, D // 2)),          "cls_b1": jnp.zeros((D // 2,), jnp.float32),
        "cls_w2": nrm((D // 2, NUM_LABELS)), "cls_b2": jnp.zeros((NUM_LABELS,), jnp.float32),
    }


# --------------------------------------------------------------------------
# Forward glue (mirrors PropertyPredictionModel.forward, eval mode)
# --------------------------------------------------------------------------
def property_prediction_forward(params, smiles_ids, attention_mask=None):
    B, Lseq = smiles_ids.shape
    S = Lseq + 1                                   # + CLS token
    S_pad = ((S + 7) // 8) * 8                     # sublane-aligned sequence tile
    BT = B if B <= 16 else 16                      # batch rows per grid step
    Bp = ((B + BT - 1) // BT) * BT

    # --- token ids (CLS prepended) + key-padding mask (reference semantics) ---
    cls_col = jnp.full((B, 1), CLS_ID, dtype=smiles_ids.dtype)
    x_ids = jnp.concatenate([cls_col, smiles_ids], axis=1)                  # (B, S)
    if attention_mask is not None:
        # Mirrors the reference exactly: cls_mask = ones(bool) -> the CLS key
        # position is masked out (True == ignore) whenever a mask is given.
        cls_mask = jnp.ones((B, 1), dtype=bool)
        padding_mask = jnp.concatenate([cls_mask, attention_mask == 0], axis=1)
    else:
        padding_mask = x_ids == PAD_ID

    bias = jnp.where(padding_mask, NEG_INF, 0.0).astype(jnp.float32)        # (B, S)
    # Pad keys to S_pad (masked) and batch rows to Bp (dummy rows keep key 0
    # open so their softmax stays finite; they are sliced away at the end).
    bias = jnp.pad(bias, ((0, 0), (0, S_pad - S)), constant_values=NEG_INF)
    if Bp > B:
        dummy = jnp.full((Bp - B, S_pad), NEG_INF, jnp.float32).at[:, 0].set(0.0)
        bias = jnp.concatenate([bias, dummy], axis=0)
    bias_big = jnp.broadcast_to(bias[:, None, :],
                                (Bp, S_pad, S_pad)).reshape(Bp * S_pad, S_pad)

    ids = jnp.pad(x_ids.astype(jnp.int32), ((0, Bp - B), (0, S_pad - S)),
                  constant_values=CLS_ID)
    ids_flat = ids.reshape(Bp * S_pad, 1)

    # --- VMEM-resident tables / weights (trace-time folding & packing) ---
    table = jnp.zeros((NT_PAD, D_MODEL), jnp.float32)
    table = table.at[:NUM_TOKENS].set(params["embedding"] * math.sqrt(D_MODEL))
    pos_tiled = jnp.tile(params["pos_enc"][:S_pad], (BT, 1))                # (BT*S_pad, D)

    # Fold the attention softmax 1/sqrt(dh) scale into the Q projection.
    scale = 1.0 / math.sqrt(D_MODEL // NUM_HEADS)
    col_scale = jnp.concatenate([jnp.full((D_MODEL,), scale, jnp.float32),
                                 jnp.ones((2 * D_MODEL,), jnp.float32)])
    w_qkv = params["w_qkv"] * col_scale
    b_qkv = params["b_qkv"] * col_scale

    # Pack every tiny per-layer vector into one (L*8+2, VEC_W) array -> far
    # fewer input DMAs at kernel start.
    def vrow(v):
        v = v.reshape(-1)
        return jnp.pad(v, (0, VEC_W - v.shape[0]))

    rows = []
    for l in range(NUM_LAYERS):
        rows += [vrow(b_qkv[l]), vrow(params["b_o"][l]),
                 vrow(params["ln1_g"][l]), vrow(params["ln1_b"][l]),
                 vrow(params["b1"][l]), vrow(params["b2"][l]),
                 vrow(params["ln2_g"][l]), vrow(params["ln2_b"][l])]
    rows += [vrow(params["cls_b1"]), vrow(params["cls_b2"])]
    vecs = jnp.stack(rows, axis=0)

    mats = (w_qkv, params["w_o"], params["w1"], params["w2"],
            params["cls_w1"], params["cls_w2"])
    out = fused_forward(ids_flat, bias_big, table, pos_tiled, mats, vecs,
                        bt=BT, s_pad=S_pad, bp=Bp)
    return out[:B]                                                          # (B, num_labels)


if __name__ == "__main__":
    key = jax.random.PRNGKey(0)
    k_params, k_ids = jax.random.split(key)

    params = init_params(k_params)

    batch, seq_len = 2, 8
    smiles_ids = jax.random.randint(k_ids, (batch, seq_len), 2, NUM_TOKENS).astype(jnp.int32)
    attention_mask = jnp.ones((batch, seq_len), jnp.int32).at[:, 6:].set(0)  # last 2 are padding

    forward = jax.jit(property_prediction_forward)
    out = jax.block_until_ready(forward(params, smiles_ids, attention_mask))
    assert out.shape == (batch, NUM_LABELS)
    assert bool(jnp.all(jnp.isfinite(out)))
    assert bool(jnp.allclose(jnp.sum(out, axis=-1), 1.0, atol=1e-5))
    print("KERNEL_OK")
</pallas_src>

<mosaic_0001>
module attributes {stable_mosaic.version = 11 : i64} {
  func.func @fused_forward_kernel(%arg0: i32, %arg1: memref<32x1xi32, #tpu.memory_space<vmem>>, %arg2: memref<32x16xf32, #tpu.memory_space<vmem>>, %arg3: memref<64x32xf32, #tpu.memory_space<vmem>>, %arg4: memref<32x32xf32, #tpu.memory_space<vmem>>, %arg5: memref<2x32x96xf32, #tpu.memory_space<vmem>>, %arg6: memref<2x32x32xf32, #tpu.memory_space<vmem>>, %arg7: memref<2x32x64xf32, #tpu.memory_space<vmem>>, %arg8: memref<2x64x32xf32, #tpu.memory_space<vmem>>, %arg9: memref<32x16xf32, #tpu.memory_space<vmem>>, %arg10: memref<16x3xf32, #tpu.memory_space<vmem>>, %arg11: memref<18x96xf32, #tpu.memory_space<vmem>>, %arg12: memref<2x3xf32, #tpu.memory_space<vmem>>) attributes {dimension_semantics = [#tpu.dimension_semantics<parallel>], iteration_bounds = array<i64: 1>, scalar_prefetch = 0 : i64, scratch_operands = 0 : i64, tpu.core_type = #tpu.core_type<tc>, window_params = [{transform_indices = @transform_0, window_bounds = array<i64: 32, 1>}, {transform_indices = @transform_1, window_bounds = array<i64: 32, 16>}, {pipeline_mode = #tpu.pipeline_mode<synchronous>, transform_indices = @transform_2, window_bounds = array<i64: 64, 32>}, {pipeline_mode = #tpu.pipeline_mode<synchronous>, transform_indices = @transform_3, window_bounds = array<i64: 32, 32>}, {pipeline_mode = #tpu.pipeline_mode<synchronous>, transform_indices = @transform_4, window_bounds = array<i64: 2, 32, 96>}, {pipeline_mode = #tpu.pipeline_mode<synchronous>, transform_indices = @transform_5, window_bounds = array<i64: 2, 32, 32>}, {pipeline_mode = #tpu.pipeline_mode<synchronous>, transform_indices = @transform_6, window_bounds = array<i64: 2, 32, 64>}, {pipeline_mode = #tpu.pipeline_mode<synchronous>, transform_indices = @transform_7, window_bounds = array<i64: 2, 64, 32>}, {pipeline_mode = #tpu.pipeline_mode<synchronous>, transform_indices = @transform_8, window_bounds = array<i64: 32, 16>}, {pipeline_mode = #tpu.pipeline_mode<synchronous>, transform_indices = @transform_9, window_bounds = array<i64: 16, 3>}, {pipeline_mode = #tpu.pipeline_mode<synchronous>, transform_indices = @transform_10, window_bounds = array<i64: 18, 96>}, {transform_indices = @transform_11, window_bounds = array<i64: 2, 3>}]} {
    %c0 = arith.constant 0 : index
    %c0_0 = arith.constant 0 : index
    %0 = vector.load %arg1[%c0, %c0_0] : memref<32x1xi32, #tpu.memory_space<vmem>>, vector<32x1xi32>
    %1 = tpu.iota {dimensions = array<i32: 1>} : vector<32x64xi32>
    %2 = vector.broadcast %0 : vector<32x1xi32> to vector<32x64xi32>
    %3 = arith.cmpi eq, %2, %1 : vector<32x64xi32>
    %4 = arith.extui %3 : vector<32x64xi1> to vector<32x64xi32>
    %5 = arith.sitofp %4 : vector<32x64xi32> to vector<32x64xf32>
    %c0_1 = arith.constant 0 : index
    %c0_2 = arith.constant 0 : index
    %6 = vector.load %arg3[%c0_1, %c0_2] : memref<64x32xf32, #tpu.memory_space<vmem>>, vector<64x32xf32>
    %cst = arith.constant dense<0.000000e+00> : vector<32x32xf32>
    %7 = tpu.matmul %5, %6, %cst {dimension_numbers = #tpu.dot_dimension_numbers<[1], [0], [0], [1], [0, 0, 1, 1], [], []>} : vector<32x64xf32>, vector<64x32xf32>, vector<32x32xf32> -> vector<32x32xf32>
    %c0_3 = arith.constant 0 : index
    %c0_4 = arith.constant 0 : index
    %8 = vector.load %arg4[%c0_3, %c0_4] : memref<32x32xf32, #tpu.memory_space<vmem>>, vector<32x32xf32>
    %9 = arith.addf %7, %8 : vector<32x32xf32>
    %c0_5 = arith.constant 0 : index
    %c0_6 = arith.constant 0 : index
    %10 = vector.load %arg2[%c0_5, %c0_6] : memref<32x16xf32, #tpu.memory_space<vmem>>, vector<32x16xf32>
    %c0_7 = arith.constant 0 : index
    %c0_8 = arith.constant 0 : index
    %11 = vector.load %arg11[%c0_7, %c0_8] : memref<18x96xf32, #tpu.memory_space<vmem>>, vector<18x96xf32>
    %c0_9 = arith.constant 0 : index
    %c0_10 = arith.constant 0 : index
    %c0_11 = arith.constant 0 : index
    %12 = vector.load %arg5[%c0_9, %c0_10, %c0_11] : memref<2x32x96xf32, #tpu.memory_space<vmem>>, vector<1x32x96xf32>
    %13 = vector.shape_cast %12 : vector<1x32x96xf32> to vector<32x96xf32>
    %c0_12 = arith.constant 0 : index
    %c0_13 = arith.constant 0 : index
    %c0_14 = arith.constant 0 : index
    %14 = vector.load %arg6[%c0_12, %c0_13, %c0_14] : memref<2x32x32xf32, #tpu.memory_space<vmem>>, vector<1x32x32xf32>
    %15 = vector.shape_cast %14 : vector<1x32x32xf32> to vector<32x32xf32>
    %cst_15 = arith.constant dense<0.000000e+00> : vector<32x96xf32>
    %16 = tpu.matmul %9, %13, %cst_15 {dimension_numbers = #tpu.dot_dimension_numbers<[1], [0], [0], [1], [0, 0, 1, 1], [], []>} : vector<32x32xf32>, vector<32x96xf32>, vector<32x96xf32> -> vector<32x96xf32>
    %17 = vector.extract_strided_slice %11 {offsets = [0, 0], sizes = [1, 96], strides = [1, 1]} : vector<18x96xf32> to vector<1x96xf32>
    %18 = vector.broadcast %17 : vector<1x96xf32> to vector<32x96xf32>
    %19 = arith.addf %16, %18 : vector<32x96xf32>
    %20 = vector.extract_strided_slice %19 {offsets = [0, 0], sizes = [16, 96], strides = [1, 1]} : vector<32x96xf32> to vector<16x96xf32>
    %21 = vector.extract_strided_slice %10 {offsets = [0, 0], sizes = [16, 16], strides = [1, 1]} : vector<32x16xf32> to vector<16x16xf32>
    %22 = vector.extract_strided_slice %20 {offsets = [0, 0], sizes = [16, 8], strides = [1, 1]} : vector<16x96xf32> to vector<16x8xf32>
    %23 = vector.extract_strided_slice %20 {offsets = [0, 32], sizes = [16, 8], strides = [1, 1]} : vector<16x96xf32> to vector<16x8xf32>
    %24 = vector.extract_strided_slice %20 {offsets = [0, 64], sizes = [16, 8], strides = [1, 1]} : vector<16x96xf32> to vector<16x8xf32>
    %cst_16 = arith.constant dense<0.000000e+00> : vector<16x16xf32>
    %25 = tpu.matmul %22, %23, %cst_16 {dimension_numbers = #tpu.dot_dimension_numbers<[1], [1], [0], [0], [0, 0, 1, 0], [], []>} : vector<16x8xf32>, vector<16x8xf32>, vector<16x16xf32> -> vector<16x16xf32>
    %26 = arith.addf %25, %21 : vector<16x16xf32>
    %cst_17 = arith.constant dense<0xFF800000> : vector<16xf32>
    %27 = vector.multi_reduction <maximumf>, %26, %cst_17 [1] : vector<16x16xf32> to vector<16xf32>
    %28 = vector.shape_cast %27 : vector<16xf32> to vector<16x1xf32>
    %29 = vector.broadcast %28 : vector<16x1xf32> to vector<16x16xf32>
    %30 = arith.subf %26, %29 : vector<16x16xf32>
    %31 = math.exp %30 : vector<16x16xf32>
    %cst_18 = arith.constant dense<0.000000e+00> : vector<16xf32>
    %32 = vector.multi_reduction <add>, %31, %cst_18 [1] : vector<16x16xf32> to vector<16xf32>
    %33 = vector.shape_cast %32 : vector<16xf32> to vector<16x1xf32>
    %34 = vector.broadcast %33 : vector<16x1xf32> to vector<16x16xf32>
    %35 = arith.divf %31, %34 : vector<16x16xf32>
    %cst_19 = arith.constant dense<0.000000e+00> : vector<16x8xf32>
    %36 = tpu.matmul %35, %24, %cst_19 {dimension_numbers = #tpu.dot_dimension_numbers<[1], [0], [0], [1], [0, 0, 1, 1], [], []>} : vector<16x16xf32>, vector<16x8xf32>, vector<16x8xf32> -> vector<16x8xf32>
    %37 = vector.extract_strided_slice %15 {offsets = [0, 0], sizes = [8, 32], strides = [1, 1]} : vector<32x32xf32> to vector<8x32xf32>
    %cst_20 = arith.constant dense<0.000000e+00> : vector<16x32xf32>
    %38 = tpu.matmul %36, %37, %cst_20 {dimension_numbers = #tpu.dot_dimension_numbers<[1], [0], [0], [1], [0, 0, 1, 1], [], []>} : vector<16x8xf32>, vector<8x32xf32>, vector<16x32xf32> -> vector<16x32xf32>
    %39 = vector.extract_strided_slice %20 {offsets = [0, 8], sizes = [16, 8], strides = [1, 1]} : vector<16x96xf32> to vector<16x8xf32>
    %40 = vector.extract_strided_slice %20 {offsets = [0, 40], sizes = [16, 8], strides = [1, 1]} : vector<16x96xf32> to vector<16x8xf32>
    %41 = vector.extract_strided_slice %20 {offsets = [0, 72], sizes = [16, 8], strides = [1, 1]} : vector<16x96xf32> to vector<16x8xf32>
    %cst_21 = arith.constant dense<0.000000e+00> : vector<16x16xf32>
    %42 = tpu.matmul %39, %40, %cst_21 {dimension_numbers = #tpu.dot_dimension_numbers<[1], [1], [0], [0], [0, 0, 1, 0], [], []>} : vector<16x8xf32>, vector<16x8xf32>, vector<16x16xf32> -> vector<16x16xf32>
    %43 = arith.addf %42, %21 : vector<16x16xf32>
    %cst_22 = arith.constant dense<0xFF800000> : vector<16xf32>
    %44 = vector.multi_reduction <maximumf>, %43, %cst_22 [1] : vector<16x16xf32> to vector<16xf32>
    %45 = vector.shape_cast %44 : vector<16xf32> to vector<16x1xf32>
    %46 = vector.broadcast %45 : vector<16x1xf32> to vector<16x16xf32>
    %47 = arith.subf %43, %46 : vector<16x16xf32>
    %48 = math.exp %47 : vector<16x16xf32>
    %cst_23 = arith.constant dense<0.000000e+00> : vector<16xf32>
    %49 = vector.multi_reduction <add>, %48, %cst_23 [1] : vector<16x16xf32> to vector<16xf32>
    %50 = vector.shape_cast %49 : vector<16xf32> to vector<16x1xf32>
    %51 = vector.broadcast %50 : vector<16x1xf32> to vector<16x16xf32>
    %52 = arith.divf %48, %51 : vector<16x16xf32>
    %cst_24 = arith.constant dense<0.000000e+00> : vector<16x8xf32>
    %53 = tpu.matmul %52, %41, %cst_24 {dimension_numbers = #tpu.dot_dimension_numbers<[1], [0], [0], [1], [0, 0, 1, 1], [], []>} : vector<16x16xf32>, vector<16x8xf32>, vector<16x8xf32> -> vector<16x8xf32>
    %54 = vector.extract_strided_slice %15 {offsets = [8, 0], sizes = [8, 32], strides = [1, 1]} : vector<32x32xf32> to vector<8x32xf32>
    %cst_25 = arith.constant dense<0.000000e+00> : vector<16x32xf32>
    %55 = tpu.matmul %53, %54, %cst_25 {dimension_numbers = #tpu.dot_dimension_numbers<[1], [0], [0], [1], [0, 0, 1, 1], [], []>} : vector<16x8xf32>, vector<8x32xf32>, vector<16x32xf32> -> vector<16x32xf32>
    %56 = arith.addf %38, %55 : vector<16x32xf32>
    %57 = vector.extract_strided_slice %20 {offsets = [0, 16], sizes = [16, 8], strides = [1, 1]} : vector<16x96xf32> to vector<16x8xf32>
    %58 = vector.extract_strided_slice %20 {offsets = [0, 48], sizes = [16, 8], strides = [1, 1]} : vector<16x96xf32> to vector<16x8xf32>
    %59 = vector.extract_strided_slice %20 {offsets = [0, 80], sizes = [16, 8], strides = [1, 1]} : vector<16x96xf32> to vector<16x8xf32>
    %cst_26 = arith.constant dense<0.000000e+00> : vector<16x16xf32>
    %60 = tpu.matmul %57, %58, %cst_26 {dimension_numbers = #tpu.dot_dimension_numbers<[1], [1], [0], [0], [0, 0, 1, 0], [], []>} : vector<16x8xf32>, vector<16x8xf32>, vector<16x16xf32> -> vector<16x16xf32>
    %61 = arith.addf %60, %21 : vector<16x16xf32>
    %cst_27 = arith.constant dense<0xFF800000> : vector<16xf32>
    %62 = vector.multi_reduction <maximumf>, %61, %cst_27 [1] : vector<16x16xf32> to vector<16xf32>
    %63 = vector.shape_cast %62 : vector<16xf32> to vector<16x1xf32>
    %64 = vector.broadcast %63 : vector<16x1xf32> to vector<16x16xf32>
    %65 = arith.subf %61, %64 : vector<16x16xf32>
    %66 = math.exp %65 : vector<16x16xf32>
    %cst_28 = arith.constant dense<0.000000e+00> : vector<16xf32>
    %67 = vector.multi_reduction <add>, %66, %cst_28 [1] : vector<16x16xf32> to vector<16xf32>
    %68 = vector.shape_cast %67 : vector<16xf32> to vector<16x1xf32>
    %69 = vector.broadcast %68 : vector<16x1xf32> to vector<16x16xf32>
    %70 = arith.divf %66, %69 : vector<16x16xf32>
    %cst_29 = arith.constant dense<0.000000e+00> : vector<16x8xf32>
    %71 = tpu.matmul %70, %59, %cst_29 {dimension_numbers = #tpu.dot_dimension_numbers<[1], [0], [0], [1], [0, 0, 1, 1], [], []>} : vector<16x16xf32>, vector<16x8xf32>, vector<16x8xf32> -> vector<16x8xf32>
    %72 = vector.extract_strided_slice %15 {offsets = [16, 0], sizes = [8, 32], strides = [1, 1]} : vector<32x32xf32> to vector<8x32xf32>
    %cst_30 = arith.constant dense<0.000000e+00> : vector<16x32xf32>
    %73 = tpu.matmul %71, %72, %cst_30 {dimension_numbers = #tpu.dot_dimension_numbers<[1], [0], [0], [1], [0, 0, 1, 1], [], []>} : vector<16x8xf32>, vector<8x32xf32>, vector<16x32xf32> -> vector<16x32xf32>
    %74 = arith.addf %56, %73 : vector<16x32xf32>
    %75 = vector.extract_strided_slice %20 {offsets = [0, 24], sizes = [16, 8], strides = [1, 1]} : vector<16x96xf32> to vector<16x8xf32>
    %76 = vector.extract_strided_slice %20 {offsets = [0, 56], sizes = [16, 8], strides = [1, 1]} : vector<16x96xf32> to vector<16x8xf32>
    %77 = vector.extract_strided_slice %20 {offsets = [0, 88], sizes = [16, 8], strides = [1, 1]} : vector<16x96xf32> to vector<16x8xf32>
    %cst_31 = arith.constant dense<0.000000e+00> : vector<16x16xf32>
    %78 = tpu.matmul %75, %76, %cst_31 {dimension_numbers = #tpu.dot_dimension_numbers<[1], [1], [0], [0], [0, 0, 1, 0], [], []>} : vector<16x8xf32>, vector<16x8xf32>, vector<16x16xf32> -> vector<16x16xf32>
    %79 = arith.addf %78, %21 : vector<16x16xf32>
    %cst_32 = arith.constant dense<0xFF800000> : vector<16xf32>
    %80 = vector.multi_reduction <maximumf>, %79, %cst_32 [1] : vector<16x16xf32> to vector<16xf32>
    %81 = vector.shape_cast %80 : vector<16xf32> to vector<16x1xf32>
    %82 = vector.broadcast %81 : vector<16x1xf32> to vector<16x16xf32>
    %83 = arith.subf %79, %82 : vector<16x16xf32>
    %84 = math.exp %83 : vector<16x16xf32>
    %cst_33 = arith.constant dense<0.000000e+00> : vector<16xf32>
    %85 = vector.multi_reduction <add>, %84, %cst_33 [1] : vector<16x16xf32> to vector<16xf32>
    %86 = vector.shape_cast %85 : vector<16xf32> to vector<16x1xf32>
    %87 = vector.broadcast %86 : vector<16x1xf32> to vector<16x16xf32>
    %88 = arith.divf %84, %87 : vector<16x16xf32>
    %cst_34 = arith.constant dense<0.000000e+00> : vector<16x8xf32>
    %89 = tpu.matmul %88, %77, %cst_34 {dimension_numbers = #tpu.dot_dimension_numbers<[1], [0], [0], [1], [0, 0, 1, 1], [], []>} : vector<16x16xf32>, vector<16x8xf32>, vector<16x8xf32> -> vector<16x8xf32>
    %90 = vector.extract_strided_slice %15 {offsets = [24, 0], sizes = [8, 32], strides = [1, 1]} : vector<32x32xf32> to vector<8x32xf32>
    %cst_35 = arith.constant dense<0.000000e+00> : vector<16x32xf32>
    %91 = tpu.matmul %89, %90, %cst_35 {dimension_numbers = #tpu.dot_dimension_numbers<[1], [0], [0], [1], [0, 0, 1, 1], [], []>} : vector<16x8xf32>, vector<8x32xf32>, vector<16x32xf32> -> vector<16x32xf32>
    %92 = arith.addf %74, %91 : vector<16x32xf32>
    %93 = vector.extract_strided_slice %19 {offsets = [16, 0], sizes = [16, 96], strides = [1, 1]} : vector<32x96xf32> to vector<16x96xf32>
    %94 = vector.extract_strided_slice %10 {offsets = [16, 0], sizes = [16, 16], strides = [1, 1]} : vector<32x16xf32> to vector<16x16xf32>
    %95 = vector.extract_strided_slice %93 {offsets = [0, 0], sizes = [16, 8], strides = [1, 1]} : vector<16x96xf32> to vector<16x8xf32>
    %96 = vector.extract_strided_slice %93 {offsets = [0, 32], sizes = [16, 8], strides = [1, 1]} : vector<16x96xf32> to vector<16x8xf32>
    %97 = vector.extract_strided_slice %93 {offsets = [0, 64], sizes = [16, 8], strides = [1, 1]} : vector<16x96xf32> to vector<16x8xf32>
    %cst_36 = arith.constant dense<0.000000e+00> : vector<16x16xf32>
    %98 = tpu.matmul %95, %96, %cst_36 {dimension_numbers = #tpu.dot_dimension_numbers<[1], [1], [0], [0], [0, 0, 1, 0], [], []>} : vector<16x8xf32>, vector<16x8xf32>, vector<16x16xf32> -> vector<16x16xf32>
    %99 = arith.addf %98, %94 : vector<16x16xf32>
    %cst_37 = arith.constant dense<0xFF800000> : vector<16xf32>
    %100 = vector.multi_reduction <maximumf>, %99, %cst_37 [1] : vector<16x16xf32> to vector<16xf32>
    %101 = vector.shape_cast %100 : vector<16xf32> to vector<16x1xf32>
    %102 = vector.broadcast %101 : vector<16x1xf32> to vector<16x16xf32>
    %103 = arith.subf %99, %102 : vector<16x16xf32>
    %104 = math.exp %103 : vector<16x16xf32>
    %cst_38 = arith.constant dense<0.000000e+00> : vector<16xf32>
    %105 = vector.multi_reduction <add>, %104, %cst_38 [1] : vector<16x16xf32> to vector<16xf32>
    %106 = vector.shape_cast %105 : vector<16xf32> to vector<16x1xf32>
    %107 = vector.broadcast %106 : vector<16x1xf32> to vector<16x16xf32>
    %108 = arith.divf %104, %107 : vector<16x16xf32>
    %cst_39 = arith.constant dense<0.000000e+00> : vector<16x8xf32>
    %109 = tpu.matmul %108, %97, %cst_39 {dimension_numbers = #tpu.dot_dimension_numbers<[1], [0], [0], [1], [0, 0, 1, 1], [], []>} : vector<16x16xf32>, vector<16x8xf32>, vector<16x8xf32> -> vector<16x8xf32>
    %110 = vector.extract_strided_slice %15 {offsets = [0, 0], sizes = [8, 32], strides = [1, 1]} : vector<32x32xf32> to vector<8x32xf32>
    %cst_40 = arith.constant dense<0.000000e+00> : vector<16x32xf32>
    %111 = tpu.matmul %109, %110, %cst_40 {dimension_numbers = #tpu.dot_dimension_numbers<[1], [0], [0], [1], [0, 0, 1, 1], [], []>} : vector<16x8xf32>, vector<8x32xf32>, vector<16x32xf32> -> vector<16x32xf32>
    %112 = vector.extract_strided_slice %93 {offsets = [0, 8], sizes = [16, 8], strides = [1, 1]} : vector<16x96xf32> to vector<16x8xf32>
    %113 = vector.extract_strided_slice %93 {offsets = [0, 40], sizes = [16, 8], strides = [1, 1]} : vector<16x96xf32> to vector<16x8xf32>
    %114 = vector.extract_strided_slice %93 {offsets = [0, 72], sizes = [16, 8], strides = [1, 1]} : vector<16x96xf32> to vector<16x8xf32>
    %cst_41 = arith.constant dense<0.000000e+00> : vector<16x16xf32>
    %115 = tpu.matmul %112, %113, %cst_41 {dimension_numbers = #tpu.dot_dimension_numbers<[1], [1], [0], [0], [0, 0, 1, 0], [], []>} : vector<16x8xf32>, vector<16x8xf32>, vector<16x16xf32> -> vector<16x16xf32>
    %116 = arith.addf %115, %94 : vector<16x16xf32>
    %cst_42 = arith.constant dense<0xFF800000> : vector<16xf32>
    %117 = vector.multi_reduction <maximumf>, %116, %cst_42 [1] : vector<16x16xf32> to vector<16xf32>
    %118 = vector.shape_cast %117 : vector<16xf32> to vector<16x1xf32>
    %119 = vector.broadcast %118 : vector<16x1xf32> to vector<16x16xf32>
    %120 = arith.subf %116, %119 : vector<16x16xf32>
    %121 = math.exp %120 : vector<16x16xf32>
    %cst_43 = arith.constant dense<0.000000e+00> : vector<16xf32>
    %122 = vector.multi_reduction <add>, %121, %cst_43 [1] : vector<16x16xf32> to vector<16xf32>
    %123 = vector.shape_cast %122 : vector<16xf32> to vector<16x1xf32>
    %124 = vector.broadcast %123 : vector<16x1xf32> to vector<16x16xf32>
    %125 = arith.divf %121, %124 : vector<16x16xf32>
    %cst_44 = arith.constant dense<0.000000e+00> : vector<16x8xf32>
    %126 = tpu.matmul %125, %114, %cst_44 {dimension_numbers = #tpu.dot_dimension_numbers<[1], [0], [0], [1], [0, 0, 1, 1], [], []>} : vector<16x16xf32>, vector<16x8xf32>, vector<16x8xf32> -> vector<16x8xf32>
    %127 = vector.extract_strided_slice %15 {offsets = [8, 0], sizes = [8, 32], strides = [1, 1]} : vector<32x32xf32> to vector<8x32xf32>
    %cst_45 = arith.constant dense<0.000000e+00> : vector<16x32xf32>
    %128 = tpu.matmul %126, %127, %cst_45 {dimension_numbers = #tpu.dot_dimension_numbers<[1], [0], [0], [1], [0, 0, 1, 1], [], []>} : vector<16x8xf32>, vector<8x32xf32>, vector<16x32xf32> -> vector<16x32xf32>
    %129 = arith.addf %111, %128 : vector<16x32xf32>
    %130 = vector.extract_strided_slice %93 {offsets = [0, 16], sizes = [16, 8], strides = [1, 1]} : vector<16x96xf32> to vector<16x8xf32>
    %131 = vector.extract_strided_slice %93 {offsets = [0, 48], sizes = [16, 8], strides = [1, 1]} : vector<16x96xf32> to vector<16x8xf32>
    %132 = vector.extract_strided_slice %93 {offsets = [0, 80], sizes = [16, 8], strides = [1, 1]} : vector<16x96xf32> to vector<16x8xf32>
    %cst_46 = arith.constant dense<0.000000e+00> : vector<16x16xf32>
    %133 = tpu.matmul %130, %131, %cst_46 {dimension_numbers = #tpu.dot_dimension_numbers<[1], [1], [0], [0], [0, 0, 1, 0], [], []>} : vector<16x8xf32>, vector<16x8xf32>, vector<16x16xf32> -> vector<16x16xf32>
    %134 = arith.addf %133, %94 : vector<16x16xf32>
    %cst_47 = arith.constant dense<0xFF800000> : vector<16xf32>
    %135 = vector.multi_reduction <maximumf>, %134, %cst_47 [1] : vector<16x16xf32> to vector<16xf32>
    %136 = vector.shape_cast %135 : vector<16xf32> to vector<16x1xf32>
    %137 = vector.broadcast %136 : vector<16x1xf32> to vector<16x16xf32>
    %138 = arith.subf %134, %137 : vector<16x16xf32>
    %139 = math.exp %138 : vector<16x16xf32>
    %cst_48 = arith.constant dense<0.000000e+00> : vector<16xf32>
    %140 = vector.multi_reduction <add>, %139, %cst_48 [1] : vector<16x16xf32> to vector<16xf32>
    %141 = vector.shape_cast %140 : vector<16xf32> to vector<16x1xf32>
    %142 = vector.broadcast %141 : vector<16x1xf32> to vector<16x16xf32>
    %143 = arith.divf %139, %142 : vector<16x16xf32>
    %cst_49 = arith.constant dense<0.000000e+00> : vector<16x8xf32>
    %144 = tpu.matmul %143, %132, %cst_49 {dimension_numbers = #tpu.dot_dimension_numbers<[1], [0], [0], [1], [0, 0, 1, 1], [], []>} : vector<16x16xf32>, vector<16x8xf32>, vector<16x8xf32> -> vector<16x8xf32>
    %145 = vector.extract_strided_slice %15 {offsets = [16, 0], sizes = [8, 32], strides = [1, 1]} : vector<32x32xf32> to vector<8x32xf32>
    %cst_50 = arith.constant dense<0.000000e+00> : vector<16x32xf32>
    %146 = tpu.matmul %144, %145, %cst_50 {dimension_numbers = #tpu.dot_dimension_numbers<[1], [0], [0], [1], [0, 0, 1, 1], [], []>} : vector<16x8xf32>, vector<8x32xf32>, vector<16x32xf32> -> vector<16x32xf32>
    %147 = arith.addf %129, %146 : vector<16x32xf32>
    %148 = vector.extract_strided_slice %93 {offsets = [0, 24], sizes = [16, 8], strides = [1, 1]} : vector<16x96xf32> to vector<16x8xf32>
    %149 = vector.extract_strided_slice %93 {offsets = [0, 56], sizes = [16, 8], strides = [1, 1]} : vector<16x96xf32> to vector<16x8xf32>
    %150 = vector.extract_strided_slice %93 {offsets = [0, 88], sizes = [16, 8], strides = [1, 1]} : vector<16x96xf32> to vector<16x8xf32>
    %cst_51 = arith.constant dense<0.000000e+00> : vector<16x16xf32>
    %151 = tpu.matmul %148, %149, %cst_51 {dimension_numbers = #tpu.dot_dimension_numbers<[1], [1], [0], [0], [0, 0, 1, 0], [], []>} : vector<16x8xf32>, vector<16x8xf32>, vector<16x16xf32> -> vector<16x16xf32>
    %152 = arith.addf %151, %94 : vector<16x16xf32>
    %cst_52 = arith.constant dense<0xFF800000> : vector<16xf32>
    %153 = vector.multi_reduction <maximumf>, %152, %cst_52 [1] : vector<16x16xf32> to vector<16xf32>
    %154 = vector.shape_cast %153 : vector<16xf32> to vector<16x1xf32>
    %155 = vector.broadcast %154 : vector<16x1xf32> to vector<16x16xf32>
    %156 = arith.subf %152, %155 : vector<16x16xf32>
    %157 = math.exp %156 : vector<16x16xf32>
    %cst_53 = arith.constant dense<0.000000e+00> : vector<16xf32>
    %158 = vector.multi_reduction <add>, %157, %cst_53 [1] : vector<16x16xf32> to vector<16xf32>
    %159 = vector.shape_cast %158 : vector<16xf32> to vector<16x1xf32>
    %160 = vector.broadcast %159 : vector<16x1xf32> to vector<16x16xf32>
    %161 = arith.divf %157, %160 : vector<16x16xf32>
    %cst_54 = arith.constant dense<0.000000e+00> : vector<16x8xf32>
    %162 = tpu.matmul %161, %150, %cst_54 {dimension_numbers = #tpu.dot_dimension_numbers<[1], [0], [0], [1], [0, 0, 1, 1], [], []>} : vector<16x16xf32>, vector<16x8xf32>, vector<16x8xf32> -> vector<16x8xf32>
    %163 = vector.extract_strided_slice %15 {offsets = [24, 0], sizes = [8, 32], strides = [1, 1]} : vector<32x32xf32> to vector<8x32xf32>
    %cst_55 = arith.constant dense<0.000000e+00> : vector<16x32xf32>
    %164 = tpu.matmul %162, %163, %cst_55 {dimension_numbers = #tpu.dot_dimension_numbers<[1], [0], [0], [1], [0, 0, 1, 1], [], []>} : vector<16x8xf32>, vector<8x32xf32>, vector<16x32xf32> -> vector<16x32xf32>
    %165 = arith.addf %147, %164 : vector<16x32xf32>
    %166 = tpu.concatenate %92, %165 in 0 : vector<16x32xf32>, vector<16x32xf32> -> vector<32x32xf32>
    %167 = vector.extract_strided_slice %11 {offsets = [1, 0], sizes = [1, 32], strides = [1, 1]} : vector<18x96xf32> to vector<1x32xf32>
    %168 = vector.broadcast %167 : vector<1x32xf32> to vector<32x32xf32>
    %169 = arith.addf %166, %168 : vector<32x32xf32>
    %170 = arith.addf %9, %169 : vector<32x32xf32>
    %171 = vector.extract_strided_slice %11 {offsets = [2, 0], sizes = [1, 32], strides = [1, 1]} : vector<18x96xf32> to vector<1x32xf32>
    %172 = vector.extract_strided_slice %11 {offsets = [3, 0], sizes = [1, 32], strides = [1, 1]} : vector<18x96xf32> to vector<1x32xf32>
    %cst_56 = arith.constant dense<0.000000e+00> : vector<32xf32>
    %173 = vector.multi_reduction <add>, %170, %cst_56 [1] : vector<32x32xf32> to vector<32xf32>
    %174 = vector.shape_cast %173 : vector<32xf32> to vector<32x1xf32>
    %cst_57 = arith.constant 3.200000e+01 : f32
    %175 = vector.broadcast %cst_57 : f32 to vector<32x1xf32>
    %176 = arith.divf %174, %175 : vector<32x1xf32>
    %177 = vector.broadcast %176 : vector<32x1xf32> to vector<32x32xf32>
    %178 = arith.subf %170, %177 : vector<32x32xf32>
    %179 = arith.mulf %178, %178 : vector<32x32xf32>
    %cst_58 = arith.constant dense<0.000000e+00> : vector<32xf32>
    %180 = vector.multi_reduction <add>, %179, %cst_58 [1] : vector<32x32xf32> to vector<32xf32>
    %181 = vector.shape_cast %180 : vector<32xf32> to vector<32x1xf32>
    %cst_59 = arith.constant 3.200000e+01 : f32
    %182 = vector.broadcast %cst_59 : f32 to vector<32x1xf32>
    %183 = arith.divf %181, %182 : vector<32x1xf32>
    %184 = vector.broadcast %176 : vector<32x1xf32> to vector<32x32xf32>
    %185 = arith.subf %170, %184 : vector<32x32xf32>
    %cst_60 = arith.constant 9.99999974E-6 : f32
    %186 = vector.broadcast %cst_60 : f32 to vector<32x1xf32>
    %187 = arith.addf %183, %186 : vector<32x1xf32>
    %188 = math.rsqrt %187 : vector<32x1xf32>
    %189 = vector.broadcast %188 : vector<32x1xf32> to vector<32x32xf32>
    %190 = arith.mulf %185, %189 : vector<32x32xf32>
    %191 = vector.broadcast %171 : vector<1x32xf32> to vector<32x32xf32>
    %192 = arith.mulf %190, %191 : vector<32x32xf32>
    %193 = vector.broadcast %172 : vector<1x32xf32> to vector<32x32xf32>
    %194 = arith.addf %192, %193 : vector<32x32xf32>
    %c0_61 = arith.constant 0 : index
    %c0_62 = arith.constant 0 : index
    %c0_63 = arith.constant 0 : index
    %195 = vector.load %arg7[%c0_61, %c0_62, %c0_63] : memref<2x32x64xf32, #tpu.memory_space<vmem>>, vector<1x32x64xf32>
    %196 = vector.shape_cast %195 : vector<1x32x64xf32> to vector<32x64xf32>
    %cst_64 = arith.constant dense<0.000000e+00> : vector<32x64xf32>
    %197 = tpu.matmul %194, %196, %cst_64 {dimension_numbers = #tpu.dot_dimension_numbers<[1], [0], [0], [1], [0, 0, 1, 1], [], []>} : vector<32x32xf32>, vector<32x64xf32>, vector<32x64xf32> -> vector<32x64xf32>
    %198 = vector.extract_strided_slice %11 {offsets = [4, 0], sizes = [1, 64], strides = [1, 1]} : vector<18x96xf32> to vector<1x64xf32>
    %199 = vector.broadcast %198 : vector<1x64xf32> to vector<32x64xf32>
    %200 = arith.addf %197, %199 : vector<32x64xf32>
    %cst_65 = arith.constant 0.000000e+00 : f32
    %201 = vector.broadcast %cst_65 : f32 to vector<32x64xf32>
    %202 = arith.maximumf %200, %201 : vector<32x64xf32>
    %c0_66 = arith.constant 0 : index
    %c0_67 = arith.constant 0 : index
    %c0_68 = arith.constant 0 : index
    %203 = vector.load %arg8[%c0_66, %c0_67, %c0_68] : memref<2x64x32xf32, #tpu.memory_space<vmem>>, vector<1x64x32xf32>
    %204 = vector.shape_cast %203 : vector<1x64x32xf32> to vector<64x32xf32>
    %cst_69 = arith.constant dense<0.000000e+00> : vector<32x32xf32>
    %205 = tpu.matmul %202, %204, %cst_69 {dimension_numbers = #tpu.dot_dimension_numbers<[1], [0], [0], [1], [0, 0, 1, 1], [], []>} : vector<32x64xf32>, vector<64x32xf32>, vector<32x32xf32> -> vector<32x32xf32>
    %206 = vector.extract_strided_slice %11 {offsets = [5, 0], sizes = [1, 32], strides = [1, 1]} : vector<18x96xf32> to vector<1x32xf32>
    %207 = vector.broadcast %206 : vector<1x32xf32> to vector<32x32xf32>
    %208 = arith.addf %205, %207 : vector<32x32xf32>
    %209 = arith.addf %194, %208 : vector<32x32xf32>
    %210 = vector.extract_strided_slice %11 {offsets = [6, 0], sizes = [1, 32], strides = [1, 1]} : vector<18x96xf32> to vector<1x32xf32>
    %211 = vector.extract_strided_slice %11 {offsets = [7, 0], sizes = [1, 32], strides = [1, 1]} : vector<18x96xf32> to vector<1x32xf32>
    %cst_70 = arith.constant dense<0.000000e+00> : vector<32xf32>
    %212 = vector.multi_reduction <add>, %209, %cst_70 [1] : vector<32x32xf32> to vector<32xf32>
    %213 = vector.shape_cast %212 : vector<32xf32> to vector<32x1xf32>
    %cst_71 = arith.constant 3.200000e+01 : f32
    %214 = vector.broadcast %cst_71 : f32 to vector<32x1xf32>
    %215 = arith.divf %213, %214 : vector<32x1xf32>
    %216 = vector.broadcast %215 : vector<32x1xf32> to vector<32x32xf32>
    %217 = arith.subf %209, %216 : vector<32x32xf32>
    %218 = arith.mulf %217, %217 : vector<32x32xf32>
    %cst_72 = arith.constant dense<0.000000e+00> : vector<32xf32>
    %219 = vector.multi_reduction <add>, %218, %cst_72 [1] : vector<32x32xf32> to vector<32xf32>
    %220 = vector.shape_cast %219 : vector<32xf32> to vector<32x1xf32>
    %cst_73 = arith.constant 3.200000e+01 : f32
    %221 = vector.broadcast %cst_73 : f32 to vector<32x1xf32>
    %222 = arith.divf %220, %221 : vector<32x1xf32>
    %223 = vector.broadcast %215 : vector<32x1xf32> to vector<32x32xf32>
    %224 = arith.subf %209, %223 : vector<32x32xf32>
    %cst_74 = arith.constant 9.99999974E-6 : f32
    %225 = vector.broadcast %cst_74 : f32 to vector<32x1xf32>
    %226 = arith.addf %222, %225 : vector<32x1xf32>
    %227 = math.rsqrt %226 : vector<32x1xf32>
    %228 = vector.broadcast %227 : vector<32x1xf32> to vector<32x32xf32>
    %229 = arith.mulf %224, %228 : vector<32x32xf32>
    %230 = vector.broadcast %210 : vector<1x32xf32> to vector<32x32xf32>
    %231 = arith.mulf %229, %230 : vector<32x32xf32>
    %232 = vector.broadcast %211 : vector<1x32xf32> to vector<32x32xf32>
    %233 = arith.addf %231, %232 : vector<32x32xf32>
    %c1 = arith.constant 1 : index
    %c0_75 = arith.constant 0 : index
    %c0_76 = arith.constant 0 : index
    %234 = vector.load %arg5[%c1, %c0_75, %c0_76] : memref<2x32x96xf32, #tpu.memory_space<vmem>>, vector<1x32x96xf32>
    %235 = vector.shape_cast %234 : vector<1x32x96xf32> to vector<32x96xf32>
    %c1_77 = arith.constant 1 : index
    %c0_78 = arith.constant 0 : index
    %c0_79 = arith.constant 0 : index
    %236 = vector.load %arg6[%c1_77, %c0_78, %c0_79] : memref<2x32x32xf32, #tpu.memory_space<vmem>>, vector<1x32x32xf32>
    %237 = vector.shape_cast %236 : vector<1x32x32xf32> to vector<32x32xf32>
    %cst_80 = arith.constant dense<0.000000e+00> : vector<32x96xf32>
    %238 = tpu.matmul %233, %235, %cst_80 {dimension_numbers = #tpu.dot_dimension_numbers<[1], [0], [0], [1], [0, 0, 1, 1], [], []>} : vector<32x32xf32>, vector<32x96xf32>, vector<32x96xf32> -> vector<32x96xf32>
    %239 = vector.extract_strided_slice %11 {offsets = [8, 0], sizes = [1, 96], strides = [1, 1]} : vector<18x96xf32> to vector<1x96xf32>
    %240 = vector.broadcast %239 : vector<1x96xf32> to vector<32x96xf32>
    %241 = arith.addf %238, %240 : vector<32x96xf32>
    %242 = vector.extract_strided_slice %241 {offsets = [0, 0], sizes = [16, 96], strides = [1, 1]} : vector<32x96xf32> to vector<16x96xf32>
    %243 = vector.extract_strided_slice %10 {offsets = [0, 0], sizes = [16, 16], strides = [1, 1]} : vector<32x16xf32> to vector<16x16xf32>
    %244 = vector.extract_strided_slice %242 {offsets = [0, 0], sizes = [16, 8], strides = [1, 1]} : vector<16x96xf32> to vector<16x8xf32>
    %245 = vector.extract_strided_slice %242 {offsets = [0, 32], sizes = [16, 8], strides = [1, 1]} : vector<16x96xf32> to vector<16x8xf32>
    %246 = vector.extract_strided_slice %242 {offsets = [0, 64], sizes = [16, 8], strides = [1, 1]} : vector<16x96xf32> to vector<16x8xf32>
    %cst_81 = arith.constant dense<0.000000e+00> : vector<16x16xf32>
    %247 = tpu.matmul %244, %245, %cst_81 {dimension_numbers = #tpu.dot_dimension_numbers<[1], [1], [0], [0], [0, 0, 1, 0], [], []>} : vector<16x8xf32>, vector<16x8xf32>, vector<16x16xf32> -> vector<16x16xf32>
    %248 = arith.addf %247, %243 : vector<16x16xf32>
    %cst_82 = arith.constant dense<0xFF800000> : vector<16xf32>
    %249 = vector.multi_reduction <maximumf>, %248, %cst_82 [1] : vector<16x16xf32> to vector<16xf32>
    %250 = vector.shape_cast %249 : vector<16xf32> to vector<16x1xf32>
    %251 = vector.broadcast %250 : vector<16x1xf32> to vector<16x16xf32>
    %252 = arith.subf %248, %251 : vector<16x16xf32>
    %253 = math.exp %252 : vector<16x16xf32>
    %cst_83 = arith.constant dense<0.000000e+00> : vector<16xf32>
    %254 = vector.multi_reduction <add>, %253, %cst_83 [1] : vector<16x16xf32> to vector<16xf32>
    %255 = vector.shape_cast %254 : vector<16xf32> to vector<16x1xf32>
    %256 = vector.broadcast %255 : vector<16x1xf32> to vector<16x16xf32>
    %257 = arith.divf %253, %256 : vector<16x16xf32>
    %cst_84 = arith.constant dense<0.000000e+00> : vector<16x8xf32>
    %258 = tpu.matmul %257, %246, %cst_84 {dimension_numbers = #tpu.dot_dimension_numbers<[1], [0], [0], [1], [0, 0, 1, 1], [], []>} : vector<16x16xf32>, vector<16x8xf32>, vector<16x8xf32> -> vector<16x8xf32>
    %259 = vector.extract_strided_slice %237 {offsets = [0, 0], sizes = [8, 32], strides = [1, 1]} : vector<32x32xf32> to vector<8x32xf32>
    %cst_85 = arith.constant dense<0.000000e+00> : vector<16x32xf32>
    %260 = tpu.matmul %258, %259, %cst_85 {dimension_numbers = #tpu.dot_dimension_numbers<[1], [0], [0], [1], [0, 0, 1, 1], [], []>} : vector<16x8xf32>, vector<8x32xf32>, vector<16x32xf32> -> vector<16x32xf32>
    %261 = vector.extract_strided_slice %242 {offsets = [0, 8], sizes = [16, 8], strides = [1, 1]} : vector<16x96xf32> to vector<16x8xf32>
    %262 = vector.extract_strided_slice %242 {offsets = [0, 40], sizes = [16, 8], strides = [1, 1]} : vector<16x96xf32> to vector<16x8xf32>
    %263 = vector.extract_strided_slice %242 {offsets = [0, 72], sizes = [16, 8], strides = [1, 1]} : vector<16x96xf32> to vector<16x8xf32>
    %cst_86 = arith.constant dense<0.000000e+00> : vector<16x16xf32>
    %264 = tpu.matmul %261, %262, %cst_86 {dimension_numbers = #tpu.dot_dimension_numbers<[1], [1], [0], [0], [0, 0, 1, 0], [], []>} : vector<16x8xf32>, vector<16x8xf32>, vector<16x16xf32> -> vector<16x16xf32>
    %265 = arith.addf %264, %243 : vector<16x16xf32>
    %cst_87 = arith.constant dense<0xFF800000> : vector<16xf32>
    %266 = vector.multi_reduction <maximumf>, %265, %cst_87 [1] : vector<16x16xf32> to vector<16xf32>
    %267 = vector.shape_cast %266 : vector<16xf32> to vector<16x1xf32>
    %268 = vector.broadcast %267 : vector<16x1xf32> to vector<16x16xf32>
    %269 = arith.subf %265, %268 : vector<16x16xf32>
    %270 = math.exp %269 : vector<16x16xf32>
    %cst_88 = arith.constant dense<0.000000e+00> : vector<16xf32>
    %271 = vector.multi_reduction <add>, %270, %cst_88 [1] : vector<16x16xf32> to vector<16xf32>
    %272 = vector.shape_cast %271 : vector<16xf32> to vector<16x1xf32>
    %273 = vector.broadcast %272 : vector<16x1xf32> to vector<16x16xf32>
    %274 = arith.divf %270, %273 : vector<16x16xf32>
    %cst_89 = arith.constant dense<0.000000e+00> : vector<16x8xf32>
    %275 = tpu.matmul %274, %263, %cst_89 {dimension_numbers = #tpu.dot_dimension_numbers<[1], [0], [0], [1], [0, 0, 1, 1], [], []>} : vector<16x16xf32>, vector<16x8xf32>, vector<16x8xf32> -> vector<16x8xf32>
    %276 = vector.extract_strided_slice %237 {offsets = [8, 0], sizes = [8, 32], strides = [1, 1]} : vector<32x32xf32> to vector<8x32xf32>
    %cst_90 = arith.constant dense<0.000000e+00> : vector<16x32xf32>
    %277 = tpu.matmul %275, %276, %cst_90 {dimension_numbers = #tpu.dot_dimension_numbers<[1], [0], [0], [1], [0, 0, 1, 1], [], []>} : vector<16x8xf32>, vector<8x32xf32>, vector<16x32xf32> -> vector<16x32xf32>
    %278 = arith.addf %260, %277 : vector<16x32xf32>
    %279 = vector.extract_strided_slice %242 {offsets = [0, 16], sizes = [16, 8], strides = [1, 1]} : vector<16x96xf32> to vector<16x8xf32>
    %280 = vector.extract_strided_slice %242 {offsets = [0, 48], sizes = [16, 8], strides = [1, 1]} : vector<16x96xf32> to vector<16x8xf32>
    %281 = vector.extract_strided_slice %242 {offsets = [0, 80], sizes = [16, 8], strides = [1, 1]} : vector<16x96xf32> to vector<16x8xf32>
    %cst_91 = arith.constant dense<0.000000e+00> : vector<16x16xf32>
    %282 = tpu.matmul %279, %280, %cst_91 {dimension_numbers = #tpu.dot_dimension_numbers<[1], [1], [0], [0], [0, 0, 1, 0], [], []>} : vector<16x8xf32>, vector<16x8xf32>, vector<16x16xf32> -> vector<16x16xf32>
    %283 = arith.addf %282, %243 : vector<16x16xf32>
    %cst_92 = arith.constant dense<0xFF800000> : vector<16xf32>
    %284 = vector.multi_reduction <maximumf>, %283, %cst_92 [1] : vector<16x16xf32> to vector<16xf32>
    %285 = vector.shape_cast %284 : vector<16xf32> to vector<16x1xf32>
    %286 = vector.broadcast %285 : vector<16x1xf32> to vector<16x16xf32>
    %287 = arith.subf %283, %286 : vector<16x16xf32>
    %288 = math.exp %287 : vector<16x16xf32>
    %cst_93 = arith.constant dense<0.000000e+00> : vector<16xf32>
    %289 = vector.multi_reduction <add>, %288, %cst_93 [1] : vector<16x16xf32> to vector<16xf32>
    %290 = vector.shape_cast %289 : vector<16xf32> to vector<16x1xf32>
    %291 = vector.broadcast %290 : vector<16x1xf32> to vector<16x16xf32>
    %292 = arith.divf %288, %291 : vector<16x16xf32>
    %cst_94 = arith.constant dense<0.000000e+00> : vector<16x8xf32>
    %293 = tpu.matmul %292, %281, %cst_94 {dimension_numbers = #tpu.dot_dimension_numbers<[1], [0], [0], [1], [0, 0, 1, 1], [], []>} : vector<16x16xf32>, vector<16x8xf32>, vector<16x8xf32> -> vector<16x8xf32>
    %294 = vector.extract_strided_slice %237 {offsets = [16, 0], sizes = [8, 32], strides = [1, 1]} : vector<32x32xf32> to vector<8x32xf32>
    %cst_95 = arith.constant dense<0.000000e+00> : vector<16x32xf32>
    %295 = tpu.matmul %293, %294, %cst_95 {dimension_numbers = #tpu.dot_dimension_numbers<[1], [0], [0], [1], [0, 0, 1, 1], [], []>} : vector<16x8xf32>, vector<8x32xf32>, vector<16x32xf32> -> vector<16x32xf32>
    %296 = arith.addf %278, %295 : vector<16x32xf32>
    %297 = vector.extract_strided_slice %242 {offsets = [0, 24], sizes = [16, 8], strides = [1, 1]} : vector<16x96xf32> to vector<16x8xf32>
    %298 = vector.extract_strided_slice %242 {offsets = [0, 56], sizes = [16, 8], strides = [1, 1]} : vector<16x96xf32> to vector<16x8xf32>
    %299 = vector.extract_strided_slice %242 {offsets = [0, 88], sizes = [16, 8], strides = [1, 1]} : vector<16x96xf32> to vector<16x8xf32>
    %cst_96 = arith.constant dense<0.000000e+00> : vector<16x16xf32>
    %300 = tpu.matmul %297, %298, %cst_96 {dimension_numbers = #tpu.dot_dimension_numbers<[1], [1], [0], [0], [0, 0, 1, 0], [], []>} : vector<16x8xf32>, vector<16x8xf32>, vector<16x16xf32> -> vector<16x16xf32>
    %301 = arith.addf %300, %243 : vector<16x16xf32>
    %cst_97 = arith.constant dense<0xFF800000> : vector<16xf32>
    %302 = vector.multi_reduction <maximumf>, %301, %cst_97 [1] : vector<16x16xf32> to vector<16xf32>
    %303 = vector.shape_cast %302 : vector<16xf32> to vector<16x1xf32>
    %304 = vector.broadcast %303 : vector<16x1xf32> to vector<16x16xf32>
    %305 = arith.subf %301, %304 : vector<16x16xf32>
    %306 = math.exp %305 : vector<16x16xf32>
    %cst_98 = arith.constant dense<0.000000e+00> : vector<16xf32>
    %307 = vector.multi_reduction <add>, %306, %cst_98 [1] : vector<16x16xf32> to vector<16xf32>
    %308 = vector.shape_cast %307 : vector<16xf32> to vector<16x1xf32>
    %309 = vector.broadcast %308 : vector<16x1xf32> to vector<16x16xf32>
    %310 = arith.divf %306, %309 : vector<16x16xf32>
    %cst_99 = arith.constant dense<0.000000e+00> : vector<16x8xf32>
    %311 = tpu.matmul %310, %299, %cst_99 {dimension_numbers = #tpu.dot_dimension_numbers<[1], [0], [0], [1], [0, 0, 1, 1], [], []>} : vector<16x16xf32>, vector<16x8xf32>, vector<16x8xf32> -> vector<16x8xf32>
    %312 = vector.extract_strided_slice %237 {offsets = [24, 0], sizes = [8, 32], strides = [1, 1]} : vector<32x32xf32> to vector<8x32xf32>
    %cst_100 = arith.constant dense<0.000000e+00> : vector<16x32xf32>
    %313 = tpu.matmul %311, %312, %cst_100 {dimension_numbers = #tpu.dot_dimension_numbers<[1], [0], [0], [1], [0, 0, 1, 1], [], []>} : vector<16x8xf32>, vector<8x32xf32>, vector<16x32xf32> -> vector<16x32xf32>
    %314 = arith.addf %296, %313 : vector<16x32xf32>
    %315 = vector.extract_strided_slice %241 {offsets = [16, 0], sizes = [16, 96], strides = [1, 1]} : vector<32x96xf32> to vector<16x96xf32>
    %316 = vector.extract_strided_slice %10 {offsets = [16, 0], sizes = [16, 16], strides = [1, 1]} : vector<32x16xf32> to vector<16x16xf32>
    %317 = vector.extract_strided_slice %315 {offsets = [0, 0], sizes = [16, 8], strides = [1, 1]} : vector<16x96xf32> to vector<16x8xf32>
    %318 = vector.extract_strided_slice %315 {offsets = [0, 32], sizes = [16, 8], strides = [1, 1]} : vector<16x96xf32> to vector<16x8xf32>
    %319 = vector.extract_strided_slice %315 {offsets = [0, 64], sizes = [16, 8], strides = [1, 1]} : vector<16x96xf32> to vector<16x8xf32>
    %cst_101 = arith.constant dense<0.000000e+00> : vector<16x16xf32>
    %320 = tpu.matmul %317, %318, %cst_101 {dimension_numbers = #tpu.dot_dimension_numbers<[1], [1], [0], [0], [0, 0, 1, 0], [], []>} : vector<16x8xf32>, vector<16x8xf32>, vector<16x16xf32> -> vector<16x16xf32>
    %321 = arith.addf %320, %316 : vector<16x16xf32>
    %cst_102 = arith.constant dense<0xFF800000> : vector<16xf32>
    %322 = vector.multi_reduction <maximumf>, %321, %cst_102 [1] : vector<16x16xf32> to vector<16xf32>
    %323 = vector.shape_cast %322 : vector<16xf32> to vector<16x1xf32>
    %324 = vector.broadcast %323 : vector<16x1xf32> to vector<16x16xf32>
    %325 = arith.subf %321, %324 : vector<16x16xf32>
    %326 = math.exp %325 : vector<16x16xf32>
    %cst_103 = arith.constant dense<0.000000e+00> : vector<16xf32>
    %327 = vector.multi_reduction <add>, %326, %cst_103 [1] : vector<16x16xf32> to vector<16xf32>
    %328 = vector.shape_cast %327 : vector<16xf32> to vector<16x1xf32>
    %329 = vector.broadcast %328 : vector<16x1xf32> to vector<16x16xf32>
    %330 = arith.divf %326, %329 : vector<16x16xf32>
    %cst_104 = arith.constant dense<0.000000e+00> : vector<16x8xf32>
    %331 = tpu.matmul %330, %319, %cst_104 {dimension_numbers = #tpu.dot_dimension_numbers<[1], [0], [0], [1], [0, 0, 1, 1], [], []>} : vector<16x16xf32>, vector<16x8xf32>, vector<16x8xf32> -> vector<16x8xf32>
    %332 = vector.extract_strided_slice %237 {offsets = [0, 0], sizes = [8, 32], strides = [1, 1]} : vector<32x32xf32> to vector<8x32xf32>
    %cst_105 = arith.constant dense<0.000000e+00> : vector<16x32xf32>
    %333 = tpu.matmul %331, %332, %cst_105 {dimension_numbers = #tpu.dot_dimension_numbers<[1], [0], [0], [1], [0, 0, 1, 1], [], []>} : vector<16x8xf32>, vector<8x32xf32>, vector<16x32xf32> -> vector<16x32xf32>
    %334 = vector.extract_strided_slice %315 {offsets = [0, 8], sizes = [16, 8], strides = [1, 1]} : vector<16x96xf32> to vector<16x8xf32>
    %335 = vector.extract_strided_slice %315 {offsets = [0, 40], sizes = [16, 8], strides = [1, 1]} : vector<16x96xf32> to vector<16x8xf32>
    %336 = vector.extract_strided_slice %315 {offsets = [0, 72], sizes = [16, 8], strides = [1, 1]} : vector<16x96xf32> to vector<16x8xf32>
    %cst_106 = arith.constant dense<0.000000e+00> : vector<16x16xf32>
    %337 = tpu.matmul %334, %335, %cst_106 {dimension_numbers = #tpu.dot_dimension_numbers<[1], [1], [0], [0], [0, 0, 1, 0], [], []>} : vector<16x8xf32>, vector<16x8xf32>, vector<16x16xf32> -> vector<16x16xf32>
    %338 = arith.addf %337, %316 : vector<16x16xf32>
    %cst_107 = arith.constant dense<0xFF800000> : vector<16xf32>
    %339 = vector.multi_reduction <maximumf>, %338, %cst_107 [1] : vector<16x16xf32> to vector<16xf32>
    %340 = vector.shape_cast %339 : vector<16xf32> to vector<16x1xf32>
    %341 = vector.broadcast %340 : vector<16x1xf32> to vector<16x16xf32>
    %342 = arith.subf %338, %341 : vector<16x16xf32>
    %343 = math.exp %342 : vector<16x16xf32>
    %cst_108 = arith.constant dense<0.000000e+00> : vector<16xf32>
    %344 = vector.multi_reduction <add>, %343, %cst_108 [1] : vector<16x16xf32> to vector<16xf32>
    %345 = vector.shape_cast %344 : vector<16xf32> to vector<16x1xf32>
    %346 = vector.broadcast %345 : vector<16x1xf32> to vector<16x16xf32>
    %347 = arith.divf %343, %346 : vector<16x16xf32>
    %cst_109 = arith.constant dense<0.000000e+00> : vector<16x8xf32>
    %348 = tpu.matmul %347, %336, %cst_109 {dimension_numbers = #tpu.dot_dimension_numbers<[1], [0], [0], [1], [0, 0, 1, 1], [], []>} : vector<16x16xf32>, vector<16x8xf32>, vector<16x8xf32> -> vector<16x8xf32>
    %349 = vector.extract_strided_slice %237 {offsets = [8, 0], sizes = [8, 32], strides = [1, 1]} : vector<32x32xf32> to vector<8x32xf32>
    %cst_110 = arith.constant dense<0.000000e+00> : vector<16x32xf32>
    %350 = tpu.matmul %348, %349, %cst_110 {dimension_numbers = #tpu.dot_dimension_numbers<[1], [0], [0], [1], [0, 0, 1, 1], [], []>} : vector<16x8xf32>, vector<8x32xf32>, vector<16x32xf32> -> vector<16x32xf32>
    %351 = arith.addf %333, %350 : vector<16x32xf32>
    %352 = vector.extract_strided_slice %315 {offsets = [0, 16], sizes = [16, 8], strides = [1, 1]} : vector<16x96xf32> to vector<16x8xf32>
    %353 = vector.extract_strided_slice %315 {offsets = [0, 48], sizes = [16, 8], strides = [1, 1]} : vector<16x96xf32> to vector<16x8xf32>
    %354 = vector.extract_strided_slice %315 {offsets = [0, 80], sizes = [16, 8], strides = [1, 1]} : vector<16x96xf32> to vector<16x8xf32>
    %cst_111 = arith.constant dense<0.000000e+00> : vector<16x16xf32>
    %355 = tpu.matmul %352, %353, %cst_111 {dimension_numbers = #tpu.dot_dimension_numbers<[1], [1], [0], [0], [0, 0, 1, 0], [], []>} : vector<16x8xf32>, vector<16x8xf32>, vector<16x16xf32> -> vector<16x16xf32>
    %356 = arith.addf %355, %316 : vector<16x16xf32>
    %cst_112 = arith.constant dense<0xFF800000> : vector<16xf32>
    %357 = vector.multi_reduction <maximumf>, %356, %cst_112 [1] : vector<16x16xf32> to vector<16xf32>
    %358 = vector.shape_cast %357 : vector<16xf32> to vector<16x1xf32>
    %359 = vector.broadcast %358 : vector<16x1xf32> to vector<16x16xf32>
    %360 = arith.subf %356, %359 : vector<16x16xf32>
    %361 = math.exp %360 : vector<16x16xf32>
    %cst_113 = arith.constant dense<0.000000e+00> : vector<16xf32>
    %362 = vector.multi_reduction <add>, %361, %cst_113 [1] : vector<16x16xf32> to vector<16xf32>
    %363 = vector.shape_cast %362 : vector<16xf32> to vector<16x1xf32>
    %364 = vector.broadcast %363 : vector<16x1xf32> to vector<16x16xf32>
    %365 = arith.divf %361, %364 : vector<16x16xf32>
    %cst_114 = arith.constant dense<0.000000e+00> : vector<16x8xf32>
    %366 = tpu.matmul %365, %354, %cst_114 {dimension_numbers = #tpu.dot_dimension_numbers<[1], [0], [0], [1], [0, 0, 1, 1], [], []>} : vector<16x16xf32>, vector<16x8xf32>, vector<16x8xf32> -> vector<16x8xf32>
    %367 = vector.extract_strided_slice %237 {offsets = [16, 0], sizes = [8, 32], strides = [1, 1]} : vector<32x32xf32> to vector<8x32xf32>
    %cst_115 = arith.constant dense<0.000000e+00> : vector<16x32xf32>
    %368 = tpu.matmul %366, %367, %cst_115 {dimension_numbers = #tpu.dot_dimension_numbers<[1], [0], [0], [1], [0, 0, 1, 1], [], []>} : vector<16x8xf32>, vector<8x32xf32>, vector<16x32xf32> -> vector<16x32xf32>
    %369 = arith.addf %351, %368 : vector<16x32xf32>
    %370 = vector.extract_strided_slice %315 {offsets = [0, 24], sizes = [16, 8], strides = [1, 1]} : vector<16x96xf32> to vector<16x8xf32>
    %371 = vector.extract_strided_slice %315 {offsets = [0, 56], sizes = [16, 8], strides = [1, 1]} : vector<16x96xf32> to vector<16x8xf32>
    %372 = vector.extract_strided_slice %315 {offsets = [0, 88], sizes = [16, 8], strides = [1, 1]} : vector<16x96xf32> to vector<16x8xf32>
    %cst_116 = arith.constant dense<0.000000e+00> : vector<16x16xf32>
    %373 = tpu.matmul %370, %371, %cst_116 {dimension_numbers = #tpu.dot_dimension_numbers<[1], [1], [0], [0], [0, 0, 1, 0], [], []>} : vector<16x8xf32>, vector<16x8xf32>, vector<16x16xf32> -> vector<16x16xf32>
    %374 = arith.addf %373, %316 : vector<16x16xf32>
    %cst_117 = arith.constant dense<0xFF800000> : vector<16xf32>
    %375 = vector.multi_reduction <maximumf>, %374, %cst_117 [1] : vector<16x16xf32> to vector<16xf32>
    %376 = vector.shape_cast %375 : vector<16xf32> to vector<16x1xf32>
    %377 = vector.broadcast %376 : vector<16x1xf32> to vector<16x16xf32>
    %378 = arith.subf %374, %377 : vector<16x16xf32>
    %379 = math.exp %378 : vector<16x16xf32>
    %cst_118 = arith.constant dense<0.000000e+00> : vector<16xf32>
    %380 = vector.multi_reduction <add>, %379, %cst_118 [1] : vector<16x16xf32> to vector<16xf32>
    %381 = vector.shape_cast %380 : vector<16xf32> to vector<16x1xf32>
    %382 = vector.broadcast %381 : vector<16x1xf32> to vector<16x16xf32>
    %383 = arith.divf %379, %382 : vector<16x16xf32>
    %cst_119 = arith.constant dense<0.000000e+00> : vector<16x8xf32>
    %384 = tpu.matmul %383, %372, %cst_119 {dimension_numbers = #tpu.dot_dimension_numbers<[1], [0], [0], [1], [0, 0, 1, 1], [], []>} : vector<16x16xf32>, vector<16x8xf32>, vector<16x8xf32> -> vector<16x8xf32>
    %385 = vector.extract_strided_slice %237 {offsets = [24, 0], sizes = [8, 32], strides = [1, 1]} : vector<32x32xf32> to vector<8x32xf32>
    %cst_120 = arith.constant dense<0.000000e+00> : vector<16x32xf32>
    %386 = tpu.matmul %384, %385, %cst_120 {dimension_numbers = #tpu.dot_dimension_numbers<[1], [0], [0], [1], [0, 0, 1, 1], [], []>} : vector<16x8xf32>, vector<8x32xf32>, vector<16x32xf32> -> vector<16x32xf32>
    %387 = arith.addf %369, %386 : vector<16x32xf32>
    %388 = tpu.concatenate %314, %387 in 0 : vector<16x32xf32>, vector<16x32xf32> -> vector<32x32xf32>
    %389 = vector.extract_strided_slice %11 {offsets = [9, 0], sizes = [1, 32], strides = [1, 1]} : vector<18x96xf32> to vector<1x32xf32>
    %390 = vector.broadcast %389 : vector<1x32xf32> to vector<32x32xf32>
    %391 = arith.addf %388, %390 : vector<32x32xf32>
    %392 = arith.addf %233, %391 : vector<32x32xf32>
    %393 = vector.extract_strided_slice %11 {offsets = [10, 0], sizes = [1, 32], strides = [1, 1]} : vector<18x96xf32> to vector<1x32xf32>
    %394 = vector.extract_strided_slice %11 {offsets = [11, 0], sizes = [1, 32], strides = [1, 1]} : vector<18x96xf32> to vector<1x32xf32>
    %cst_121 = arith.constant dense<0.000000e+00> : vector<32xf32>
    %395 = vector.multi_reduction <add>, %392, %cst_121 [1] : vector<32x32xf32> to vector<32xf32>
    %396 = vector.shape_cast %395 : vector<32xf32> to vector<32x1xf32>
    %cst_122 = arith.constant 3.200000e+01 : f32
    %397 = vector.broadcast %cst_122 : f32 to vector<32x1xf32>
    %398 = arith.divf %396, %397 : vector<32x1xf32>
    %399 = vector.broadcast %398 : vector<32x1xf32> to vector<32x32xf32>
    %400 = arith.subf %392, %399 : vector<32x32xf32>
    %401 = arith.mulf %400, %400 : vector<32x32xf32>
    %cst_123 = arith.constant dense<0.000000e+00> : vector<32xf32>
    %402 = vector.multi_reduction <add>, %401, %cst_123 [1] : vector<32x32xf32> to vector<32xf32>
    %403 = vector.shape_cast %402 : vector<32xf32> to vector<32x1xf32>
    %cst_124 = arith.constant 3.200000e+01 : f32
    %404 = vector.broadcast %cst_124 : f32 to vector<32x1xf32>
    %405 = arith.divf %403, %404 : vector<32x1xf32>
    %406 = vector.broadcast %398 : vector<32x1xf32> to vector<32x32xf32>
    %407 = arith.subf %392, %406 : vector<32x32xf32>
    %cst_125 = arith.constant 9.99999974E-6 : f32
    %408 = vector.broadcast %cst_125 : f32 to vector<32x1xf32>
    %409 = arith.addf %405, %408 : vector<32x1xf32>
    %410 = math.rsqrt %409 : vector<32x1xf32>
    %411 = vector.broadcast %410 : vector<32x1xf32> to vector<32x32xf32>
    %412 = arith.mulf %407, %411 : vector<32x32xf32>
    %413 = vector.broadcast %393 : vector<1x32xf32> to vector<32x32xf32>
    %414 = arith.mulf %412, %413 : vector<32x32xf32>
    %415 = vector.broadcast %394 : vector<1x32xf32> to vector<32x32xf32>
    %416 = arith.addf %414, %415 : vector<32x32xf32>
    %c1_126 = arith.constant 1 : index
    %c0_127 = arith.constant 0 : index
    %c0_128 = arith.constant 0 : index
    %417 = vector.load %arg7[%c1_126, %c0_127, %c0_128] : memref<2x32x64xf32, #tpu.memory_space<vmem>>, vector<1x32x64xf32>
    %418 = vector.shape_cast %417 : vector<1x32x64xf32> to vector<32x64xf32>
    %cst_129 = arith.constant dense<0.000000e+00> : vector<32x64xf32>
    %419 = tpu.matmul %416, %418, %cst_129 {dimension_numbers = #tpu.dot_dimension_numbers<[1], [0], [0], [1], [0, 0, 1, 1], [], []>} : vector<32x32xf32>, vector<32x64xf32>, vector<32x64xf32> -> vector<32x64xf32>
    %420 = vector.extract_strided_slice %11 {offsets = [12, 0], sizes = [1, 64], strides = [1, 1]} : vector<18x96xf32> to vector<1x64xf32>
    %421 = vector.broadcast %420 : vector<1x64xf32> to vector<32x64xf32>
    %422 = arith.addf %419, %421 : vector<32x64xf32>
    %cst_130 = arith.constant 0.000000e+00 : f32
    %423 = vector.broadcast %cst_130 : f32 to vector<32x64xf32>
    %424 = arith.maximumf %422, %423 : vector<32x64xf32>
    %c1_131 = arith.constant 1 : index
    %c0_132 = arith.constant 0 : index
    %c0_133 = arith.constant 0 : index
    %425 = vector.load %arg8[%c1_131, %c0_132, %c0_133] : memref<2x64x32xf32, #tpu.memory_space<vmem>>, vector<1x64x32xf32>
    %426 = vector.shape_cast %425 : vector<1x64x32xf32> to vector<64x32xf32>
    %cst_134 = arith.constant dense<0.000000e+00> : vector<32x32xf32>
    %427 = tpu.matmul %424, %426, %cst_134 {dimension_numbers = #tpu.dot_dimension_numbers<[1], [0], [0], [1], [0, 0, 1, 1], [], []>} : vector<32x64xf32>, vector<64x32xf32>, vector<32x32xf32> -> vector<32x32xf32>
    %428 = vector.extract_strided_slice %11 {offsets = [13, 0], sizes = [1, 32], strides = [1, 1]} : vector<18x96xf32> to vector<1x32xf32>
    %429 = vector.broadcast %428 : vector<1x32xf32> to vector<32x32xf32>
    %430 = arith.addf %427, %429 : vector<32x32xf32>
    %431 = arith.addf %416, %430 : vector<32x32xf32>
    %432 = vector.extract_strided_slice %11 {offsets = [14, 0], sizes = [1, 32], strides = [1, 1]} : vector<18x96xf32> to vector<1x32xf32>
    %433 = vector.extract_strided_slice %11 {offsets = [15, 0], sizes = [1, 32], strides = [1, 1]} : vector<18x96xf32> to vector<1x32xf32>
    %cst_135 = arith.constant dense<0.000000e+00> : vector<32xf32>
    %434 = vector.multi_reduction <add>, %431, %cst_135 [1] : vector<32x32xf32> to vector<32xf32>
    %435 = vector.shape_cast %434 : vector<32xf32> to vector<32x1xf32>
    %cst_136 = arith.constant 3.200000e+01 : f32
    %436 = vector.broadcast %cst_136 : f32 to vector<32x1xf32>
    %437 = arith.divf %435, %436 : vector<32x1xf32>
    %438 = vector.broadcast %437 : vector<32x1xf32> to vector<32x32xf32>
    %439 = arith.subf %431, %438 : vector<32x32xf32>
    %440 = arith.mulf %439, %439 : vector<32x32xf32>
    %cst_137 = arith.constant dense<0.000000e+00> : vector<32xf32>
    %441 = vector.multi_reduction <add>, %440, %cst_137 [1] : vector<32x32xf32> to vector<32xf32>
    %442 = vector.shape_cast %441 : vector<32xf32> to vector<32x1xf32>
    %cst_138 = arith.constant 3.200000e+01 : f32
    %443 = vector.broadcast %cst_138 : f32 to vector<32x1xf32>
    %444 = arith.divf %442, %443 : vector<32x1xf32>
    %445 = vector.broadcast %437 : vector<32x1xf32> to vector<32x32xf32>
    %446 = arith.subf %431, %445 : vector<32x32xf32>
    %cst_139 = arith.constant 9.99999974E-6 : f32
    %447 = vector.broadcast %cst_139 : f32 to vector<32x1xf32>
    %448 = arith.addf %444, %447 : vector<32x1xf32>
    %449 = math.rsqrt %448 : vector<32x1xf32>
    %450 = vector.broadcast %449 : vector<32x1xf32> to vector<32x32xf32>
    %451 = arith.mulf %446, %450 : vector<32x32xf32>
    %452 = vector.broadcast %432 : vector<1x32xf32> to vector<32x32xf32>
    %453 = arith.mulf %451, %452 : vector<32x32xf32>
    %454 = vector.broadcast %433 : vector<1x32xf32> to vector<32x32xf32>
    %455 = arith.addf %453, %454 : vector<32x32xf32>
    %456 = vector.extract_strided_slice %455 {offsets = [0, 0], sizes = [1, 32], strides = [1, 1]} : vector<32x32xf32> to vector<1x32xf32>
    %457 = vector.extract_strided_slice %455 {offsets = [16, 0], sizes = [1, 32], strides = [1, 1]} : vector<32x32xf32> to vector<1x32xf32>
    %458 = tpu.concatenate %456, %457 in 0 : vector<1x32xf32>, vector<1x32xf32> -> vector<2x32xf32>
    %c0_140 = arith.constant 0 : index
    %c0_141 = arith.constant 0 : index
    %459 = vector.load %arg9[%c0_140, %c0_141] : memref<32x16xf32, #tpu.memory_space<vmem>>, vector<32x16xf32>
    %cst_142 = arith.constant dense<0.000000e+00> : vector<2x16xf32>
    %460 = tpu.matmul %458, %459, %cst_142 {dimension_numbers = #tpu.dot_dimension_numbers<[1], [0], [0], [1], [0, 0, 1, 1], [], []>} : vector<2x32xf32>, vector<32x16xf32>, vector<2x16xf32> -> vector<2x16xf32>
    %461 = vector.extract_strided_slice %11 {offsets = [16, 0], sizes = [1, 16], strides = [1, 1]} : vector<18x96xf32> to vector<1x16xf32>
    %462 = vector.broadcast %461 : vector<1x16xf32> to vector<2x16xf32>
    %463 = arith.addf %460, %462 : vector<2x16xf32>
    %cst_143 = arith.constant 0.000000e+00 : f32
    %464 = vector.broadcast %cst_143 : f32 to vector<2x16xf32>
    %465 = arith.maximumf %463, %464 : vector<2x16xf32>
    %c0_144 = arith.constant 0 : index
    %c0_145 = arith.constant 0 : index
    %466 = vector.load %arg10[%c0_144, %c0_145] : memref<16x3xf32, #tpu.memory_space<vmem>>, vector<16x3xf32>
    %cst_146 = arith.constant dense<0.000000e+00> : vector<2x3xf32>
    %467 = tpu.matmul %465, %466, %cst_146 {dimension_numbers = #tpu.dot_dimension_numbers<[1], [0], [0], [1], [0, 0, 1, 1], [], []>} : vector<2x16xf32>, vector<16x3xf32>, vector<2x3xf32> -> vector<2x3xf32>
    %468 = vector.extract_strided_slice %11 {offsets = [17, 0], sizes = [1, 3], strides = [1, 1]} : vector<18x96xf32> to vector<1x3xf32>
    %469 = vector.broadcast %468 : vector<1x3xf32> to vector<2x3xf32>
    %470 = arith.addf %467, %469 : vector<2x3xf32>
    %cst_147 = arith.constant dense<0xFF800000> : vector<2xf32>
    %471 = vector.multi_reduction <maximumf>, %470, %cst_147 [1] : vector<2x3xf32> to vector<2xf32>
    %472 = vector.shape_cast %471 : vector<2xf32> to vector<2x1xf32>
    %473 = vector.broadcast %472 : vector<2x1xf32> to vector<2x3xf32>
    %474 = arith.subf %470, %473 : vector<2x3xf32>
    %475 = math.exp %474 : vector<2x3xf32>
    %cst_148 = arith.constant dense<0.000000e+00> : vector<2xf32>
    %476 = vector.multi_reduction <add>, %475, %cst_148 [1] : vector<2x3xf32> to vector<2xf32>
    %477 = vector.shape_cast %476 : vector<2xf32> to vector<2x1xf32>
    %478 = vector.broadcast %477 : vector<2x1xf32> to vector<2x3xf32>
    %479 = arith.divf %475, %478 : vector<2x3xf32>
    %c0_149 = arith.constant 0 : index
    %c0_150 = arith.constant 0 : index
    %480 = vector.load %arg12[%c0_149, %c0_150] : memref<2x3xf32, #tpu.memory_space<vmem>>, vector<2x3xf32>
    tpu.vector_store %arg12[%c0_149, %c0_150], %479 {strides = array<i32>} : memref<2x3xf32, #tpu.memory_space<vmem>>, vector<2x3xf32>,
    return
  }
  func.func @transform_0(%arg0: i32) -> (i32, i32) {
    %c0_i32 = arith.constant 0 : i32
    %c0_i32_0 = arith.constant 0 : i32
    return %arg0, %c0_i32 : i32, i32
  }
  func.func @transform_1(%arg0: i32) -> (i32, i32) {
    %c0_i32 = arith.constant 0 : i32
    %c0_i32_0 = arith.constant 0 : i32
    return %arg0, %c0_i32 : i32, i32
  }
  func.func @transform_2(%arg0: i32) -> (i32, i32) {
    %c0_i32 = arith.constant 0 : i32
    %c0_i32_0 = arith.constant 0 : i32
    %c0_i32_1 = arith.constant 0 : i32
    return %c0_i32, %c0_i32_0 : i32, i32
  }
  func.func @transform_3(%arg0: i32) -> (i32, i32) {
    %c0_i32 = arith.constant 0 : i32
    %c0_i32_0 = arith.constant 0 : i32
    %c0_i32_1 = arith.constant 0 : i32
    return %c0_i32, %c0_i32_0 : i32, i32
  }
  func.func @transform_4(%arg0: i32) -> (i32, i32, i32) {
    %c0_i32 = arith.constant 0 : i32
    %c0_i32_0 = arith.constant 0 : i32
    %c0_i32_1 = arith.constant 0 : i32
    %c0_i32_2 = arith.constant 0 : i32
    return %c0_i32, %c0_i32_0, %c0_i32_1 : i32, i32, i32
  }
  func.func @transform_5(%arg0: i32) -> (i32, i32, i32) {
    %c0_i32 = arith.constant 0 : i32
    %c0_i32_0 = arith.constant 0 : i32
    %c0_i32_1 = arith.constant 0 : i32
    %c0_i32_2 = arith.constant 0 : i32
    return %c0_i32, %c0_i32_0, %c0_i32_1 : i32, i32, i32
  }
  func.func @transform_6(%arg0: i32) -> (i32, i32, i32) {
    %c0_i32 = arith.constant 0 : i32
    %c0_i32_0 = arith.constant 0 : i32
    %c0_i32_1 = arith.constant 0 : i32
    %c0_i32_2 = arith.constant 0 : i32
    return %c0_i32, %c0_i32_0, %c0_i32_1 : i32, i32, i32
  }
  func.func @transform_7(%arg0: i32) -> (i32, i32, i32) {
    %c0_i32 = arith.constant 0 : i32
    %c0_i32_0 = arith.constant 0 : i32
    %c0_i32_1 = arith.constant 0 : i32
    %c0_i32_2 = arith.constant 0 : i32
    return %c0_i32, %c0_i32_0, %c0_i32_1 : i32, i32, i32
  }
  func.func @transform_8(%arg0: i32) -> (i32, i32) {
    %c0_i32 = arith.constant 0 : i32
    %c0_i32_0 = arith.constant 0 : i32
    %c0_i32_1 = arith.constant 0 : i32
    return %c0_i32, %c0_i32_0 : i32, i32
  }
  func.func @transform_9(%arg0: i32) -> (i32, i32) {
    %c0_i32 = arith.constant 0 : i32
    %c0_i32_0 = arith.constant 0 : i32
    %c0_i32_1 = arith.constant 0 : i32
    return %c0_i32, %c0_i32_0 : i32, i32
  }
  func.func @transform_10(%arg0: i32) -> (i32, i32) {
    %c0_i32 = arith.constant 0 : i32
    %c0_i32_0 = arith.constant 0 : i32
    %c0_i32_1 = arith.constant 0 : i32
    return %c0_i32, %c0_i32_0 : i32, i32
  }
  func.func @transform_11(%arg0: i32) -> (i32, i32) {
    %c0_i32 = arith.constant 0 : i32
    %c0_i32_0 = arith.constant 0 : i32
    return %arg0, %c0_i32 : i32, i32
  }
}

</mosaic_0001>

<bundles_post_ra>
// kernel: property_prediction_forward.1
= control target key start
LH: loop header
LB: loop body
LE: loop exit
PB: predicated region body
PF: predicated region fallthrough
CT: control target
= control target key end

     0   :  { %v7334_v2 = vmov 0   ;;  %s8388_s0 = inlined_call_operand.vmem [shape: s32[32,1], index: 0, kind: input, shape index: {}]   ;;  %s8389_s1 = inlined_call_operand.vmem [shape: f32[32,16], index: 1, kind: input, shape index: {}]   ;;  %s8390_s2 = inlined_call_operand.vmem [shape: f32[64,32], index: 2, kind: input, shape index: {}]   ;;  %s8391_s3 = inlined_call_operand.vmem [shape: f32[32,32], index: 3, kind: input, shape index: {}]   ;;  %s8392_s4 = inlined_call_operand.vmem [shape: f32[2,32,96], index: 4, kind: input, shape index: {}]   ;;  %s8393_s5 = inlined_call_operand.vmem [shape: f32[2,32,32], index: 5, kind: input, shape index: {}]   ;;  %s8394_s6 = inlined_call_operand.vmem [shape: f32[2,32,64], index: 6, kind: input, shape index: {}]   ;;  %s8395_s7 = inlined_call_operand.vmem [shape: f32[2,64,32], index: 7, kind: input, shape index: {}]   ;;  %s8396_s8 = inlined_call_operand.vmem [shape: f32[32,16], index: 8, kind: input, shape index: {}]   ;;  %s8397_s9 = inlined_call_operand.vmem [shape: f32[16,3], index: 9, kind: input, shape index: {}]   ;;  %s8398_s10 = inlined_call_operand.vmem [shape: f32[18,96], index: 10, kind: input, shape index: {}]   ;;  %s8399_s11 = inlined_call_operand.hbm [shape: f32[2,3], index: 11, kind: output, shape index: {}]  }
   0x1   :  { %v39_v0 = vld [vmem:[%s8388_s0] sm:$0xff]  ;;  %6982 = vset.pattern.permute.xlu0 %v7334_v2  ;;  %v70_v3 = vld [vmem:[%s8390_s2 + $0x8] sm:$0xff]  ;;  %v71_v4 = vld [vmem:[%s8390_s2 + $0x10] sm:$0xff]  ;;  %6983 = vset.pattern.permute.xlu1 %v7334_v2 }
   0x2   :  { %v69_v1 = vld [vmem:[%s8390_s2] sm:$0xff]  ;;  %v72_v5 = vld [vmem:[%s8390_s2 + $0x18] sm:$0xff]  ;;  %46 = vperm.xlu0 %6982, %v39_v0   ;;  %v40_v6 = vld [vmem:[%s8388_s0 + $0x8] sm:$0xff] }
   0x3   :  { %v6693_v7 = vpack.c.bf16 %v70_v3, %v69_v1  ;;  %v6697_v8 = vpack.c.bf16 %v72_v5, %v71_v4  ;;  %v73_v9 = vld [vmem:[%s8390_s2 + $0x20] sm:$0xff]  ;;  %v74_v10 = vld [vmem:[%s8390_s2 + $0x28] sm:$0xff] }
   0x4   :  { %16 = vsyncpa [#allocation3], 0  ;;  %v6701_v11 = vpack.c.bf16 %v74_v10, %v73_v9  ;;  %v75_v12 = vld [vmem:[%s8390_s2 + $0x30] sm:$0xff]  ;;  %v76_v13 = vld [vmem:[%s8390_s2 + $0x38] sm:$0xff]  ;;  %v43_v20 = vlaneseq  ;;  %vm81_vm0 = vcmask 523264   ;;  %v7335_v23 = vmov 0.0  }
   0x5   :  { %6694 = vmatprep.subr.bf16.mxu0 %v6693_v7  ;;  %v41_v14 = vld [vmem:[%s8388_s0 + $0x10] sm:$0xff]  ;;  %v6705_v15 = vpack.c.bf16 %v76_v13, %v75_v12  ;;  %v42_v16 = vld [vmem:[%s8388_s0 + $0x18] sm:$0xff]  ;;  %v186_v17 = vld [vmem:[%s8392_s4] sm:$0xff]  ;;  %vm198_vm5 = vcmask 261120   ;;  %vm302_vm6 = vcmask 64512   ;;  %s7337_s19 = smov 96  }
   0x6   :  { %6696 = vmatpush3.bf16.msra.mxu0 %v6693_v7  ;;  %49 = vperm.xlu0 %6982, %v40_v6   ;;  %v187_v18 = vld [vmem:[%s8392_s4 + $0x8] sm:$0xff]  ;;  %v44_v21 = vand.u32 127, %v43_v20  ;;  %v188_v31 = vld [vmem:[%s8392_s4 + $0x10] sm:$0xff]  ;;  %v189_v32 = vld [vmem:[%s8392_s4 + $0x18] sm:$0xff]  ;;  %v7494_v46 = vshrl.u32 %v43_v20, 7  ;;  %s7338_s20 = smov 120  }
   0x7   :  { %6698 = vmatprep.subr.bf16.mxu0 %v6697_v8  ;;  %52 = vperm.xlu1 %6983, %v41_v14   ;;  %v6709_v19 = vpack.c.bf16 %v187_v18, %v186_v17  ;;  %v6713_v33 = vpack.c.bf16 %v189_v32, %v188_v31  ;;  %v77_v34 = vld [vmem:[%s8391_s3] sm:$0xff]  ;;  %v78_v35 = vld [vmem:[%s8391_s3 + $0x8] sm:$0xff]  ;;  %v80_v40 = vld [vmem:[%s8391_s3 + $0x18] sm:$0xff]  ;;  %vm386_vm8 = vcmask 130048   ;;  %s7339_s25 = smov 64   ;;  %s7340_s0 = smov 80  }
   0x8   :  { %v79_v41 = vld [vmem:[%s8391_s3 + $0x10] sm:$0xff]  ;;  %v7497_v47 = vsub.s32 0, %v7494_v46  ;;  %v7502_v48 = vld [vmem:[%s8398_s10] sm:$0xff]  ;;  %s7336_s3 = smov 88   ;;  %vm7530_vm7 = vmpackc.low %vm302_vm6, %vm302_vm6  ;;  %s7341_s2 = smov 112   ;;  %vm7348_vm9 = vmmov 0  }
   0x9   :  { %6710 = vmatprep.subr.bf16.mxu1 %v6709_v19  ;;  %v7549_v6 = vld [vmem:[%s8389_s1 + $0x8] sm:$0xff]  ;;  %v7554_v7 = vld [vmem:[%s8389_s1] sm:$0xff]  ;;  %s7342_s26 = smov 56   ;;  %s7343_s27 = smov 72   ;;  %vm5625_vm10 = vcmask 1040384   ;;  %vm5788_vm11 = vcmask 17408  }
   0xa   :  { %6700 = vmatpush3.bf16.msra.mxu0 %v6697_v8  ;;  %6712 = vmatpush3.bf16.msra.mxu1 %v6709_v19  ;;  %v197_v49 = vrot.slane %v7502_v48, %v7497_v47  ;;  %s7344_s28 = smov 104   ;;  %s7345_s14 = smov 48  }
   0xb   :  { %6702 = vmatprep.subr.bf16.mxu0 %v6701_v11  ;;  %55 = vperm.xlu1 %6983, %v42_v16   ;;  %s7346_s17 = smov 40  }
   0xc   :  { %6714 = vmatprep.subr.bf16.mxu1 %v6713_v33 }
   0xe   :  { %6704 = vmatpush3.bf16.msra.mxu0 %v6701_v11  ;;  %6716 = vmatpush3.bf16.msra.mxu1 %v6713_v33 }
   0xf   :  { %6706 = vmatprep.subr.bf16.mxu0 %v6705_v15 }
  0x12   :  { %6708 = vmatpush3.bf16.msra.mxu0 %v6705_v15 }
  0x81   :  { %v47_v22 = vpop.permute.xlu0 %46 }
  0x82   :  { %vm57_vm1 = vcmp.eq.s32.totalorder %v47_v22, %v44_v21 }
  0x83   :  { %v5815_v24 = vsel %vm57_vm1, 1.0, %v7335_v23 }
  0x84   :  { %6265 = vmatprep.mubr.msk.f32.mxu0 %vm81_vm0, %v5815_v24 }
  0x85   :  { %v50_v25 = vpop.permute.xlu0 %49 }
  0x86   :  { %vm58_vm2 = vcmp.eq.s32.totalorder %v50_v25, %v44_v21  ;;  %v53_v27 = vpop.permute.xlu1 %52 }
  0x87   :  { %v5816_v26 = vsel %vm58_vm2, 1.0, %v7335_v23  ;;  %vm59_vm3 = vcmp.eq.s32.totalorder %v53_v27, %v44_v21 }
  0x88   :  { %6266 = vmatmul.mubr.msk.f32.vlgmr.msra.gmra.mrb[0].mxu0 %vm81_vm0, %v5816_v26  ;;  %v5817_v28 = vsel %vm59_vm3, 1.0, %v7335_v23 }
  0x89   :  { %6268 = vmatprep.mubr.msk.f32.mxu0 %vm81_vm0, %v5817_v28 }
  0x8a   :  { %v56_v29 = vpop.permute.xlu1 %55 }
  0x8b   :  { %vm60_vm4 = vcmp.eq.s32.totalorder %v56_v29, %v44_v21 }
  0x8c   :  { %v5818_v30 = vsel %vm60_vm4, 1.0, %v7335_v23 }
  0x8d   :  { %6269 = vmatmul.mubr.msk.f32.gmra.mrb[2].mxu0 %vm81_vm0, %v5818_v30 }
 0x15b   :  { %v6267_v36 = vpop.f32.mrb[0].mxu0 }
 0x15c   :  { %v160_v37 = vpop.f32.mrb[1].mxu0  ;;  %v7474_v39 = vadd.f32 %v6267_v36, %v78_v35 }
 0x15d   :  { %v7472_v38 = vadd.f32 %v160_v37, %v77_v34 }
 0x15f   :  { %6279 = vmatprep.mubr.msk.f32.mxu1 %vm198_vm5, %v7472_v38 }
 0x160   :  { %6280 = vmatmul.mubr.msk.f32.vlgmr.msra.gmra.mrb[0].mxu1 %vm198_vm5, %v7474_v39  ;;  %v6270_v42 = vpop.f32.mrb[2].mxu0 }
 0x161   :  { %v7486_v43 = vadd.f32 %v6270_v42, %v80_v40  ;;  %v170_v44 = vpop.f32.mrb[3].mxu0 }
 0x162   :  { %v7488_v45 = vadd.f32 %v170_v44, %v79_v41 }
 0x164   :  { %6282 = vmatprep.mubr.msk.f32.mxu1 %vm198_vm5, %v7488_v45 }
 0x165   :  { %6283 = vmatmul.mubr.msk.f32.gmra.mrb[2].mxu1 %vm198_vm5, %v7486_v43 }
 0x233   :  { %v6281_v50 = vpop.f32.mrb[0].mxu1 }
 0x234   :  { %v7506_v51 = vadd.f32 %v6281_v50, %v197_v49  ;;  %v277_v52 = vpop.f32.mrb[1].mxu1 }
 0x235   :  { %v7508_v53 = vadd.f32 %v277_v52, %v197_v49 }
 0x237   :  { %6289 = vmatprep.mubr.msk.f32.mxu1 %vm302_vm6, %v7508_v53  ;;  %v7514_v54 = vpack.i.bf16 %v7506_v51, %v7508_v53 }
 0x238   :  { %v6284_v55 = vpop.f32.mrb[2].mxu1 }
 0x239   :  { %6990 = vrot.lane.b32.xlu1 %v7514_v54, %s7336_s3  ;;  %6985 = vrot.lane.b32.xlu0 %v7514_v54, %s7337_s19  ;;  %v7520_v56 = vadd.f32 %v6284_v55, %v197_v49  ;;  %v287_v57 = vpop.f32.mrb[3].mxu1 }
 0x23a   :  { %v7522_v58 = vadd.f32 %v287_v57, %v197_v49 }
 0x23d   :  { %498 = vrot.lane.b32.xlu1 %v7506_v51, %s7338_s20  ;;  %496 = vrot.lane.b32.xlu0 %v7508_v53, %s7338_s20 }
 0x2ab   :  { %v6991_v59 = vpop.permute.xlu1 %6990  ;;  %v6986_v60 = vpop.permute.xlu0 %6985 }
 0x2ac   :  { %v6993_v61 = vunpack.i.h.bf16 %v6991_v59  ;;  %v6992_v62 = vunpack.i.l.bf16 %v6991_v59  ;;  %v6988_v63 = vunpack.i.h.bf16 %v6986_v60  ;;  %v6987_v0 = vunpack.i.l.bf16 %v6986_v60 }
 0x2ae   :  { %v6727_v2 = vpack.c.bf16 %v6993_v61, %v6992_v62  ;;  %v6717_v3 = vpack.c.bf16 %v6988_v63, %v6987_v0 }
 0x2af   :  { %v497_v4 = vpop.permute.xlu0 %496  ;;  %v499_v5 = vpop.permute.xlu1 %498 }
 0x2b0   :  { %6719 = vmatprep.subr.msk.bf16.mxu1 %vm7530_vm7, %v6717_v3  ;;  %6729 = vmatprep.subr.msk.bf16.mxu0 %vm7530_vm7, %v6727_v2 }
 0x2b1   :  { %6303 = vmatprep.mubr.msk.f32.mxu0 %vm302_vm6, %v497_v4  ;;  %6722 = vmatpush3.bf16.xpose.msk.msra.mxu1 %vm7530_vm7, %v6717_v3 }
 0x2b2   :  { %6732 = vmatpush3.bf16.xpose.msk.msra.mxu0 %vm7530_vm7, %v6727_v2 }
 0x2b8   :  { %6290 = vmatmul.mubr.msk.f32.vlgmr.msra.gmra.mrb[4].mxu1 %vm302_vm6, %v7506_v51 }
 0x2b9   :  { %6304 = vmatmul.mubr.msk.f32.vlgmr.msra.gmra.mrb[4].mxu0 %vm302_vm6, %v499_v5 }
 0x38b   :  { %v6291_v8 = vpop.f32.mrb[4].mxu1 }
 0x38c   :  { %v383_v9 = vadd.f32 %v6291_v8, %v7549_v6  ;;  %v6305_v10 = vpop.f32.mrb[4].mxu0  ;;  %v377_v11 = vpop.f32.mrb[5].mxu1 }
 0x38d   :  { %v378_v12 = vadd.f32 %v377_v11, %v7554_v7  ;;  %v578_v13 = vpop.f32.mrb[5].mxu0  ;;  %v584_v17 = vadd.f32 %v6305_v10, %v7549_v6 }
 0x38e   :  { %v390_v14 = vsel %vm386_vm8, %v383_v9, -inf  ;;  %v579_v15 = vadd.f32 %v578_v13, %v7554_v7 }
 0x38f   :  { %391 = vmax.xlane.f32.xlu1 %v390_v14  ;;  %v387_v16 = vsel %vm386_vm8, %v378_v12, -inf  ;;  %v590_v19 = vsel %vm386_vm8, %v584_v17, -inf }
 0x390   :  { %388 = vmax.xlane.f32.xlu0 %v387_v16  ;;  %v587_v18 = vsel %vm386_vm8, %v579_v15, -inf }
 0x394   :  { %588 = vmax.xlane.f32.xlu0 %v587_v18 }
 0x398   :  { %591 = vmax.xlane.f32.xlu0 %v590_v19 }
 0x41c   :  { %v392_v20 = vpop.xlane.xlu1 %391 }
 0x41d   :  { %v394_v21 = vsub.f32 %v383_v9, %v392_v20  ;;  %v389_v22 = vpop.xlane.xlu0 %388  ;;  %v7588_v9 = vld [vmem:[%s8393_s5 + $0x8] sm:$0xff] }
 0x41e   :  { %v393_v24 = vsub.f32 %v378_v12, %v389_v22 }
 0x41f   :  { %v397_v25 = vmul.f32 1.442695, %v394_v21 }
 0x420   :  { %v395_v26 = vmul.f32 1.442695, %v393_v24 }
 0x421   :  { %7144 = vpow2.f32 %v397_v25  ;;  %v589_v27 = vpop.xlane.xlu0 %588 }
 0x422   :  { %7146 = vpow2.f32 %v395_v26  ;;  %v593_v28 = vsub.f32 %v579_v15, %v589_v27  ;;  %v7600_v15 = vld [vmem:[%s8393_s5] sm:$0xff] }
 0x423   :  { %6318 = vmatprep.subr.mxu0 %v7600_v15 }
 0x424   :  { %v595_v29 = vmul.f32 1.442695, %v593_v28  ;;  %6319 = vmatpush3.msra.mxu0 %v7600_v15 }
 0x425   :  { %v592_v30 = vpop.xlane.xlu0 %591 }
 0x426   :  { %7148 = vpow2.f32 %v595_v29  ;;  %v594_v31 = vsub.f32 %v584_v17, %v592_v30 }
 0x428   :  { %v597_v32 = vmul.f32 1.442695, %v594_v31 }
 0x42a   :  { %7150 = vpow2.f32 %v597_v32 }
 0x42b   :  { %v7145_v33 = vpop.eup %7144 }
 0x42c   :  { %v7147_v34 = vpop.eup %7146  ;;  %v402_v35 = vsel %vm386_vm8, %v7145_v33, 0.0 }
 0x42d   :  { %403 = vadd.xlane.f32.xlu0 %v402_v35  ;;  %v399_v36 = vsel %vm386_vm8, %v7147_v34, 0.0 }
 0x42e   :  { %400 = vadd.xlane.f32.xlu1 %v399_v36 }
 0x430   :  { %v7149_v37 = vpop.eup %7148 }
 0x431   :  { %v599_v40 = vsel %vm386_vm8, %v7149_v37, 0.0 }
 0x432   :  { %600 = vadd.xlane.f32.xlu1 %v599_v40 }
 0x434   :  { %v7151_v41 = vpop.eup %7150 }
 0x435   :  { %v602_v42 = vsel %vm386_vm8, %v7151_v41, 0.0 }
 0x436   :  { %603 = vadd.xlane.f32.xlu0 %v602_v42 }
 0x443   :  { %6995 = vrot.lane.b32.xlu1 %v7514_v54, %s7339_s25 }
 0x447   :  { %7005 = vrot.lane.b32.xlu1 %v7514_v54, %s7340_s0 }
 0x44b   :  { %858 = vrot.lane.b32.xlu1 %v7508_v53, %s7341_s2 }
 0x44c   :  { %7000 = vrot.lane.b32.xlu0 %v7514_v54, %s7342_s26 }
 0x44f   :  { %7010 = vrot.lane.b32.xlu1 %v7514_v54, %s7343_s27 }
 0x450   :  { %860 = vrot.lane.b32.xlu0 %v7506_v51, %s7341_s2 }
 0x453   :  { %1143 = vrot.lane.b32.xlu1 %v7506_v51, %s7344_s28 }
 0x454   :  { %1141 = vrot.lane.b32.xlu0 %v7508_v53, %s7344_s28 }
 0x4ba   :  { %v404_v44 = vpop.xlane.xlu0 %403 }
 0x4bb   :  { %v401_v49 = vpop.xlane.xlu1 %400 }
 0x4bc   :  { %7152 = vrcp.f32 %v401_v49 }
 0x4bd   :  { %7154 = vrcp.f32 %v404_v44 }
 0x4bf   :  { %v601_v50 = vpop.xlane.xlu1 %600 }
 0x4c0   :  { %7156 = vrcp.f32 %v601_v50 }
 0x4c3   :  { %v6996_v52 = vpop.permute.xlu1 %6995  ;;  %v604_v55 = vpop.xlane.xlu0 %603 }
 0x4c4   :  { %v6998_v57 = vunpack.i.h.bf16 %v6996_v52  ;;  %v6997_v59 = vunpack.i.l.bf16 %v6996_v52  ;;  %7158 = vrcp.f32 %v604_v55 }
 0x4c6   :  { %v7153_v60 = vpop.eup %7152  ;;  %v6723_v61 = vpack.c.bf16 %v6998_v57, %v6997_v59 }
 0x4c7   :  { %v7155_v62 = vpop.eup %7154  ;;  %v7001_v63 = vpop.permute.xlu0 %7000  ;;  %v406_v0 = vmul.f32 %v7153_v60, %v7147_v34 }
 0x4c8   :  { %v7003_v51 = vunpack.i.h.bf16 %v7001_v63  ;;  %v7002_v2 = vunpack.i.l.bf16 %v7001_v63  ;;  %6724 = vmatprep.subr.bf16.mxu1 %v6723_v61  ;;  %v7006_v3 = vpop.permute.xlu1 %7005  ;;  %v408_v4 = vmul.f32 %v7155_v62, %v7145_v33 }
 0x4c9   :  { %6726 = vmatpush3.bf16.msra.mxu1 %v6723_v61  ;;  %6296 = vmatprep.mubr.msk.f32.mxu1 %vm386_vm8, %v406_v0  ;;  %v7008_v10 = vunpack.i.h.bf16 %v7006_v3  ;;  %v7007_v11 = vunpack.i.l.bf16 %v7006_v3 }
 0x4ca   :  { %v7157_v53 = vpop.eup %7156  ;;  %v6733_v5 = vpack.c.bf16 %v7003_v51, %v7002_v2 }
 0x4cb   :  { %v606_v8 = vmul.f32 %v7157_v53, %v7149_v37  ;;  %v6737_v14 = vpack.c.bf16 %v7008_v10, %v7007_v11  ;;  %v861_v26 = vpop.permute.xlu0 %860 }
 0x4cc   :  { %6297 = vmatmul.mubr.msk.f32.vlgmr.msra.gmra.mrb[6].mxu1 %vm386_vm8, %v408_v4  ;;  %6734 = vmatprep.subr.bf16.mxu1 %v6733_v5  ;;  %v859_v16 = vpop.permute.xlu1 %858 }
 0x4cd   :  { %6736 = vmatpush3.bf16.msra.mxu1 %v6733_v5  ;;  %6310 = vmatprep.mubr.msk.f32.mxu1 %vm386_vm8, %v606_v8 }
 0x4ce   :  { %v7159_v12 = vpop.eup %7158  ;;  %6313 = vmatprep.subr.mxu1 %v7588_v9 }
 0x4cf   :  { %v608_v13 = vmul.f32 %v7159_v12, %v7151_v41  ;;  %v1142_v27 = vpop.permute.xlu0 %1141  ;;  %v7632_v41 = vpack.i.bf16 %v7520_v56, %v7522_v58 }
 0x4d0   :  { %v7011_v18 = vpop.permute.xlu1 %7010 }
 0x4d1   :  { %6311 = vmatmul.mubr.msk.f32.vlgmr.msra.gmra.mrb[8].mxu1 %vm386_vm8, %v608_v13  ;;  %v7013_v20 = vunpack.i.h.bf16 %v7011_v18  ;;  %v7012_v21 = vunpack.i.l.bf16 %v7011_v18 }
 0x4d2   :  { %6314 = vmatpush3.msra.mxu1 %v7588_v9 }
 0x4d3   :  { %6739 = vmatprep.subr.msk.bf16.mxu1 %vm7530_vm7, %v6737_v14  ;;  %v6747_v25 = vpack.c.bf16 %v7013_v20, %v7012_v21 }
 0x4d4   :  { %v1144_v28 = vpop.permute.xlu1 %1143 }
 0x59f   :  { %v6298_v17 = vpop.f32.mrb[6].mxu1 }
 0x5a0   :  { %v487_v19 = vpop.f32.mrb[7].mxu1 }
 0x5a1   :  { %6320 = vmatprep.mubr.msk.f32.mxu0 %vm302_vm6, %v487_v19 }
 0x5a2   :  { %6321 = vmatmul.mubr.msk.f32.vlgmr.msra.gmra.mrb[6].mxu0 %vm302_vm6, %v6298_v17 }
 0x5a4   :  { %v6312_v22 = vpop.f32.mrb[8].mxu1 }
 0x5a5   :  { %v687_v24 = vpop.f32.mrb[9].mxu1 }
 0x5a6   :  { %6315 = vmatprep.mubr.msk.f32.mxu1 %vm302_vm6, %v687_v24 }
 0x5a7   :  { %6316 = vmatmul.mubr.msk.f32.vlgmr.msra.gmra.mrb[10].mxu1 %vm302_vm6, %v6312_v22 }
 0x5a8   :  { %6742 = vmatpush3.bf16.xpose.msk.msra.mxu1 %vm7530_vm7, %v6737_v14  ;;  %6327 = vmatprep.mubr.msk.f32.mxu1 %vm302_vm6, %v859_v16  ;;  %v7655_v14 = vld [vmem:[%s8393_s5 + $0x10] sm:$0xff] }
 0x5a9   :  { %6749 = vmatprep.subr.msk.bf16.mxu1 %vm7530_vm7, %v6747_v25 }
 0x5af   :  { %6328 = vmatmul.mubr.msk.f32.vlgmr.msra.gmra.mrb[12].mxu1 %vm302_vm6, %v861_v26 }
 0x5b0   :  { %6752 = vmatpush3.bf16.xpose.msk.msra.mxu1 %vm7530_vm7, %v6747_v25  ;;  %6346 = vmatprep.mubr.msk.f32.mxu1 %vm302_vm6, %v1142_v27 }
 0x5b7   :  { %6347 = vmatmul.mubr.msk.f32.vlgmr.msra.gmra.mrb[14].mxu1 %vm302_vm6, %v1144_v28 }
 0x5b8   :  { %6365 = vmatprep.mubr.msk.f32.mxu1 %vm302_vm6, %v7522_v58 }
 0x67a   :  { %v7620_v29 = vpop.f32.mrb[10].mxu1 }
 0x67b   :  { %v7622_v30 = vpop.f32.mrb[11].mxu1 }
 0x682   :  { %v6329_v31 = vpop.f32.mrb[12].mxu1 }
 0x683   :  { %v946_v32 = vadd.f32 %v6329_v31, %v7549_v6  ;;  %v940_v33 = vpop.f32.mrb[13].mxu1 }
 0x684   :  { %v941_v34 = vadd.f32 %v940_v33, %v7554_v7 }
 0x685   :  { %v952_v35 = vsel %vm386_vm8, %v946_v32, -inf }
 0x686   :  { %953 = vmax.xlane.f32.xlu1 %v952_v35  ;;  %v949_v36 = vsel %vm386_vm8, %v941_v34, -inf }
 0x687   :  { %950 = vmax.xlane.f32.xlu0 %v949_v36 }
 0x68a   :  { %v6348_v37 = vpop.f32.mrb[14].mxu1 }
 0x68b   :  { %v1223_v40 = vpop.f32.mrb[15].mxu1  ;;  %v1229_v10 = vadd.f32 %v6348_v37, %v7549_v6 }
 0x68c   :  { %v1224_v42 = vadd.f32 %v1223_v40, %v7554_v7 }
 0x68d   :  { %v1235_v11 = vsel %vm386_vm8, %v1229_v10, -inf }
 0x68e   :  { %v1232_v44 = vsel %vm386_vm8, %v1224_v42, -inf }
 0x697   :  { %7015 = vrot.lane.b32.xlu1 %v7514_v54, %s7345_s14 }
 0x69b   :  { %7025 = vrot.lane.b32.xlu1 %v7632_v41, %s7336_s3 }
 0x69f   :  { %1622 = vrot.lane.b32.xlu1 %v7522_v58, %s7338_s20 }
 0x6c3   :  { %1233 = vmax.xlane.f32.xlu1 %v1232_v44 }
 0x713   :  { %v954_v49 = vpop.xlane.xlu1 %953 }
 0x714   :  { %v956_v50 = vsub.f32 %v946_v32, %v954_v49  ;;  %v951_v52 = vpop.xlane.xlu0 %950 }
 0x715   :  { %v955_v55 = vsub.f32 %v941_v34, %v951_v52 }
 0x716   :  { %v959_v57 = vmul.f32 1.442695, %v956_v50 }
 0x717   :  { %v957_v59 = vmul.f32 1.442695, %v955_v55  ;;  %v7016_v60 = vpop.permute.xlu1 %7015 }
 0x718   :  { %v7018_v61 = vunpack.i.h.bf16 %v7016_v60  ;;  %v7017_v62 = vunpack.i.l.bf16 %v7016_v60 }
 0x719   :  { %7160 = vpow2.f32 %v957_v59 }
 0x71a   :  { %v6743_v63 = vpack.c.bf16 %v7018_v61, %v7017_v62  ;;  %7162 = vpow2.f32 %v959_v57 }
 0x71b   :  { %v7026_v53 = vpop.permute.xlu1 %7025 }
 0x71c   :  { %6744 = vmatprep.subr.bf16.mxu0 %v6743_v63  ;;  %v7028_v18 = vunpack.i.h.bf16 %v7026_v53  ;;  %v7027_v19 = vunpack.i.l.bf16 %v7026_v53 }
 0x71d   :  { %6746 = vmatpush3.bf16.msra.mxu0 %v6743_v63  ;;  %v7690_v63 = vld [vmem:[%s8389_s1 + $0x18] sm:$0xff] }
 0x71e   :  { %6337 = vmatprep.subr.mxu0 %v7655_v14  ;;  %v6767_v26 = vpack.c.bf16 %v7028_v18, %v7027_v19  ;;  %v7714_v19 = vld [vmem:[%s8393_s5 + $0x18] sm:$0xff] }
 0x71f   :  { %v1623_v3 = vpop.permute.xlu1 %1622 }
 0x723   :  { %v7161_v0 = vpop.eup %7160 }
 0x724   :  { %v961_v7 = vsel %vm386_vm8, %v7161_v0, 0.0  ;;  %v7163_v51 = vpop.eup %7162 }
 0x725   :  { %962 = vadd.xlane.f32.xlu0 %v961_v7  ;;  %v964_v2 = vsel %vm386_vm8, %v7163_v51, 0.0 }
 0x729   :  { %965 = vadd.xlane.f32.xlu0 %v964_v2 }
 0x73f   :  { %7020 = vrot.lane.b32.xlu0 %v7632_v41, %s7337_s19 }
 0x743   :  { %1624 = vrot.lane.b32.xlu0 %v7520_v56, %s7338_s20 }
 0x750   :  { %v1234_v4 = vpop.xlane.xlu1 %1233 }
 0x751   :  { %v1238_v5 = vsub.f32 %v1224_v42, %v1234_v4 }
 0x753   :  { %v1240_v8 = vmul.f32 1.442695, %v1238_v5 }
 0x755   :  { %7164 = vpow2.f32 %v1240_v8 }
 0x75f   :  { %v7648_v12 = vpop.eup %7164 }
 0x760   :  { %v1244_v13 = vsel %vm386_vm8, %v7648_v12, 0.0 }
 0x762   :  { %1236 = vmax.xlane.f32.xlu0 %v1235_v11 }
 0x766   :  { %1245 = vadd.xlane.f32.xlu0 %v1244_v13 }
 0x77c   :  { %7030 = vrot.lane.b32.xlu0 %v7514_v54, %s7346_s17 }
 0x780   :  { %1986 = vrot.lane.b32.xlu0 %v7520_v56, %s7341_s2 }
 0x7b2   :  { %v963_v6 = vpop.xlane.xlu0 %962 }
 0x7b3   :  { %7166 = vrcp.f32 %v963_v6 }
 0x7b6   :  { %v966_v16 = vpop.xlane.xlu0 %965 }
 0x7b7   :  { %7168 = vrcp.f32 %v966_v16 }
 0x7ba   :  { %v7021_v17 = vpop.permute.xlu0 %7020 }
 0x7bb   :  { %v7023_v20 = vunpack.i.h.bf16 %v7021_v17  ;;  %v7022_v21 = vunpack.i.l.bf16 %v7021_v17 }
 0x7bd   :  { %v7167_v22 = vpop.eup %7166  ;;  %v6757_v24 = vpack.c.bf16 %v7023_v20, %v7022_v21 }
 0x7be   :  { %v968_v25 = vmul.f32 %v7167_v22, %v7161_v0  ;;  %v1625_v28 = vpop.permute.xlu0 %1624 }
 0x7bf   :  { %6759 = vmatprep.subr.msk.bf16.mxu1 %vm7530_vm7, %v6757_v24 }
 0x7c0   :  { %6334 = vmatprep.mubr.msk.f32.mxu0 %vm386_vm8, %v968_v25  ;;  %6762 = vmatpush3.bf16.xpose.msk.msra.mxu1 %vm7530_vm7, %v6757_v24 }
 0x7c1   :  { %v7169_v54 = vpop.eup %7168  ;;  %6769 = vmatprep.subr.msk.bf16.mxu1 %vm7530_vm7, %v6767_v26 }
 0x7c2   :  { %v970_v27 = vmul.f32 %v7169_v54, %v7163_v51  ;;  %v7697_v51 = vld [vmem:[%s8389_s1 + $0x10] sm:$0xff] }
 0x7c4   :  { %6335 = vmatmul.mubr.msk.f32.vlgmr.msra.gmra.mrb[8].mxu0 %vm386_vm8, %v970_v27 }
 0x7c5   :  { %6338 = vmatpush3.msra.mxu0 %v7655_v14 }
 0x7c7   :  { %6366 = vmatmul.mubr.msk.f32.vlgmr.msra.gmra.mrb[16].mxu1 %vm302_vm6, %v7520_v56 }
 0x7c8   :  { %6772 = vmatpush3.bf16.xpose.msk.msra.mxu1 %vm7530_vm7, %v6767_v26  ;;  %6379 = vmatprep.mubr.msk.f32.mxu1 %vm302_vm6, %v1623_v3 }
 0x7cf   :  { %6380 = vmatmul.mubr.msk.f32.vlgmr.msra.gmra.mrb[18].mxu1 %vm302_vm6, %v1625_v28 }
 0x7ef   :  { %v1237_v31 = vpop.xlane.xlu0 %1236 }
 0x7f0   :  { %v1239_v32 = vsub.f32 %v1229_v10, %v1237_v31 }
 0x7f2   :  { %v1242_v33 = vmul.f32 1.442695, %v1239_v32 }
 0x7f3   :  { %v1246_v34 = vpop.xlane.xlu0 %1245 }
 0x7f4   :  { %7170 = vpow2.f32 %v1242_v33 }
 0x7f5   :  { %7172 = vrcp.f32 %v1246_v34 }
 0x7f7   :  { %v7031_v35 = vpop.permute.xlu0 %7030 }
 0x7f8   :  { %v7033_v36 = vunpack.i.h.bf16 %v7031_v35  ;;  %v7032_v37 = vunpack.i.l.bf16 %v7031_v35 }
 0x7fa   :  { %v6753_v40 = vpack.c.bf16 %v7033_v36, %v7032_v37 }
 0x7fb   :  { %v1987_v8 = vpop.permute.xlu0 %1986 }
 0x7fc   :  { %6754 = vmatprep.subr.bf16.mxu0 %v6753_v40 }
 0x7fe   :  { %v7171_v42 = vpop.eup %7170 }
 0x7ff   :  { %v1247_v44 = vsel %vm386_vm8, %v7171_v42, 0.0  ;;  %v7173_v60 = vpop.eup %7172 }
 0x800   :  { %1248 = vadd.xlane.f32.xlu1 %v1247_v44  ;;  %v1251_v7 = vmul.f32 %v7173_v60, %v7648_v12 }
 0x811   :  { %7035 = vrot.lane.b32.xlu1 %v7632_v41, %s7340_s0 }
 0x815   :  { %1984 = vrot.lane.b32.xlu1 %v7522_v58, %s7341_s2 }
 0x88d   :  { %v1249_v49 = vpop.xlane.xlu1 %1248 }
 0x88e   :  { %7174 = vrcp.f32 %v1249_v49 }
 0x891   :  { %v7036_v50 = vpop.permute.xlu1 %7035 }
 0x892   :  { %v7038_v52 = vunpack.i.h.bf16 %v7036_v50  ;;  %v7037_v55 = vunpack.i.l.bf16 %v7036_v50 }
 0x894   :  { %v6777_v57 = vpack.c.bf16 %v7038_v52, %v7037_v55 }
 0x895   :  { %v1985_v59 = vpop.permute.xlu1 %1984 }
 0x896   :  { %6779 = vmatprep.subr.msk.bf16.mxu1 %vm7530_vm7, %v6777_v57  ;;  %6403 = vmatprep.mubr.msk.f32.mxu1 %vm302_vm6, %v1985_v59 }
 0x897   :  { %v6336_v61 = vpop.f32.mrb[8].mxu0  ;;  %6782 = vmatpush3.bf16.xpose.msk.msra.mxu1 %vm7530_vm7, %v6777_v57 }
 0x898   :  { %v1049_v62 = vpop.f32.mrb[9].mxu0  ;;  %v7175_v0 = vpop.eup %7174 }
 0x899   :  { %6339 = vmatprep.mubr.msk.f32.mxu0 %vm302_vm6, %v1049_v62  ;;  %v1253_v5 = vmul.f32 %v7175_v0, %v7171_v42 }
 0x89a   :  { %6340 = vmatmul.mubr.msk.f32.vlgmr.msra.gmra.mrb[6].mxu0 %vm302_vm6, %v6336_v61  ;;  %v6367_v2 = vpop.f32.mrb[16].mxu1 }
 0x89b   :  { %6756 = vmatpush3.bf16.msra.mxu0 %v6753_v40  ;;  %v1510_v53 = vadd.f32 %v6367_v2, %v7690_v63  ;;  %6353 = vmatprep.mubr.msk.f32.mxu0 %vm386_vm8, %v1251_v7  ;;  %v1504_v3 = vpop.f32.mrb[17].mxu1 }
 0x89c   :  { %v1505_v4 = vadd.f32 %v1504_v3, %v7697_v51  ;;  %6356 = vmatprep.subr.mxu0 %v7714_v19 }
 0x89d   :  { %v1516_v10 = vsel %vm386_vm8, %v1510_v53, -inf }
 0x89e   :  { %6354 = vmatmul.mubr.msk.f32.vlgmr.msra.gmra.mrb[10].mxu0 %vm386_vm8, %v1253_v5  ;;  %6404 = vmatmul.mubr.msk.f32.vlgmr.msra.gmra.mrb[20].mxu1 %vm302_vm6, %v1987_v8  ;;  %v1513_v11 = vsel %vm386_vm8, %v1505_v4, -inf }
 0x89f   :  { %1517 = vmax.xlane.f32.xlu0 %v1516_v10  ;;  %1514 = vmax.xlane.f32.xlu1 %v1513_v11 }
 0x8a0   :  { %6357 = vmatpush3.msra.mxu0 %v7714_v19 }
 0x8a2   :  { %v6381_v12 = vpop.f32.mrb[18].mxu1 }
 0x8a3   :  { %v1710_v13 = vadd.f32 %v6381_v12, %v7690_v63  ;;  %v1704_v6 = vpop.f32.mrb[19].mxu1 }
 0x8a4   :  { %v1705_v16 = vadd.f32 %v1704_v6, %v7697_v51 }
 0x8a5   :  { %v1716_v17 = vsel %vm386_vm8, %v1710_v13, -inf }
 0x8a6   :  { %1717 = vmax.xlane.f32.xlu1 %v1716_v17  ;;  %v1713_v18 = vsel %vm386_vm8, %v1705_v16, -inf }
 0x8a7   :  { %1714 = vmax.xlane.f32.xlu0 %v1713_v18 }
 0x92c   :  { %v1518_v20 = vpop.xlane.xlu0 %1517  ;;  %v1515_v21 = vpop.xlane.xlu1 %1514 }
 0x92d   :  { %v1520_v22 = vsub.f32 %v1510_v53, %v1518_v20  ;;  %v1519_v24 = vsub.f32 %v1505_v4, %v1515_v21 }
 0x92f   :  { %v1523_v25 = vmul.f32 1.442695, %v1520_v22  ;;  %v1521_v26 = vmul.f32 1.442695, %v1519_v24 }
 0x931   :  { %7176 = vpow2.f32 %v1523_v25 }
 0x932   :  { %7178 = vpow2.f32 %v1521_v26 }
 0x933   :  { %v1718_v54 = vpop.xlane.xlu1 %1717 }
 0x934   :  { %v1720_v27 = vsub.f32 %v1710_v13, %v1718_v54  ;;  %v1715_v28 = vpop.xlane.xlu0 %1714 }
 0x935   :  { %v1719_v31 = vsub.f32 %v1705_v16, %v1715_v28 }
 0x936   :  { %v1723_v32 = vmul.f32 1.442695, %v1720_v27 }
 0x937   :  { %v1721_v33 = vmul.f32 1.442695, %v1719_v31 }
 0x938   :  { %7180 = vpow2.f32 %v1723_v32 }
 0x939   :  { %7182 = vpow2.f32 %v1721_v33 }
 0x93b   :  { %v7177_v34 = vpop.eup %7176 }
 0x93c   :  { %v7179_v35 = vpop.eup %7178  ;;  %v1528_v36 = vsel %vm386_vm8, %v7177_v34, 0.0 }
 0x93d   :  { %1529 = vadd.xlane.f32.xlu1 %v1528_v36  ;;  %v1525_v37 = vsel %vm386_vm8, %v7179_v35, 0.0 }
 0x93e   :  { %1526 = vadd.xlane.f32.xlu0 %v1525_v37 }
 0x942   :  { %v7720_v40 = vpop.eup %7180 }
 0x943   :  { %v7183_v42 = vpop.eup %7182  ;;  %v1728_v44 = vsel %vm386_vm8, %v7720_v40, 0.0 }
 0x944   :  { %1729 = vadd.xlane.f32.xlu1 %v1728_v44  ;;  %v1725_v49 = vsel %vm386_vm8, %v7183_v42, 0.0 }
 0x945   :  { %1726 = vadd.xlane.f32.xlu0 %v1725_v49 }
 0x955   :  { %7045 = vrot.lane.b32.xlu1 %v7632_v41, %s7342_s26 }
 0x959   :  { %7050 = vrot.lane.b32.xlu1 %v7632_v41, %s7343_s27 }
 0x95b   :  { %7040 = vrot.lane.b32.xlu0 %v7632_v41, %s7339_s25 }
 0x95d   :  { %2269 = vrot.lane.b32.xlu1 %v7520_v56, %s7344_s28 }
 0x95f   :  { %2267 = vrot.lane.b32.xlu0 %v7522_v58, %s7344_s28 }
 0x971   :  { %v6355_v50 = vpop.f32.mrb[10].mxu0  ;;  %v6405_v52 = vpop.f32.mrb[20].mxu1 }
 0x972   :  { %v1332_v55 = vpop.f32.mrb[11].mxu0  ;;  %v2066_v57 = vpop.f32.mrb[21].mxu1  ;;  %v2072_v60 = vadd.f32 %v6405_v52, %v7690_v63 }
 0x973   :  { %6358 = vmatprep.mubr.msk.f32.mxu0 %vm302_vm6, %v1332_v55  ;;  %v2067_v59 = vadd.f32 %v2066_v57, %v7697_v51 }
 0x974   :  { %6359 = vmatmul.mubr.msk.f32.vlgmr.msra.gmra.mrb[6].mxu0 %vm302_vm6, %v6355_v50  ;;  %v2078_v56 = vsel %vm386_vm8, %v2072_v60, -inf }
 0x975   :  { %v2075_v61 = vsel %vm386_vm8, %v2067_v59, -inf }
 0x97e   :  { %2076 = vmax.xlane.f32.xlu0 %v2075_v61 }
 0x981   :  { %2079 = vmax.xlane.f32.xlu1 %v2078_v56 }
 0x992   :  { %7055 = vrot.lane.b32.xlu1 %v7632_v41, %s7345_s14 }
 0x996   :  { %7060 = vrot.lane.b32.xlu1 %v7632_v41, %s7346_s17 }
 0x9ca   :  { %v1530_v62 = vpop.xlane.xlu1 %1529 }
 0x9cb   :  { %v1527_v58 = vpop.xlane.xlu0 %1526 }
 0x9cc   :  { %7184 = vrcp.f32 %v1527_v58 }
 0x9cd   :  { %7186 = vrcp.f32 %v1530_v62 }
 0x9d1   :  { %v1730_v0 = vpop.xlane.xlu1 %1729 }
 0x9d2   :  { %v1727_v7 = vpop.xlane.xlu0 %1726 }
 0x9d3   :  { %7188 = vrcp.f32 %v1727_v7 }
 0x9d4   :  { %7190 = vrcp.f32 %v1730_v0 }
 0x9d5   :  { %v7046_v2 = vpop.permute.xlu1 %7045 }
 0x9d6   :  { %v7185_v53 = vpop.eup %7184  ;;  %v7048_v3 = vunpack.i.h.bf16 %v7046_v2  ;;  %v7041_v4 = vpop.permute.xlu0 %7040  ;;  %v7047_v5 = vunpack.i.l.bf16 %v7046_v2 }
 0x9d7   :  { %v7043_v8 = vunpack.i.h.bf16 %v7041_v4  ;;  %v7042_v10 = vunpack.i.l.bf16 %v7041_v4  ;;  %v1532_v11 = vmul.f32 %v7185_v53, %v7179_v35  ;;  %v7187_v13 = vpop.eup %7186 }
 0x9d8   :  { %v6773_v18 = vpack.c.bf16 %v7048_v3, %v7047_v5  ;;  %v1534_v22 = vmul.f32 %v7187_v13, %v7177_v34 }
 0x9d9   :  { %6372 = vmatprep.mubr.msk.f32.mxu0 %vm386_vm8, %v1532_v11  ;;  %v7051_v12 = vpop.permute.xlu1 %7050  ;;  %v6763_v41 = vpack.c.bf16 %v7043_v8, %v7042_v10 }
 0x9da   :  { %v7053_v6 = vunpack.i.h.bf16 %v7051_v12  ;;  %v7052_v16 = vunpack.i.l.bf16 %v7051_v12  ;;  %v2268_v17 = vpop.permute.xlu0 %2267 }
 0x9db   :  { %6764 = vmatprep.subr.bf16.mxu0 %v6763_v41  ;;  %6422 = vmatprep.mubr.msk.f32.mxu1 %vm302_vm6, %v2268_v17 }
 0x9dc   :  { %v6787_v20 = vpack.c.bf16 %v7053_v6, %v7052_v16  ;;  %6766 = vmatpush3.bf16.msra.mxu0 %v6763_v41 }
 0x9dd   :  { %v7189_v21 = vpop.eup %7188  ;;  %6774 = vmatprep.subr.bf16.mxu0 %v6773_v18  ;;  %v2270_v54 = vpop.permute.xlu1 %2269 }
 0x9de   :  { %v7191_v24 = vpop.eup %7190  ;;  %6789 = vmatprep.subr.msk.bf16.mxu1 %vm7530_vm7, %v6787_v20  ;;  %v1732_v25 = vmul.f32 %v7189_v21, %v7183_v42 }
 0x9df   :  { %6373 = vmatmul.mubr.msk.f32.vlgmr.msra.gmra.mrb[12].mxu0 %vm386_vm8, %v1534_v22  ;;  %6792 = vmatpush3.bf16.xpose.msk.msra.mxu1 %vm7530_vm7, %v6787_v20  ;;  %v1734_v26 = vmul.f32 %v7191_v24, %v7720_v40  ;;  %v7762_v40 = vsub.s32 1, %v7494_v46 }
 0x9e0   :  { %6776 = vmatpush3.bf16.msra.mxu0 %v6773_v18  ;;  %6386 = vmatprep.mubr.msk.f32.mxu0 %vm386_vm8, %v1732_v25 }
 0x9e1   :  { %6389 = vmatprep.subr.mxu0 %v7588_v9  ;;  %v7766_v42 = vrot.slane %v7502_v48, %v7762_v40 }
 0x9e3   :  { %6387 = vmatmul.mubr.msk.f32.vlgmr.msra.gmra.mrb[14].mxu0 %vm386_vm8, %v1734_v26 }
 0x9e4   :  { %6390 = vmatpush3.msra.mxu0 %v7588_v9 }
 0x9e5   :  { %6394 = vmatprep.subr.mxu0 %v7600_v15 }
 0x9e6   :  { %6423 = vmatmul.mubr.msk.f32.vlgmr.msra.gmra.mrb[22].mxu1 %vm302_vm6, %v2270_v54 }
 0xa0b   :  { %v2077_v27 = vpop.xlane.xlu0 %2076 }
 0xa0c   :  { %v2081_v28 = vsub.f32 %v2067_v59, %v2077_v27 }
 0xa0e   :  { %v2083_v31 = vmul.f32 1.442695, %v2081_v28  ;;  %v2080_v32 = vpop.xlane.xlu1 %2079 }
 0xa0f   :  { %v2082_v33 = vsub.f32 %v2072_v60, %v2080_v32 }
 0xa10   :  { %7192 = vpow2.f32 %v2083_v31 }
 0xa11   :  { %v2085_v34 = vmul.f32 1.442695, %v2082_v33 }
 0xa12   :  { %v7056_v61 = vpop.permute.xlu1 %7055 }
 0xa13   :  { %7194 = vpow2.f32 %v2085_v34  ;;  %v7058_v62 = vunpack.i.h.bf16 %v7056_v61 }
 0xa16   :  { %v7061_v8 = vpop.permute.xlu1 %7060 }
 0xa17   :  { %v7063_v11 = vunpack.i.h.bf16 %v7061_v8  ;;  %v7062_v12 = vunpack.i.l.bf16 %v7061_v8  ;;  %v7826_v8 = vld [vmem:[%s8398_s10] sm:$0xff] }
 0xa1a   :  { %v7193_v35 = vpop.eup %7192 }
 0xa1b   :  { %v2087_v36 = vsel %vm386_vm8, %v7193_v35, 0.0 }
 0xa1c   :  { %2088 = vadd.xlane.f32.xlu0 %v2087_v36 }
 0xa1d   :  { %v7195_v37 = vpop.eup %7194 }
 0xa1e   :  { %v2090_v9 = vsel %vm386_vm8, %v7195_v37, 0.0 }
 0xa20   :  { %2091 = vadd.xlane.f32.xlu0 %v2090_v9 }
 0xa47   :  { %v6360_v44 = vpop.f32.mrb[6].mxu0 }
 0xa48   :  { %v6942_v49 = vadd.f32 %v6360_v44, %v7620_v29  ;;  %v1413_v50 = vpop.f32.mrb[7].mxu0  ;;  %v7057_v29 = vunpack.i.l.bf16 %v7056_v61  ;;  %v2632_v61 = vld [vmem:[%s8394_s6 + $0x8] sm:$0xff] }
 0xa49   :  { %v6943_v52 = vadd.f32 %v1413_v50, %v7622_v30 }
 0xa4a   :  { %v2555_v55 = vadd.f32 %v6942_v49, %v7766_v42  ;;  %v6783_v7 = vpack.c.bf16 %v7058_v62, %v7057_v29  ;;  %v2740_v62 = vld [vmem:[%s8395_s7] sm:$0xff]  ;;  %v2741_v29 = vld [vmem:[%s8395_s7 + $0x8] sm:$0xff] }
 0xa4b   :  { %v2554_v22 = vadd.f32 %v6943_v52, %v7766_v42 }
 0xa4c   :  { %v7772_v57 = vadd.f32 %v2555_v55, %v7474_v39 }
 0xa4e   :  { %v2565_v59 = vsel %vm198_vm5, %v7772_v57, 0.0 }
 0xa4f   :  { %2566 = vadd.xlane.f32.xlu1 %v2565_v59 }
 0xaa9   :  { %v2089_v60 = vpop.xlane.xlu0 %2088 }
 0xaaa   :  { %7196 = vrcp.f32 %v2089_v60 }
 0xaad   :  { %v2092_v48 = vpop.xlane.xlu0 %2091 }
 0xaae   :  { %7198 = vrcp.f32 %v2092_v48  ;;  %v2633_v48 = vld [vmem:[%s8394_s6 + $0x10] sm:$0xff] }
 0xab2   :  { %v6374_v56 = vpop.f32.mrb[12].mxu0 }
 0xab3   :  { %v1613_v58 = vpop.f32.mrb[13].mxu0 }
 0xab4   :  { %v7197_v5 = vpop.eup %7196 }
 0xab5   :  { %v2094_v41 = vmul.f32 %v7197_v5, %v7193_v35  ;;  %v2625_v5 = vsub.s32 3, %v7494_v46 }
 0xab6   :  { %v6388_v0 = vpop.f32.mrb[14].mxu0 }
 0xab7   :  { %v1813_v30 = vpop.f32.mrb[15].mxu0 }
 0xab8   :  { %6391 = vmatprep.mubr.msk.f32.mxu0 %vm302_vm6, %v1813_v30  ;;  %v7199_v10 = vpop.eup %7198 }
 0xab9   :  { %6392 = vmatmul.mubr.msk.f32.vlgmr.msra.gmra.mrb[16].mxu0 %vm302_vm6, %v6388_v0  ;;  %v6424_v39 = vpop.f32.mrb[22].mxu1  ;;  %v6805_v0 = vpack.c.bf16 %v2741_v29, %v2740_v62 }
 0xaba   :  { %6395 = vmatpush3.msra.mxu0 %v7600_v15  ;;  %6396 = vmatprep.mubr.msk.f32.mxu0 %vm302_vm6, %v1613_v58  ;;  %v2349_v2 = vpop.f32.mrb[23].mxu1  ;;  %v2355_v3 = vadd.f32 %v6424_v39, %v7690_v63  ;;  %v2096_v63 = vmul.f32 %v7199_v10, %v7195_v37 }
 0xabb   :  { %6784 = vmatprep.subr.bf16.mxu0 %v6783_v7  ;;  %v2350_v53 = vadd.f32 %v2349_v2, %v7697_v51  ;;  %v6793_v51 = vpack.c.bf16 %v7063_v11, %v7062_v12 }
 0xabc   :  { %v2361_v15 = vsel %vm386_vm8, %v2355_v3, -inf }
 0xabd   :  { %v2358_v4 = vsel %vm386_vm8, %v2350_v53, -inf }
 0xabe   :  { %2359 = vmax.xlane.f32.xlu0 %v2358_v4  ;;  %v2617_v4 = vsub.s32 2, %v7494_v46 }
 0xac0   :  { %v7831_v10 = vrot.slane %v7826_v8, %v2617_v4 }
 0xac1   :  { %6397 = vmatmul.mubr.msk.f32.vlgmr.msra.gmra.mrb[16].mxu0 %vm302_vm6, %v6374_v56 }
 0xac2   :  { %6786 = vmatpush3.bf16.msra.mxu0 %v6783_v7  ;;  %2362 = vmax.xlane.f32.xlu0 %v2361_v15  ;;  %v7836_v15 = vrot.slane %v7826_v8, %v2625_v5 }
 0xac3   :  { %6410 = vmatprep.mubr.msk.f32.mxu0 %vm386_vm8, %v2094_v41  ;;  %6413 = vmatprep.subr.mxu0 %v7655_v14 }
 0xac5   :  { %6411 = vmatmul.mubr.msk.f32.vlgmr.msra.gmra.mrb[18].mxu0 %vm386_vm8, %v2096_v63 }
 0xac6   :  { %6414 = vmatpush3.msra.mxu0 %v7655_v14  ;;  %v2558_v14 = vadd.f32 %v2554_v22, %v7472_v38 }
 0xac7   :  { %6794 = vmatprep.subr.bf16.mxu0 %v6793_v51 }
 0xac8   :  { %v2562_v54 = vsel %vm198_vm5, %v2558_v14, 0.0 }
 0xadc   :  { %v2567_v32 = vpop.xlane.xlu1 %2566 }
 0xadd   :  { %v2576_v34 = vmul.f32 0.03125, %v2567_v32 }
 0xadf   :  { %v2580_v37 = vsub.f32 %v7772_v57, %v2576_v34  ;;  %v2631_v57 = vld [vmem:[%s8394_s6] sm:$0xff] }
 0xae0   :  { %v6797_v56 = vpack.c.bf16 %v2632_v61, %v2631_v57 }
 0xae1   :  { %v2584_v55 = vmul.f32 %v2580_v37, %v2580_v37 }
 0xae2   :  { %6798 = vmatprep.subr.bf16.mxu1 %v6797_v56 }
 0xae3   :  { %v2590_v60 = vsel %vm198_vm5, %v2584_v55, 0.0  ;;  %6800 = vmatpush3.bf16.msra.mxu1 %v6797_v56 }
 0xb4b   :  { %v2360_v13 = vpop.xlane.xlu0 %2359 }
 0xb4c   :  { %v2364_v6 = vsub.f32 %v2350_v53, %v2360_v13 }
 0xb4e   :  { %v2366_v16 = vmul.f32 1.442695, %v2364_v6 }
 0xb4f   :  { %v2363_v17 = vpop.xlane.xlu0 %2362 }
 0xb50   :  { %7200 = vpow2.f32 %v2366_v16  ;;  %v2365_v18 = vsub.f32 %v2355_v3, %v2363_v17  ;;  %v2742_v17 = vld [vmem:[%s8395_s7 + $0x10] sm:$0xff] }
 0xb52   :  { %v2368_v20 = vmul.f32 1.442695, %v2365_v18  ;;  %v2743_v18 = vld [vmem:[%s8395_s7 + $0x18] sm:$0xff] }
 0xb53   :  { %v6809_v22 = vpack.c.bf16 %v2743_v18, %v2742_v17 }
 0xb54   :  { %7202 = vpow2.f32 %v2368_v20 }
 0xb5a   :  { %v7201_v21 = vpop.eup %7200 }
 0xb5b   :  { %v2370_v24 = vsel %vm386_vm8, %v7201_v21, 0.0 }
 0xb5c   :  { %2371 = vadd.xlane.f32.xlu0 %v2370_v24  ;;  %v2744_v24 = vld [vmem:[%s8395_s7 + $0x20] sm:$0xff] }
 0xb5e   :  { %v7203_v25 = vpop.eup %7202 }
 0xb5f   :  { %v2373_v26 = vsel %vm386_vm8, %v7203_v25, 0.0 }
 0xb60   :  { %2374 = vadd.xlane.f32.xlu0 %v2373_v26 }
 0xb64   :  { %2563 = vadd.xlane.f32.xlu0 %v2562_v54  ;;  %v2747_v54 = vld [vmem:[%s8395_s7 + $0x38] sm:$0xff] }
 0xb98   :  { %v6412_v27 = vpop.f32.mrb[18].mxu0 }
 0xb99   :  { %v2175_v28 = vpop.f32.mrb[19].mxu0 }
 0xb9a   :  { %6415 = vmatprep.mubr.msk.f32.mxu0 %vm302_vm6, %v2175_v28  ;;  %v2637_v28 = vsub.s32 4, %v7494_v46 }
 0xb9b   :  { %6416 = vmatmul.mubr.msk.f32.vlgmr.msra.gmra.mrb[16].mxu0 %vm302_vm6, %v6412_v27 }
 0xb9c   :  { %6796 = vmatpush3.bf16.msra.mxu0 %v6793_v51 }
 0xb9d   :  { %6432 = vmatprep.subr.mxu0 %v7714_v19 }
 0xbe9   :  { %v2372_v31 = vpop.xlane.xlu0 %2371 }
 0xbea   :  { %7204 = vrcp.f32 %v2372_v31  ;;  %v7871_v31 = vrot.slane %v7826_v8, %v2637_v28 }
 0xbed   :  { %v2375_v33 = vpop.xlane.xlu0 %2374 }
 0xbee   :  { %7206 = vrcp.f32 %v2375_v33 }
 0xbf1   :  { %v2564_v38 = vpop.xlane.xlu0 %2563 }
 0xbf2   :  { %v2575_v35 = vmul.f32 0.03125, %v2564_v38 }
 0xbf4   :  { %v7205_v36 = vpop.eup %7204  ;;  %v2579_v9 = vsub.f32 %v2558_v14, %v2575_v35  ;;  %v2746_v14 = vld [vmem:[%s8395_s7 + $0x30] sm:$0xff] }
 0xbf5   :  { %v2377_v44 = vmul.f32 %v7205_v36, %v7201_v21  ;;  %v6817_v27 = vpack.c.bf16 %v2747_v54, %v2746_v14 }
 0xbf6   :  { %v2583_v49 = vmul.f32 %v2579_v9, %v2579_v9 }
 0xbf7   :  { %6429 = vmatprep.mubr.msk.f32.mxu0 %vm386_vm8, %v2377_v44 }
 0xbf8   :  { %v7207_v50 = vpop.eup %7206  ;;  %v2587_v52 = vsel %vm198_vm5, %v2583_v49, 0.0 }
 0xbf9   :  { %2588 = vadd.xlane.f32.xlu0 %v2587_v52  ;;  %v2379_v59 = vmul.f32 %v7207_v50, %v7203_v25  ;;  %v2745_v25 = vld [vmem:[%s8395_s7 + $0x28] sm:$0xff] }
 0xbfa   :  { %v6813_v26 = vpack.c.bf16 %v2745_v25, %v2744_v24 }
 0xbfb   :  { %6430 = vmatmul.mubr.msk.f32.vlgmr.msra.gmra.mrb[20].mxu0 %vm386_vm8, %v2379_v59 }
 0xbfc   :  { %6433 = vmatpush3.msra.mxu0 %v7714_v19  ;;  %v2634_v19 = vld [vmem:[%s8394_s6 + $0x18] sm:$0xff] }
 0xbfd   :  { %2591 = vadd.xlane.f32.xlu0 %v2590_v60  ;;  %v6801_v58 = vpack.c.bf16 %v2634_v19, %v2633_v48  ;;  %6806 = vmatprep.subr.bf16.mxu0 %v6805_v0 }
 0xbff   :  { %6802 = vmatprep.subr.bf16.mxu1 %v6801_v58 }
 0xc00   :  { %6804 = vmatpush3.bf16.msra.mxu1 %v6801_v58 }
 0xc86   :  { %v2589_v30 = vpop.xlane.xlu0 %2588 }
 0xc87   :  { %v2599_v7 = vmul.f32 0.03125, %v2589_v30 }
 0xc89   :  { %v2603_v39 = vadd.f32 1e-05, %v2599_v7 }
 0xc8a   :  { %v2592_v2 = vpop.xlane.xlu0 %2591 }
 0xc8b   :  { %7208 = vrsqrt.f32 %v2603_v39  ;;  %v2600_v53 = vmul.f32 0.03125, %v2592_v2 }
 0xc8d   :  { %v2604_v3 = vadd.f32 1e-05, %v2600_v53 }
 0xc8f   :  { %7210 = vrsqrt.f32 %v2604_v3 }
 0xc95   :  { %v7209_v11 = vpop.eup %7208 }
 0xc96   :  { %v2611_v12 = vmul.f32 %v7209_v11, %v2579_v9 }
 0xc98   :  { %v2619_v41 = vmul.f32 %v7831_v10, %v2611_v12 }
 0xc99   :  { %v7211_v63 = vpop.eup %7210 }
 0xc9a   :  { %v2612_v51 = vmul.f32 %v7211_v63, %v2580_v37  ;;  %v7840_v13 = vadd.f32 %v7836_v15, %v2619_v41 }
 0xc9c   :  { %6445 = vmatprep.mubr.msk.f32.mxu1 %vm198_vm5, %v7840_v13  ;;  %v2620_v6 = vmul.f32 %v7831_v10, %v2612_v51 }
 0xc9e   :  { %v2628_v16 = vadd.f32 %v7836_v15, %v2620_v6 }
 0xca0   :  { %6446 = vmatmul.mubr.msk.f32.vlgmr.msra.gmra.mrb[24].mxu1 %vm198_vm5, %v2628_v16 }
 0xcce   :  { %v6431_v20 = vpop.f32.mrb[20].mxu0 }
 0xccf   :  { %v2458_v21 = vpop.f32.mrb[21].mxu0 }
 0xcd0   :  { %6434 = vmatprep.mubr.msk.f32.mxu0 %vm302_vm6, %v2458_v21 }
 0xcd1   :  { %6435 = vmatmul.mubr.msk.f32.vlgmr.msra.gmra.mrb[16].mxu0 %vm302_vm6, %v6431_v20 }
 0xcd2   :  { %6808 = vmatpush3.bf16.msra.mxu0 %v6805_v0 }
 0xcd3   :  { %6810 = vmatprep.subr.bf16.mxu0 %v6809_v22 }
 0xcd6   :  { %6812 = vmatpush3.bf16.msra.mxu0 %v6809_v22 }
 0xcd7   :  { %6814 = vmatprep.subr.bf16.mxu0 %v6813_v26 }
 0xcda   :  { %6816 = vmatpush3.bf16.msra.mxu0 %v6813_v26 }
 0xcdb   :  { %6818 = vmatprep.subr.bf16.mxu0 %v6817_v27 }
 0xcde   :  { %6820 = vmatpush3.bf16.msra.mxu0 %v6817_v27 }
 0xd73   :  { %v6447_v32 = vpop.f32.mrb[24].mxu1 }
 0xd74   :  { %v2723_v33 = vadd.f32 %v6447_v32, %v7871_v31  ;;  %v2717_v34 = vpop.f32.mrb[25].mxu1 }
 0xd75   :  { %v2718_v38 = vadd.f32 %v2717_v34, %v7871_v31 }
 0xd76   :  { %v2737_v36 = vmax.f32 %v2723_v33, 0.0 }
 0xd77   :  { %v2736_v35 = vmax.f32 %v2718_v38, 0.0 }
 0xd79   :  { %6467 = vmatprep.mubr.msk.f32.mxu0 %vm81_vm0, %v2736_v35 }
 0xd7a   :  { %6468 = vmatmul.mubr.msk.f32.vlgmr.msra.gmra.mrb[22].mxu0 %vm81_vm0, %v2737_v36 }
 0xda4   :  { %v6436_v37 = vpop.f32.mrb[16].mxu0 }
 0xda5   :  { %v2539_v9 = vpop.f32.mrb[17].mxu0  ;;  %v2557_v44 = vadd.f32 %v6436_v37, %v7766_v42 }
 0xda6   :  { %v2556_v49 = vadd.f32 %v7766_v42, %v2539_v9  ;;  %v5901_v9 = vld [vmem:[%s8392_s4 + $0x30] sm:$0xff] }
 0xda7   :  { %v2561_v55 = vadd.f32 %v2557_v44, %v7486_v43  ;;  %v2750_v43 = vsub.s32 5, %v7494_v46  ;;  %v5902_v44 = vld [vmem:[%s8392_s4 + $0x38] sm:$0xff] }
 0xda8   :  { %v2560_v50 = vadd.f32 %v2556_v49, %v7488_v45  ;;  %v6825_v49 = vpack.c.bf16 %v5902_v44, %v5901_v9 }
 0xda9   :  { %v2571_v59 = vsel %vm198_vm5, %v2561_v55, 0.0  ;;  %v7889_v29 = vrot.slane %v7826_v8, %v2750_v43 }
 0xdaa   :  { %v2568_v52 = vsel %vm198_vm5, %v2560_v50, 0.0 }
 0xdab   :  { %2569 = vadd.xlane.f32.xlu0 %v2568_v52 }
 0xdaf   :  { %2572 = vadd.xlane.f32.xlu0 %v2571_v59 }
 0xe38   :  { %v2570_v60 = vpop.xlane.xlu0 %2569 }
 0xe39   :  { %v2577_v57 = vmul.f32 0.03125, %v2570_v60 }
 0xe3b   :  { %v2581_v61 = vsub.f32 %v2560_v50, %v2577_v57 }
 0xe3c   :  { %v2573_v56 = vpop.xlane.xlu0 %2572 }
 0xe3d   :  { %v2578_v48 = vmul.f32 0.03125, %v2573_v56  ;;  %v2585_v19 = vmul.f32 %v2581_v61, %v2581_v61  ;;  %v2915_v56 = vsub.s32 7, %v7494_v46 }
 0xe3f   :  { %v2582_v58 = vsub.f32 %v2561_v55, %v2578_v48  ;;  %v2593_v62 = vsel %vm198_vm5, %v2585_v19, 0.0 }
 0xe40   :  { %2594 = vadd.xlane.f32.xlu0 %v2593_v62  ;;  %v7929_v62 = vrot.slane %v7826_v8, %v2915_v56 }
 0xe41   :  { %v2586_v42 = vmul.f32 %v2582_v58, %v2582_v58 }
 0xe43   :  { %v2596_v45 = vsel %vm198_vm5, %v2586_v42, 0.0 }
 0xe44   :  { %2597 = vadd.xlane.f32.xlu0 %v2596_v45 }
 0xe4d   :  { %v6469_v0 = vpop.f32.mrb[22].mxu0 }
 0xe4e   :  { %v2830_v30 = vpop.f32.mrb[23].mxu0  ;;  %v2836_v7 = vadd.f32 %v6469_v0, %v7889_v29 }
 0xe4f   :  { %v2831_v39 = vadd.f32 %v2830_v30, %v7889_v29 }
 0xe50   :  { %v2850_v3 = vadd.f32 %v2836_v7, %v2628_v16 }
 0xe51   :  { %v2849_v2 = vadd.f32 %v2831_v39, %v7840_v13 }
 0xe52   :  { %v2856_v11 = vsel %vm198_vm5, %v2850_v3, 0.0 }
 0xe53   :  { %v2853_v53 = vsel %vm198_vm5, %v2849_v2, 0.0 }
 0xe54   :  { %2854 = vadd.xlane.f32.xlu0 %v2853_v53 }
 0xe58   :  { %2857 = vadd.xlane.f32.xlu0 %v2856_v11 }
 0xecd   :  { %v2595_v12 = vpop.xlane.xlu0 %2594 }
 0xece   :  { %v2601_v41 = vmul.f32 0.03125, %v2595_v12 }
 0xed0   :  { %v2605_v63 = vadd.f32 1e-05, %v2601_v41 }
 0xed1   :  { %v2598_v51 = vpop.xlane.xlu0 %2597 }
 0xed2   :  { %7212 = vrsqrt.f32 %v2605_v63  ;;  %v2602_v6 = vmul.f32 0.03125, %v2598_v51 }
 0xed4   :  { %v2606_v17 = vadd.f32 1e-05, %v2602_v6 }
 0xed6   :  { %7214 = vrsqrt.f32 %v2606_v17 }
 0xedc   :  { %v7213_v18 = vpop.eup %7212 }
 0xedd   :  { %v2613_v20 = vmul.f32 %v7213_v18, %v2581_v61  ;;  %v2907_v61 = vsub.s32 6, %v7494_v46  ;;  %v5710_v46 = vld [vmem:[%s8397_s9 + $0x8] sm:$0xff] }
 0xedf   :  { %v2621_v21 = vmul.f32 %v7831_v10, %v2613_v20  ;;  %v7924_v48 = vrot.slane %v7826_v8, %v2907_v61 }
 0xee0   :  { %v7215_v13 = vpop.eup %7214 }
 0xee1   :  { %v2855_v22 = vpop.xlane.xlu0 %2854  ;;  %v7898_v16 = vadd.f32 %v7836_v15, %v2621_v21  ;;  %v2614_v24 = vmul.f32 %v7215_v13, %v2582_v58 }
 0xee2   :  { %v2865_v25 = vmul.f32 0.03125, %v2855_v22 }
 0xee3   :  { %6448 = vmatprep.mubr.msk.f32.mxu1 %vm198_vm5, %v7898_v16  ;;  %v2622_v26 = vmul.f32 %v7831_v10, %v2614_v24  ;;  %v5899_v10 = vld [vmem:[%s8392_s4 + $0x20] sm:$0xff] }
 0xee4   :  { %v2869_v14 = vsub.f32 %v2849_v2, %v2865_v25 }
 0xee5   :  { %v2858_v54 = vpop.xlane.xlu0 %2857  ;;  %v2630_v27 = vadd.f32 %v7836_v15, %v2622_v26  ;;  %v5900_v15 = vld [vmem:[%s8392_s4 + $0x28] sm:$0xff] }
 0xee6   :  { %v2866_v32 = vmul.f32 0.03125, %v2858_v54  ;;  %v2873_v33 = vmul.f32 %v2869_v14, %v2869_v14  ;;  %v6821_v37 = vpack.c.bf16 %v5900_v15, %v5899_v10 }
 0xee7   :  { %6449 = vmatmul.mubr.msk.f32.gmra.mrb[26].mxu1 %vm198_vm5, %v2630_v27 }
 0xee8   :  { %v2870_v34 = vsub.f32 %v2850_v3, %v2866_v32  ;;  %v2877_v38 = vsel %vm198_vm5, %v2873_v33, 0.0  ;;  %6822 = vmatprep.subr.bf16.mxu1 %v6821_v37 }
 0xee9   :  { %2878 = vadd.xlane.f32.xlu0 %v2877_v38  ;;  %6824 = vmatpush3.bf16.msra.mxu1 %v6821_v37 }
 0xeea   :  { %v2874_v35 = vmul.f32 %v2870_v34, %v2870_v34  ;;  %6826 = vmatprep.subr.bf16.mxu1 %v6825_v49 }
 0xeec   :  { %v2880_v36 = vsel %vm198_vm5, %v2874_v35, 0.0 }
 0xeed   :  { %2881 = vadd.xlane.f32.xlu1 %v2880_v36  ;;  %6828 = vmatpush3.bf16.msra.mxu1 %v6825_v49 }
 0xf76   :  { %v2879_v50 = vpop.xlane.xlu0 %2878 }
 0xf77   :  { %v2889_v52 = vmul.f32 0.03125, %v2879_v50 }
 0xf79   :  { %v2893_v55 = vadd.f32 1e-05, %v2889_v52 }
 0xf7a   :  { %v2882_v59 = vpop.xlane.xlu1 %2881 }
 0xf7b   :  { %7216 = vrsqrt.f32 %v2893_v55  ;;  %v2890_v60 = vmul.f32 0.03125, %v2882_v59 }
 0xf7d   :  { %v2894_v57 = vadd.f32 1e-05, %v2890_v60 }
 0xf7f   :  { %7218 = vrsqrt.f32 %v2894_v57 }
 0xf85   :  { %v7217_v19 = vpop.eup %7216 }
 0xf86   :  { %v2901_v58 = vmul.f32 %v7217_v19, %v2869_v14 }
 0xf88   :  { %v2909_v42 = vmul.f32 %v7924_v48, %v2901_v58 }
 0xf89   :  { %v7219_v45 = vpop.eup %7218 }
 0xf8a   :  { %v2902_v0 = vmul.f32 %v7219_v45, %v2870_v34  ;;  %v7933_v30 = vadd.f32 %v7929_v62, %v2909_v42 }
 0xf8c   :  { %v2910_v7 = vmul.f32 %v7924_v48, %v2902_v0  ;;  %6481 = vmatprep.mubr.msk.f32.mxu1 %vm198_vm5, %v7933_v30 }
 0xf8e   :  { %v7939_v39 = vadd.f32 %v7929_v62, %v2910_v7 }
 0xf90   :  { %6482 = vmatmul.mubr.msk.f32.vlgmr.msra.gmra.mrb[28].mxu1 %vm198_vm5, %v7939_v39 }
 0xfba   :  { %v6450_v8 = vpop.f32.mrb[26].mxu1 }
 0xfbb   :  { %v2733_v2 = vadd.f32 %v6450_v8, %v7871_v31  ;;  %v2727_v53 = vpop.f32.mrb[27].mxu1 }
 0xfbc   :  { %v2728_v3 = vadd.f32 %v2727_v53, %v7871_v31 }
 0xfbd   :  { %v2739_v12 = vmax.f32 %v2733_v2, 0.0 }
 0xfbe   :  { %v2738_v11 = vmax.f32 %v2728_v3, 0.0 }
 0xfc0   :  { %6470 = vmatprep.mubr.msk.f32.mxu0 %vm81_vm0, %v2738_v11 }
 0xfc1   :  { %6471 = vmatmul.mubr.msk.f32.gmra.mrb[24].mxu0 %vm81_vm0, %v2739_v12 }
0x1063   :  { %v6483_v41 = vpop.f32.mrb[28].mxu1 }
0x1064   :  { %v3013_v63 = vpop.f32.mrb[29].mxu1 }
0x1094   :  { %v6472_v51 = vpop.f32.mrb[24].mxu0 }
0x1095   :  { %v2846_v6 = vadd.f32 %v6472_v51, %v7889_v29  ;;  %v2840_v17 = vpop.f32.mrb[25].mxu0 }
0x1096   :  { %v2841_v18 = vadd.f32 %v2840_v17, %v7889_v29 }
0x1097   :  { %v2852_v20 = vadd.f32 %v2846_v6, %v2630_v27  ;;  %v8014_v6 = vld [vmem:[%s8389_s1 + $0x8] sm:$0xff] }
0x1098   :  { %v2851_v21 = vadd.f32 %v2841_v18, %v7898_v16  ;;  %v7957_v16 = vld [vmem:[%s8398_s10 + $0x8] sm:$0xff] }
0x1099   :  { %v2862_v13 = vsel %vm198_vm5, %v2852_v20, 0.0  ;;  %v7961_v27 = vrot.slane %v7957_v16, %v7497_v47 }
0x109a   :  { %2863 = vadd.xlane.f32.xlu1 %v2862_v13  ;;  %v2859_v31 = vsel %vm198_vm5, %v2851_v21, 0.0 }
0x109b   :  { %2860 = vadd.xlane.f32.xlu0 %v2859_v31  ;;  %v7964_v38 = vadd.f32 %v6483_v41, %v7961_v27  ;;  %v7967_v35 = vadd.f32 %v3013_v63, %v7961_v27 }
0x109d   :  { %v7971_v36 = vpack.i.bf16 %v7964_v38, %v7967_v35 }
0x1127   :  { %v2864_v22 = vpop.xlane.xlu1 %2863 }
0x1128   :  { %v2868_v24 = vmul.f32 0.03125, %v2864_v22  ;;  %v2861_v25 = vpop.xlane.xlu0 %2860 }
0x1129   :  { %v2867_v26 = vmul.f32 0.03125, %v2861_v25 }
0x112a   :  { %v2872_v14 = vsub.f32 %v2852_v20, %v2868_v24  ;;  %v8020_v20 = vld [vmem:[%s8389_s1] sm:$0xff] }
0x112b   :  { %v2871_v54 = vsub.f32 %v2851_v21, %v2867_v26 }
0x112c   :  { %v2876_v32 = vmul.f32 %v2872_v14, %v2872_v14 }
0x112d   :  { %v2875_v33 = vmul.f32 %v2871_v54, %v2871_v54 }
0x112e   :  { %v2886_v34 = vsel %vm198_vm5, %v2876_v32, 0.0 }
0x112f   :  { %2887 = vadd.xlane.f32.xlu1 %v2886_v34  ;;  %v2883_v29 = vsel %vm198_vm5, %v2875_v33, 0.0 }
0x1130   :  { %2884 = vadd.xlane.f32.xlu0 %v2883_v29 }
0x1140   :  { %7070 = vrot.lane.b32.xlu1 %v7971_v36, %s7336_s3 }
0x1144   :  { %3230 = vrot.lane.b32.xlu1 %v7967_v35, %s7338_s20 }
0x1146   :  { %7065 = vrot.lane.b32.xlu0 %v7971_v36, %s7337_s19 }
0x114a   :  { %3232 = vrot.lane.b32.xlu0 %v7964_v38, %s7338_s20 }
0x11bc   :  { %v2888_v10 = vpop.xlane.xlu1 %2887 }
0x11bd   :  { %v2892_v15 = vmul.f32 0.03125, %v2888_v10  ;;  %v2885_v37 = vpop.xlane.xlu0 %2884 }
0x11be   :  { %v2891_v9 = vmul.f32 0.03125, %v2885_v37 }
0x11bf   :  { %v2896_v44 = vadd.f32 1e-05, %v2892_v15 }
0x11c0   :  { %v2895_v49 = vadd.f32 1e-05, %v2891_v9  ;;  %v7071_v50 = vpop.permute.xlu1 %7070 }
0x11c1   :  { %7220 = vrsqrt.f32 %v2896_v44  ;;  %v7073_v52 = vunpack.i.h.bf16 %v7071_v50  ;;  %v7072_v55 = vunpack.i.l.bf16 %v7071_v50  ;;  %v7066_v59 = vpop.permute.xlu0 %7065 }
0x11c2   :  { %7222 = vrsqrt.f32 %v2895_v49  ;;  %v7068_v60 = vunpack.i.h.bf16 %v7066_v59  ;;  %v7067_v57 = vunpack.i.l.bf16 %v7066_v59 }
0x11c3   :  { %v6839_v19 = vpack.c.bf16 %v7073_v52, %v7072_v55 }
0x11c4   :  { %v6829_v58 = vpack.c.bf16 %v7068_v60, %v7067_v57  ;;  %v3231_v42 = vpop.permute.xlu1 %3230 }
0x11c5   :  { %6841 = vmatprep.subr.msk.bf16.mxu0 %vm7530_vm7, %v6839_v19  ;;  %6505 = vmatprep.mubr.msk.f32.mxu0 %vm302_vm6, %v3231_v42  ;;  %v3233_v7 = vpop.permute.xlu0 %3232 }
0x11c6   :  { %6831 = vmatprep.subr.msk.bf16.mxu1 %vm7530_vm7, %v6829_v58  ;;  %6844 = vmatpush3.bf16.xpose.msk.msra.mxu0 %vm7530_vm7, %v6839_v19 }
0x11c7   :  { %6834 = vmatpush3.bf16.xpose.msk.msra.mxu1 %vm7530_vm7, %v6829_v58 }
0x11cb   :  { %v7221_v45 = vpop.eup %7220 }
0x11cc   :  { %v7223_v0 = vpop.eup %7222  ;;  %v2904_v8 = vmul.f32 %v7221_v45, %v2872_v14 }
0x11cd   :  { %6506 = vmatmul.mubr.msk.f32.vlgmr.msra.gmra.mrb[26].mxu0 %vm302_vm6, %v3233_v7  ;;  %v2903_v2 = vmul.f32 %v7223_v0, %v2871_v54 }
0x11ce   :  { %v2912_v53 = vmul.f32 %v7924_v48, %v2904_v8 }
0x11cf   :  { %v2911_v3 = vmul.f32 %v7924_v48, %v2903_v2 }
0x11d0   :  { %v7997_v12 = vadd.f32 %v7929_v62, %v2912_v53 }
0x11d1   :  { %v7994_v11 = vadd.f32 %v7929_v62, %v2911_v3 }
0x11d3   :  { %6484 = vmatprep.mubr.msk.f32.mxu1 %vm198_vm5, %v7994_v11 }
0x11d4   :  { %6485 = vmatmul.mubr.msk.f32.gmra.mrb[30].mxu1 %vm198_vm5, %v7997_v12 }
0x11d5   :  { %6491 = vmatprep.mubr.msk.f32.mxu1 %vm302_vm6, %v7967_v35 }
0x11d8   :  { %6492 = vmatmul.mubr.msk.f32.vlgmr.msra.gmra.mrb[32].mxu1 %vm302_vm6, %v7964_v38 }
0x12a0   :  { %v6507_v41 = vpop.f32.mrb[26].mxu0 }
0x12a1   :  { %v3312_v48 = vpop.f32.mrb[27].mxu0  ;;  %v3318_v22 = vadd.f32 %v8014_v6, %v6507_v41 }
0x12a2   :  { %v3313_v13 = vadd.f32 %v8020_v20, %v3312_v48 }
0x12a3   :  { %v3324_v26 = vsel %vm386_vm8, %v3318_v22, -inf }
0x12a4   :  { %v3321_v25 = vsel %vm386_vm8, %v3313_v13, -inf }
0x12a7   :  { %v8007_v63 = vpop.f32.mrb[30].mxu1 }
0x12a8   :  { %v8009_v51 = vpop.f32.mrb[31].mxu1 }
0x12ab   :  { %v6493_v62 = vpop.f32.mrb[32].mxu1 }
0x12ac   :  { %v3118_v17 = vadd.f32 %v8014_v6, %v6493_v62  ;;  %v3112_v18 = vpop.f32.mrb[33].mxu1 }
0x12ad   :  { %v3113_v21 = vadd.f32 %v8020_v20, %v3112_v18 }
0x12ae   :  { %v3124_v31 = vsel %vm386_vm8, %v3118_v17, -inf }
0x12af   :  { %3125 = vmax.xlane.f32.xlu0 %v3124_v31  ;;  %v3121_v24 = vsel %vm386_vm8, %v3113_v21, -inf }
0x12b0   :  { %3122 = vmax.xlane.f32.xlu1 %v3121_v24 }
0x12b3   :  { %3322 = vmax.xlane.f32.xlu0 %v3321_v25 }
0x12b4   :  { %3325 = vmax.xlane.f32.xlu1 %v3324_v26 }
0x133c   :  { %v3126_v14 = vpop.xlane.xlu0 %3125 }
0x133d   :  { %v3123_v54 = vpop.xlane.xlu1 %3122  ;;  %v3128_v33 = vsub.f32 %v3118_v17, %v3126_v14 }
0x133e   :  { %v3127_v32 = vsub.f32 %v3113_v21, %v3123_v54 }
0x133f   :  { %v3131_v44 = vmul.f32 1.442695, %v3128_v33 }
0x1340   :  { %v3323_v34 = vpop.xlane.xlu0 %3322  ;;  %v3129_v37 = vmul.f32 1.442695, %v3127_v32 }
0x1341   :  { %v3327_v29 = vsub.f32 %v3313_v13, %v3323_v34  ;;  %v3326_v10 = vpop.xlane.xlu1 %3325 }
0x1342   :  { %v3328_v15 = vsub.f32 %v3318_v22, %v3326_v10 }
0x1343   :  { %v3329_v9 = vmul.f32 1.442695, %v3327_v29 }
0x1344   :  { %v3331_v49 = vmul.f32 1.442695, %v3328_v15 }
0x1345   :  { %7224 = vpow2.f32 %v3329_v9  ;;  %v8066_v9 = vadd.f32 %v8009_v51, %v7961_v27  ;;  %v8081_v51 = vld [vmem:[%s8393_s5 + $0x20] sm:$0xff] }
0x1346   :  { %7226 = vpow2.f32 %v3331_v49  ;;  %v8074_v49 = vld [vmem:[%s8393_s5 + $0x28] sm:$0xff] }
0x1347   :  { %7228 = vpow2.f32 %v3129_v37  ;;  %6515 = vmatprep.subr.mxu0 %v8074_v49 }
0x1348   :  { %7230 = vpow2.f32 %v3131_v44  ;;  %6516 = vmatpush3.msra.mxu0 %v8074_v49 }
0x1349   :  { %6520 = vmatprep.subr.mxu0 %v8081_v51 }
0x134f   :  { %v7225_v50 = vpop.eup %7224 }
0x1350   :  { %v7227_v52 = vpop.eup %7226  ;;  %v3333_v55 = vsel %vm386_vm8, %v7225_v50, 0.0 }
0x1351   :  { %v7229_v59 = vpop.eup %7228  ;;  %3334 = vadd.xlane.f32.xlu0 %v3333_v55  ;;  %v3336_v60 = vsel %vm386_vm8, %v7227_v52, 0.0 }
0x1352   :  { %v7231_v57 = vpop.eup %7230  ;;  %3337 = vadd.xlane.f32.xlu1 %v3336_v60  ;;  %v3133_v19 = vsel %vm386_vm8, %v7229_v59, 0.0 }
0x1353   :  { %v3136_v58 = vsel %vm386_vm8, %v7231_v57, 0.0 }
0x1355   :  { %3134 = vadd.xlane.f32.xlu0 %v3133_v19 }
0x1356   :  { %3137 = vadd.xlane.f32.xlu1 %v3136_v58 }
0x1367   :  { %7080 = vrot.lane.b32.xlu1 %v7971_v36, %s7342_s26 }
0x136b   :  { %7075 = vrot.lane.b32.xlu0 %v7971_v36, %s7339_s25  ;;  %7085 = vrot.lane.b32.xlu1 %v7971_v36, %s7340_s0 }
0x136f   :  { %3592 = vrot.lane.b32.xlu0 %v7967_v35, %s7341_s2  ;;  %3594 = vrot.lane.b32.xlu1 %v7964_v38, %s7341_s2 }
0x1373   :  { %7090 = vrot.lane.b32.xlu0 %v7971_v36, %s7343_s27  ;;  %3875 = vrot.lane.b32.xlu1 %v7967_v35, %s7344_s28 }
0x1377   :  { %3877 = vrot.lane.b32.xlu0 %v7964_v38, %s7344_s28 }
0x13de   :  { %v3335_v42 = vpop.xlane.xlu0 %3334 }
0x13df   :  { %v3338_v45 = vpop.xlane.xlu1 %3337  ;;  %7232 = vrcp.f32 %v3335_v42 }
0x13e2   :  { %v3135_v0 = vpop.xlane.xlu0 %3134 }
0x13e3   :  { %7234 = vrcp.f32 %v3135_v0  ;;  %v3138_v7 = vpop.xlane.xlu1 %3137 }
0x13e4   :  { %7236 = vrcp.f32 %v3138_v7 }
0x13e5   :  { %7238 = vrcp.f32 %v3338_v45 }
0x13e6   :  { %v7076_v8 = vpop.permute.xlu0 %7075 }
0x13e7   :  { %v7078_v2 = vunpack.i.h.bf16 %v7076_v8  ;;  %v7077_v53 = vunpack.i.l.bf16 %v7076_v8  ;;  %v7081_v3 = vpop.permute.xlu1 %7080 }
0x13e8   :  { %v7083_v41 = vunpack.i.h.bf16 %v7081_v3  ;;  %v7082_v48 = vunpack.i.l.bf16 %v7081_v3 }
0x13e9   :  { %v6835_v62 = vpack.c.bf16 %v7078_v2, %v7077_v53  ;;  %v7233_v18 = vpop.eup %7232 }
0x13ea   :  { %v6845_v17 = vpack.c.bf16 %v7083_v41, %v7082_v48  ;;  %v3593_v21 = vpop.permute.xlu0 %3592  ;;  %v3340_v14 = vmul.f32 %v7233_v18, %v7225_v50 }
0x13eb   :  { %6836 = vmatprep.subr.bf16.mxu1 %v6835_v62  ;;  %v7086_v35 = vpop.permute.xlu1 %7085 }
0x13ec   :  { %6838 = vmatpush3.bf16.msra.mxu1 %v6835_v62  ;;  %v7088_v13 = vunpack.i.h.bf16 %v7086_v35  ;;  %v7087_v31 = vunpack.i.l.bf16 %v7086_v35 }
0x13ed   :  { %v7235_v38 = vpop.eup %7234  ;;  %6846 = vmatprep.subr.bf16.mxu1 %v6845_v17 }
0x13ee   :  { %v7237_v22 = vpop.eup %7236  ;;  %v3140_v24 = vmul.f32 %v7235_v38, %v7229_v59  ;;  %v6849_v54 = vpack.c.bf16 %v7088_v13, %v7087_v31  ;;  %v7091_v33 = vpop.permute.xlu0 %7090  ;;  %v8097_v38 = vadd.f32 %v8007_v63, %v7961_v27 }
0x13ef   :  { %v3142_v25 = vmul.f32 %v7237_v22, %v7231_v57  ;;  %v7239_v26 = vpop.eup %7238  ;;  %v7093_v34 = vunpack.i.h.bf16 %v7091_v33  ;;  %v7092_v29 = vunpack.i.l.bf16 %v7091_v33  ;;  %v3595_v15 = vpop.permute.xlu1 %3594 }
0x13f0   :  { %6498 = vmatprep.mubr.msk.f32.mxu1 %vm386_vm8, %v3140_v24  ;;  %v3342_v32 = vmul.f32 %v7239_v26, %v7227_v52 }
0x13f1   :  { %6499 = vmatmul.mubr.msk.f32.vlgmr.msra.gmra.mrb[34].mxu1 %vm386_vm8, %v3142_v25  ;;  %v6859_v10 = vpack.c.bf16 %v7093_v34, %v7092_v29 }
0x13f2   :  { %6848 = vmatpush3.bf16.msra.mxu1 %v6845_v17  ;;  %6512 = vmatprep.mubr.msk.f32.mxu1 %vm386_vm8, %v3340_v14  ;;  %v3878_v44 = vpop.permute.xlu0 %3877 }
0x13f3   :  { %6851 = vmatprep.subr.msk.bf16.mxu1 %vm7530_vm7, %v6849_v54  ;;  %v3876_v37 = vpop.permute.xlu1 %3875 }
0x13f5   :  { %6513 = vmatmul.mubr.msk.f32.vlgmr.msra.gmra.mrb[36].mxu1 %vm386_vm8, %v3342_v32 }
0x13f6   :  { %6529 = vmatprep.mubr.msk.f32.mxu1 %vm302_vm6, %v3593_v21  ;;  %v8101_v21 = vpack.i.bf16 %v8097_v38, %v8066_v9 }
0x13fb   :  { %6854 = vmatpush3.bf16.xpose.msk.msra.mxu1 %vm7530_vm7, %v6849_v54 }
0x13fc   :  { %6861 = vmatprep.subr.msk.bf16.mxu1 %vm7530_vm7, %v6859_v10 }
0x1402   :  { %6530 = vmatmul.mubr.msk.f32.vlgmr.msra.gmra.mrb[38].mxu1 %vm302_vm6, %v3595_v15 }
0x1403   :  { %6864 = vmatpush3.bf16.xpose.msk.msra.mxu1 %vm7530_vm7, %v6859_v10  ;;  %6548 = vmatprep.mubr.msk.f32.mxu1 %vm302_vm6, %v3876_v37  ;;  %v8128_v10 = vld [vmem:[%s8393_s5 + $0x30] sm:$0xff] }
0x140a   :  { %6549 = vmatmul.mubr.msk.f32.vlgmr.msra.gmra.mrb[40].mxu1 %vm302_vm6, %v3878_v44 }
0x140b   :  { %6567 = vmatprep.mubr.msk.f32.mxu1 %vm302_vm6, %v8066_v9 }
0x14c4   :  { %v6500_v50 = vpop.f32.mrb[34].mxu1 }
0x14c5   :  { %v3221_v52 = vpop.f32.mrb[35].mxu1 }
0x14c8   :  { %v6514_v55 = vpop.f32.mrb[36].mxu1 }
0x14c9   :  { %v3421_v59 = vpop.f32.mrb[37].mxu1 }
0x14ca   :  { %6517 = vmatprep.mubr.msk.f32.mxu0 %vm302_vm6, %v3421_v59 }
0x14cb   :  { %6518 = vmatmul.mubr.msk.f32.vlgmr.msra.gmra.mrb[28].mxu0 %vm302_vm6, %v6514_v55 }
0x14cc   :  { %6522 = vmatprep.mubr.msk.f32.mxu0 %vm302_vm6, %v3221_v52  ;;  %6521 = vmatpush3.msra.mxu0 %v8081_v51 }
0x14d3   :  { %6523 = vmatmul.mubr.msk.f32.vlgmr.msra.gmra.mrb[28].mxu0 %vm302_vm6, %v6500_v50 }
0x14d5   :  { %v6531_v60 = vpop.f32.mrb[38].mxu1 }
0x14d6   :  { %v3680_v57 = vadd.f32 %v8014_v6, %v6531_v60  ;;  %v3674_v19 = vpop.f32.mrb[39].mxu1 }
0x14d7   :  { %v3675_v58 = vadd.f32 %v8020_v20, %v3674_v19 }
0x14d8   :  { %v3686_v42 = vsel %vm386_vm8, %v3680_v57, -inf }
0x14d9   :  { %3687 = vmax.xlane.f32.xlu0 %v3686_v42  ;;  %v3683_v45 = vsel %vm386_vm8, %v3675_v58, -inf }
0x14da   :  { %3684 = vmax.xlane.f32.xlu1 %v3683_v45 }
0x14dd   :  { %v6550_v0 = vpop.f32.mrb[40].mxu1 }
0x14de   :  { %v3957_v7 = vpop.f32.mrb[41].mxu1  ;;  %v3963_v63 = vadd.f32 %v8014_v6, %v6550_v0 }
0x14df   :  { %v3958_v27 = vadd.f32 %v8020_v20, %v3957_v7 }
0x14e0   :  { %v3969_v31 = vsel %vm386_vm8, %v3963_v63, -inf }
0x14e1   :  { %v3966_v13 = vsel %vm386_vm8, %v3958_v27, -inf }
0x1566   :  { %v3688_v8 = vpop.xlane.xlu0 %3687 }
0x1567   :  { %v3690_v2 = vsub.f32 %v3680_v57, %v3688_v8  ;;  %v3685_v53 = vpop.xlane.xlu1 %3684 }
0x1568   :  { %v3689_v3 = vsub.f32 %v3675_v58, %v3685_v53 }
0x1569   :  { %v3693_v41 = vmul.f32 1.442695, %v3690_v2 }
0x156a   :  { %v3691_v48 = vmul.f32 1.442695, %v3689_v3 }
0x156b   :  { %7240 = vpow2.f32 %v3693_v41 }
0x156c   :  { %7242 = vpow2.f32 %v3691_v48 }
0x1575   :  { %v7241_v62 = vpop.eup %7240 }
0x1576   :  { %v7243_v17 = vpop.eup %7242  ;;  %v3698_v35 = vsel %vm386_vm8, %v7241_v62, 0.0 }
0x1577   :  { %3699 = vadd.xlane.f32.xlu1 %v3698_v35  ;;  %v3695_v18 = vsel %vm386_vm8, %v7243_v17, 0.0 }
0x1578   :  { %3696 = vadd.xlane.f32.xlu0 %v3695_v18 }
0x1588   :  { %7100 = vrot.lane.b32.xlu1 %v8101_v21, %s7337_s19 }
0x158c   :  { %7105 = vrot.lane.b32.xlu1 %v8101_v21, %s7336_s3 }
0x158e   :  { %7095 = vrot.lane.b32.xlu0 %v7971_v36, %s7345_s14 }
0x1590   :  { %4358 = vrot.lane.b32.xlu1 %v8097_v38, %s7338_s20 }
0x1592   :  { %4356 = vrot.lane.b32.xlu0 %v8066_v9, %s7338_s20 }
0x15b1   :  { %3967 = vmax.xlane.f32.xlu0 %v3966_v13 }
0x15b4   :  { %3970 = vmax.xlane.f32.xlu1 %v3969_v31 }
0x15c5   :  { %7110 = vrot.lane.b32.xlu1 %v7971_v36, %s7346_s17 }
0x15c9   :  { %4718 = vrot.lane.b32.xlu1 %v8066_v9, %s7341_s2 }
0x15cd   :  { %4720 = vrot.lane.b32.xlu1 %v8097_v38, %s7341_s2 }
0x1604   :  { %v3700_v22 = vpop.xlane.xlu1 %3699 }
0x1605   :  { %7244 = vrcp.f32 %v3700_v22  ;;  %v3697_v20 = vpop.xlane.xlu0 %3696 }
0x1606   :  { %7246 = vrcp.f32 %v3697_v20 }
0x1608   :  { %v7101_v6 = vpop.permute.xlu1 %7100 }
0x1609   :  { %v7103_v24 = vunpack.i.h.bf16 %v7101_v6  ;;  %v7102_v25 = vunpack.i.l.bf16 %v7101_v6  ;;  %v7096_v26 = vpop.permute.xlu0 %7095 }
0x160a   :  { %v7098_v14 = vunpack.i.h.bf16 %v7096_v26  ;;  %v7097_v54 = vunpack.i.l.bf16 %v7096_v26 }
0x160b   :  { %v6869_v32 = vpack.c.bf16 %v7103_v24, %v7102_v25  ;;  %v8152_v25 = vld [vmem:[%s8389_s1 + $0x18] sm:$0xff] }
0x160c   :  { %v6855_v33 = vpack.c.bf16 %v7098_v14, %v7097_v54  ;;  %v7106_v34 = vpop.permute.xlu1 %7105  ;;  %v8161_v54 = vld [vmem:[%s8389_s1 + $0x10] sm:$0xff] }
0x160d   :  { %v7108_v36 = vunpack.i.h.bf16 %v7106_v34  ;;  %v7107_v29 = vunpack.i.l.bf16 %v7106_v34  ;;  %6871 = vmatprep.subr.msk.bf16.mxu1 %vm7530_vm7, %v6869_v32  ;;  %v4357_v55 = vpop.permute.xlu0 %4356 }
0x160e   :  { %6856 = vmatprep.subr.bf16.mxu0 %v6855_v33  ;;  %6874 = vmatpush3.bf16.xpose.msk.msra.mxu1 %vm7530_vm7, %v6869_v32 }
0x160f   :  { %v7245_v15 = vpop.eup %7244  ;;  %v6879_v37 = vpack.c.bf16 %v7108_v36, %v7107_v29  ;;  %6858 = vmatpush3.bf16.msra.mxu0 %v6855_v33 }
0x1610   :  { %v7247_v44 = vpop.eup %7246  ;;  %6539 = vmatprep.subr.mxu0 %v8128_v10  ;;  %v3704_v52 = vmul.f32 %v7245_v15, %v7241_v62  ;;  %v4359_v59 = vpop.permute.xlu1 %4358 }
0x1611   :  { %6881 = vmatprep.subr.msk.bf16.mxu1 %vm7530_vm7, %v6879_v37  ;;  %v3702_v50 = vmul.f32 %v7247_v44, %v7243_v17 }
0x1613   :  { %6536 = vmatprep.mubr.msk.f32.mxu0 %vm386_vm8, %v3702_v50 }
0x1614   :  { %6537 = vmatmul.mubr.msk.f32.vlgmr.msra.gmra.mrb[30].mxu0 %vm386_vm8, %v3704_v52 }
0x1615   :  { %6568 = vmatmul.mubr.msk.f32.vlgmr.msra.gmra.mrb[42].mxu1 %vm302_vm6, %v8097_v38  ;;  %6540 = vmatpush3.msra.mxu0 %v8128_v10 }
0x1616   :  { %6884 = vmatpush3.bf16.xpose.msk.msra.mxu1 %vm7530_vm7, %v6879_v37  ;;  %6581 = vmatprep.mubr.msk.f32.mxu1 %vm302_vm6, %v4357_v55 }
0x161d   :  { %6582 = vmatmul.mubr.msk.f32.vlgmr.msra.gmra.mrb[44].mxu1 %vm302_vm6, %v4359_v59 }
0x163e   :  { %v3968_v60 = vpop.xlane.xlu0 %3967 }
0x163f   :  { %v3972_v57 = vsub.f32 %v3958_v27, %v3968_v60  ;;  %v8179_v60 = vld [vmem:[%s8393_s5 + $0x38] sm:$0xff] }
0x1641   :  { %v3974_v19 = vmul.f32 1.442695, %v3972_v57  ;;  %v3971_v58 = vpop.xlane.xlu1 %3970 }
0x1642   :  { %v3973_v42 = vsub.f32 %v3963_v63, %v3971_v58 }
0x1643   :  { %7248 = vpow2.f32 %v3974_v19 }
0x1644   :  { %v3976_v45 = vmul.f32 1.442695, %v3973_v42 }
0x1645   :  { %v7111_v0 = vpop.permute.xlu1 %7110 }
0x1646   :  { %7250 = vpow2.f32 %v3976_v45  ;;  %v7113_v7 = vunpack.i.h.bf16 %v7111_v0  ;;  %v7112_v8 = vunpack.i.l.bf16 %v7111_v0 }
0x1648   :  { %v6865_v2 = vpack.c.bf16 %v7113_v7, %v7112_v8 }
0x1649   :  { %v4719_v53 = vpop.permute.xlu1 %4718 }
0x164a   :  { %6866 = vmatprep.subr.bf16.mxu0 %v6865_v2  ;;  %6605 = vmatprep.mubr.msk.f32.mxu1 %vm302_vm6, %v4719_v53 }
0x164d   :  { %v7249_v3 = vpop.eup %7248  ;;  %v4721_v15 = vpop.permute.xlu1 %4720 }
0x164e   :  { %v3978_v41 = vsel %vm386_vm8, %v7249_v3, 0.0 }
0x164f   :  { %3979 = vadd.xlane.f32.xlu0 %v3978_v41 }
0x1650   :  { %v7251_v48 = vpop.eup %7250 }
0x1651   :  { %v3981_v62 = vsel %vm386_vm8, %v7251_v48, 0.0 }
0x1653   :  { %3982 = vadd.xlane.f32.xlu0 %v3981_v62 }
0x1669   :  { %7115 = vrot.lane.b32.xlu0 %v8101_v21, %s7340_s0 }
0x16dc   :  { %v3980_v17 = vpop.xlane.xlu0 %3979 }
0x16dd   :  { %7252 = vrcp.f32 %v3980_v17 }
0x16e0   :  { %v3983_v35 = vpop.xlane.xlu0 %3982 }
0x16e1   :  { %7254 = vrcp.f32 %v3983_v35 }
0x16e4   :  { %v7116_v18 = vpop.permute.xlu0 %7115 }
0x16e5   :  { %v7118_v27 = vunpack.i.h.bf16 %v7116_v18  ;;  %v7117_v63 = vunpack.i.l.bf16 %v7116_v18 }
0x16e7   :  { %v7253_v13 = vpop.eup %7252  ;;  %v6889_v31 = vpack.c.bf16 %v7118_v27, %v7117_v63  ;;  %v6538_v22 = vpop.f32.mrb[30].mxu0 }
0x16e8   :  { %v3783_v20 = vpop.f32.mrb[31].mxu0  ;;  %v6569_v6 = vpop.f32.mrb[42].mxu1  ;;  %v3985_v24 = vmul.f32 %v7253_v13, %v7249_v3 }
0x16e9   :  { %v4244_v26 = vadd.f32 %v8152_v25, %v6569_v6  ;;  %6541 = vmatprep.mubr.msk.f32.mxu0 %vm302_vm6, %v3783_v20  ;;  %v4238_v14 = vpop.f32.mrb[43].mxu1  ;;  %6891 = vmatprep.subr.msk.bf16.mxu1 %vm7530_vm7, %v6889_v31 }
0x16ea   :  { %v4239_v32 = vadd.f32 %v8161_v54, %v4238_v14  ;;  %6542 = vmatmul.mubr.msk.f32.vlgmr.msra.gmra.mrb[28].mxu0 %vm302_vm6, %v6538_v22  ;;  %6894 = vmatpush3.bf16.xpose.msk.msra.mxu1 %vm7530_vm7, %v6889_v31 }
0x16eb   :  { %v7255_v33 = vpop.eup %7254  ;;  %6868 = vmatpush3.bf16.msra.mxu0 %v6865_v2  ;;  %6555 = vmatprep.mubr.msk.f32.mxu0 %vm386_vm8, %v3985_v24  ;;  %v4250_v34 = vsel %vm386_vm8, %v4244_v26, -inf }
0x16ec   :  { %v3987_v36 = vmul.f32 %v7255_v33, %v7251_v48  ;;  %4251 = vmax.xlane.f32.xlu1 %v4250_v34  ;;  %v4247_v29 = vsel %vm386_vm8, %v4239_v32, -inf  ;;  %6558 = vmatprep.subr.mxu0 %v8179_v60 }
0x16ed   :  { %4248 = vmax.xlane.f32.xlu0 %v4247_v29 }
0x16ee   :  { %6556 = vmatmul.mubr.msk.f32.vlgmr.msra.gmra.mrb[32].mxu0 %vm386_vm8, %v3987_v36 }
0x16ef   :  { %6559 = vmatpush3.msra.mxu0 %v8179_v60 }
0x16f0   :  { %v6583_v37 = vpop.f32.mrb[44].mxu1 }
0x16f1   :  { %v4438_v44 = vpop.f32.mrb[45].mxu1  ;;  %6606 = vmatmul.mubr.msk.f32.vlgmr.msra.gmra.mrb[46].mxu1 %vm302_vm6, %v4721_v15  ;;  %v4444_v52 = vadd.f32 %v8152_v25, %v6583_v37 }
0x16f2   :  { %v4439_v50 = vadd.f32 %v8161_v54, %v4438_v44 }
0x16f3   :  { %v4450_v59 = vsel %vm386_vm8, %v4444_v52, -inf }
0x16f4   :  { %v4447_v55 = vsel %vm386_vm8, %v4439_v50, -inf }
0x16f5   :  { %4448 = vmax.xlane.f32.xlu0 %v4447_v55 }
0x16f9   :  { %4451 = vmax.xlane.f32.xlu0 %v4450_v59 }
0x1779   :  { %v4252_v57 = vpop.xlane.xlu1 %4251 }
0x177a   :  { %v4254_v19 = vsub.f32 %v4244_v26, %v4252_v57  ;;  %v4249_v58 = vpop.xlane.xlu0 %4248 }
0x177b   :  { %v4253_v42 = vsub.f32 %v4239_v32, %v4249_v58 }
0x177c   :  { %v4257_v45 = vmul.f32 1.442695, %v4254_v19 }
0x177d   :  { %v4255_v0 = vmul.f32 1.442695, %v4253_v42 }
0x177e   :  { %7256 = vpow2.f32 %v4257_v45 }
0x177f   :  { %7258 = vpow2.f32 %v4255_v0 }
0x1782   :  { %v4449_v7 = vpop.xlane.xlu0 %4448 }
0x1783   :  { %v4453_v8 = vsub.f32 %v4439_v50, %v4449_v7 }
0x1785   :  { %v4455_v2 = vmul.f32 1.442695, %v4453_v8 }
0x1786   :  { %v4452_v53 = vpop.xlane.xlu0 %4451 }
0x1787   :  { %7260 = vpow2.f32 %v4455_v2  ;;  %v4454_v3 = vsub.f32 %v4444_v52, %v4452_v53 }
0x1788   :  { %v7257_v41 = vpop.eup %7256 }
0x1789   :  { %v7259_v48 = vpop.eup %7258  ;;  %v4457_v62 = vmul.f32 1.442695, %v4454_v3  ;;  %v4262_v17 = vsel %vm386_vm8, %v7257_v41, 0.0 }
0x178a   :  { %4263 = vadd.xlane.f32.xlu0 %v4262_v17  ;;  %v4259_v35 = vsel %vm386_vm8, %v7259_v48, 0.0 }
0x178b   :  { %7262 = vpow2.f32 %v4457_v62  ;;  %4260 = vadd.xlane.f32.xlu1 %v4259_v35 }
0x1791   :  { %v7261_v18 = vpop.eup %7260 }
0x1792   :  { %v4459_v27 = vsel %vm386_vm8, %v7261_v18, 0.0 }
0x1793   :  { %4460 = vadd.xlane.f32.xlu1 %v4459_v27 }
0x1795   :  { %v7263_v63 = vpop.eup %7262 }
0x1796   :  { %v4462_v13 = vsel %vm386_vm8, %v7263_v63, 0.0 }
0x1797   :  { %4463 = vadd.xlane.f32.xlu0 %v4462_v13 }
0x17a4   :  { %7120 = vrot.lane.b32.xlu1 %v8101_v21, %s7339_s25 }
0x17a8   :  { %7130 = vrot.lane.b32.xlu1 %v8101_v21, %s7343_s27 }
0x17ac   :  { %5001 = vrot.lane.b32.xlu1 %v8066_v9, %s7344_s28 }
0x17ad   :  { %7125 = vrot.lane.b32.xlu0 %v8101_v21, %s7342_s26 }
0x17b1   :  { %5003 = vrot.lane.b32.xlu0 %v8097_v38, %s7344_s28 }
0x17c1   :  { %v6557_v31 = vpop.f32.mrb[32].mxu0 }
0x17c2   :  { %v4066_v22 = vpop.f32.mrb[33].mxu0 }
0x17c3   :  { %6560 = vmatprep.mubr.msk.f32.mxu0 %vm302_vm6, %v4066_v22  ;;  %v8222_v22 = vrot.slane %v7957_v16, %v7762_v40 }
0x17c4   :  { %6561 = vmatmul.mubr.msk.f32.vlgmr.msra.gmra.mrb[28].mxu0 %vm302_vm6, %v6557_v31  ;;  %v6607_v20 = vpop.f32.mrb[46].mxu1 }
0x17c5   :  { %v4800_v6 = vpop.f32.mrb[47].mxu1  ;;  %v4806_v24 = vadd.f32 %v8152_v25, %v6607_v20 }
0x17c6   :  { %v4801_v26 = vadd.f32 %v8161_v54, %v4800_v6 }
0x17c7   :  { %v4812_v14 = vsel %vm386_vm8, %v4806_v24, -inf }
0x17c8   :  { %v4809_v9 = vsel %vm386_vm8, %v4801_v26, -inf }
0x17d0   :  { %4810 = vmax.xlane.f32.xlu1 %v4809_v9  ;;  %4813 = vmax.xlane.f32.xlu0 %v4812_v14 }
0x1817   :  { %v4264_v38 = vpop.xlane.xlu0 %4263 }
0x1818   :  { %v4261_v32 = vpop.xlane.xlu1 %4260 }
0x1819   :  { %7264 = vrcp.f32 %v4261_v32 }
0x181a   :  { %7266 = vrcp.f32 %v4264_v38 }
0x1820   :  { %v4461_v33 = vpop.xlane.xlu1 %4460 }
0x1821   :  { %7268 = vrcp.f32 %v4461_v33 }
0x1823   :  { %v7265_v34 = vpop.eup %7264 }
0x1824   :  { %v7121_v36 = vpop.permute.xlu1 %7120  ;;  %v4464_v29 = vpop.xlane.xlu0 %4463  ;;  %v4266_v15 = vmul.f32 %v7265_v34, %v7259_v48 }
0x1825   :  { %v7123_v37 = vunpack.i.h.bf16 %v7121_v36  ;;  %v7122_v44 = vunpack.i.l.bf16 %v7121_v36  ;;  %7270 = vrcp.f32 %v4464_v29  ;;  %v7267_v52 = vpop.eup %7266 }
0x1826   :  { %6574 = vmatprep.mubr.msk.f32.mxu0 %vm386_vm8, %v4266_v15  ;;  %v4268_v0 = vmul.f32 %v7267_v52, %v7257_v41 }
0x1827   :  { %v6875_v50 = vpack.c.bf16 %v7123_v37, %v7122_v44 }
0x1828   :  { %v7131_v55 = vpop.permute.xlu1 %7130  ;;  %v7126_v59 = vpop.permute.xlu0 %7125 }
0x1829   :  { %v7133_v57 = vunpack.i.h.bf16 %v7131_v55  ;;  %v7132_v19 = vunpack.i.l.bf16 %v7131_v55  ;;  %v7128_v58 = vunpack.i.h.bf16 %v7126_v59  ;;  %v7127_v42 = vunpack.i.l.bf16 %v7126_v59  ;;  %6876 = vmatprep.subr.bf16.mxu0 %v6875_v50 }
0x182a   :  { %6878 = vmatpush3.bf16.msra.mxu0 %v6875_v50 }
0x182b   :  { %v7269_v45 = vpop.eup %7268  ;;  %v6899_v7 = vpack.c.bf16 %v7133_v57, %v7132_v19  ;;  %v6885_v8 = vpack.c.bf16 %v7128_v58, %v7127_v42 }
0x182c   :  { %v5002_v2 = vpop.permute.xlu1 %5001  ;;  %v4466_v53 = vmul.f32 %v7269_v45, %v7261_v18  ;;  %v5004_v41 = vpop.permute.xlu0 %5003 }
0x182d   :  { %6575 = vmatmul.mubr.msk.f32.vlgmr.msra.gmra.mrb[34].mxu0 %vm386_vm8, %v4268_v0  ;;  %6886 = vmatprep.subr.bf16.mxu0 %v6885_v8 }
0x182e   :  { %6901 = vmatprep.subr.msk.bf16.mxu1 %vm7530_vm7, %v6899_v7  ;;  %6624 = vmatprep.mubr.msk.f32.mxu1 %vm302_vm6, %v5002_v2 }
0x182f   :  { %v7271_v3 = vpop.eup %7270  ;;  %6888 = vmatpush3.bf16.msra.mxu0 %v6885_v8  ;;  %6588 = vmatprep.mubr.msk.f32.mxu0 %vm386_vm8, %v4466_v53 }
0x1830   :  { %v4468_v48 = vmul.f32 %v7271_v3, %v7263_v63  ;;  %6904 = vmatpush3.bf16.xpose.msk.msra.mxu1 %vm7530_vm7, %v6899_v7  ;;  %6591 = vmatprep.subr.mxu0 %v8074_v49 }
0x1832   :  { %6589 = vmatmul.mubr.msk.f32.vlgmr.msra.gmra.mrb[36].mxu0 %vm386_vm8, %v4468_v48 }
0x1833   :  { %6592 = vmatpush3.msra.mxu0 %v8074_v49 }
0x1834   :  { %6596 = vmatprep.subr.mxu0 %v8081_v51 }
0x1837   :  { %6625 = vmatmul.mubr.msk.f32.vlgmr.msra.gmra.mrb[48].mxu1 %vm302_vm6, %v5004_v41 }
0x185d   :  { %v4811_v62 = vpop.xlane.xlu1 %4810  ;;  %v4814_v17 = vpop.xlane.xlu0 %4813 }
0x185e   :  { %v4815_v35 = vsub.f32 %v4801_v26, %v4811_v62  ;;  %v4816_v18 = vsub.f32 %v4806_v24, %v4814_v17 }
0x1860   :  { %v4817_v27 = vmul.f32 1.442695, %v4815_v35  ;;  %v4819_v63 = vmul.f32 1.442695, %v4816_v18 }
0x1862   :  { %7272 = vpow2.f32 %v4817_v27 }
0x1863   :  { %7274 = vpow2.f32 %v4819_v63 }
0x186c   :  { %v7273_v1 = vpop.eup %7272 }
0x186d   :  { %v7275_v13 = vpop.eup %7274  ;;  %v4821_v31 = vsel %vm386_vm8, %v7273_v1, 0.0 }
0x186e   :  { %4822 = vadd.xlane.f32.xlu0 %v4821_v31  ;;  %v4824_v49 = vsel %vm386_vm8, %v7275_v13, 0.0 }
0x186f   :  { %4825 = vadd.xlane.f32.xlu1 %v4824_v49 }
0x1884   :  { %7135 = vrot.lane.b32.xlu0 %v8101_v21, %s7345_s14 }
0x1897   :  { %v6562_v20 = vpop.f32.mrb[28].mxu0 }
0x1898   :  { %v4147_v6 = vpop.f32.mrb[29].mxu0 }
0x1899   :  { %v5288_v24 = vadd.f32 %v8222_v22, %v4147_v6 }
0x189b   :  { %v8226_v26 = vadd.f32 %v5288_v24, %v7933_v30 }
0x189d   :  { %v5296_v9 = vsel %vm198_vm5, %v8226_v26, 0.0 }
0x18a3   :  { %5297 = vadd.xlane.f32.xlu0 %v5296_v9 }
0x18fb   :  { %v4823_v14 = vpop.xlane.xlu0 %4822 }
0x18fc   :  { %v4826_v34 = vpop.xlane.xlu1 %4825  ;;  %7276 = vrcp.f32 %v4823_v14 }
0x18fd   :  { %7278 = vrcp.f32 %v4826_v34 }
0x18ff   :  { %v7136_v38 = vpop.permute.xlu0 %7135 }
0x1900   :  { %v6576_v32 = vpop.f32.mrb[34].mxu0  ;;  %v7138_v36 = vunpack.i.h.bf16 %v7136_v38  ;;  %v7137_v16 = vunpack.i.l.bf16 %v7136_v38 }
0x1901   :  { %v4347_v33 = vpop.f32.mrb[35].mxu0 }
0x1902   :  { %v6895_v37 = vpack.c.bf16 %v7138_v36, %v7137_v16 }
0x1905   :  { %v6590_v29 = vpop.f32.mrb[36].mxu0 }
0x1906   :  { %v4547_v15 = vpop.f32.mrb[37].mxu0  ;;  %v7277_v50 = vpop.eup %7276 }
0x1907   :  { %6593 = vmatprep.mubr.msk.f32.mxu0 %vm302_vm6, %v4547_v15  ;;  %v7279_v57 = vpop.eup %7278  ;;  %v4828_v19 = vmul.f32 %v7277_v50, %v7273_v1 }
0x1908   :  { %6594 = vmatmul.mubr.msk.f32.vlgmr.msra.gmra.mrb[38].mxu0 %vm302_vm6, %v6590_v29 }
0x1909   :  { %6597 = vmatpush3.msra.mxu0 %v8081_v51  ;;  %6598 = vmatprep.mubr.msk.f32.mxu0 %vm302_vm6, %v4347_v33  ;;  %v4830_v51 = vmul.f32 %v7279_v57, %v7275_v13 }
0x190a   :  { %v6626_v30 = vpop.f32.mrb[48].mxu1  ;;  %6896 = vmatprep.subr.bf16.mxu0 %v6895_v37 }
0x190b   :  { %v5083_v44 = vpop.f32.mrb[49].mxu1  ;;  %v5089_v55 = vadd.f32 %v8152_v25, %v6626_v30 }
0x190c   :  { %v5084_v52 = vadd.f32 %v8161_v54, %v5083_v44 }
0x190d   :  { %v5095_v58 = vsel %vm386_vm8, %v5089_v55, -inf }
0x190e   :  { %v5092_v59 = vsel %vm386_vm8, %v5084_v52, -inf }
0x190f   :  { %5093 = vmax.xlane.f32.xlu1 %v5092_v59  ;;  %v5978_v59 = vld [vmem:[%s8394_s6 + $0x38] sm:$0xff] }
0x1910   :  { %6599 = vmatmul.mubr.msk.f32.vlgmr.msra.gmra.mrb[38].mxu0 %vm302_vm6, %v6576_v32 }
0x1911   :  { %6898 = vmatpush3.bf16.msra.mxu0 %v6895_v37  ;;  %6612 = vmatprep.mubr.msk.f32.mxu0 %vm386_vm8, %v4828_v19 }
0x1912   :  { %6615 = vmatprep.subr.mxu0 %v8128_v10 }
0x1913   :  { %5096 = vmax.xlane.f32.xlu1 %v5095_v58 }
0x1914   :  { %6613 = vmatmul.mubr.msk.f32.vlgmr.msra.gmra.mrb[40].mxu0 %vm386_vm8, %v4830_v51 }
0x1915   :  { %6616 = vmatpush3.msra.mxu0 %v8128_v10  ;;  %v5289_v10 = vadd.f32 %v6562_v20, %v8222_v22 }
0x1917   :  { %v5293_v48 = vadd.f32 %v5289_v10, %v7939_v39 }
0x1919   :  { %v5299_v17 = vsel %vm198_vm5, %v5293_v48, 0.0 }
0x1930   :  { %v5298_v24 = vpop.xlane.xlu0 %5297 }
0x1931   :  { %v5308_v32 = vmul.f32 0.03125, %v5298_v24 }
0x1933   :  { %v5312_v16 = vsub.f32 %v8226_v26, %v5308_v32 }
0x1935   :  { %v5316_v44 = vmul.f32 %v5312_v16, %v5312_v16 }
0x1937   :  { %v5320_v50 = vsel %vm198_vm5, %v5316_v44, 0.0 }
0x199c   :  { %v5094_v25 = vpop.xlane.xlu1 %5093 }
0x199d   :  { %v5098_v54 = vsub.f32 %v5084_v52, %v5094_v25 }
0x199f   :  { %v5100_v0 = vmul.f32 1.442695, %v5098_v54 }
0x19a0   :  { %v5097_v42 = vpop.xlane.xlu1 %5096 }
0x19a1   :  { %v5099_v45 = vsub.f32 %v5089_v55, %v5097_v42  ;;  %v5977_v55 = vld [vmem:[%s8394_s6 + $0x30] sm:$0xff] }
0x19a2   :  { %v6913_v57 = vpack.c.bf16 %v5978_v59, %v5977_v55 }
0x19a3   :  { %v5102_v7 = vmul.f32 1.442695, %v5099_v45 }
0x19a5   :  { %7280 = vpow2.f32 %v5102_v7 }
0x19a6   :  { %7282 = vpow2.f32 %v5100_v0 }
0x19af   :  { %v7281_v8 = vpop.eup %7280 }
0x19b0   :  { %v5107_v2 = vsel %vm386_vm8, %v7281_v8, 0.0  ;;  %v7283_v53 = vpop.eup %7282 }
0x19b1   :  { %5108 = vadd.xlane.f32.xlu1 %v5107_v2  ;;  %v5104_v3 = vsel %vm386_vm8, %v7283_v53, 0.0 }
0x19b5   :  { %5105 = vadd.xlane.f32.xlu1 %v5104_v3 }
0x19c6   :  { %7140 = vrot.lane.b32.xlu1 %v8101_v21, %s7346_s17 }
0x19e7   :  { %v6614_v41 = vpop.f32.mrb[40].mxu0 }
0x19e8   :  { %v4909_v62 = vpop.f32.mrb[41].mxu0 }
0x19e9   :  { %6617 = vmatprep.mubr.msk.f32.mxu0 %vm302_vm6, %v4909_v62  ;;  %v8284_v62 = vld [vmem:[%s8398_s10 + $0x8] sm:$0xff] }
0x19ea   :  { %5300 = vadd.xlane.f32.xlu1 %v5299_v17  ;;  %6618 = vmatmul.mubr.msk.f32.vlgmr.msra.gmra.mrb[38].mxu0 %vm302_vm6, %v6614_v41  ;;  %v5351_v17 = vrot.slane %v8284_v62, %v2617_v4  ;;  %v5983_v4 = vld [vmem:[%s8395_s7 + $0x40] sm:$0xff]  ;;  %v5372_v55 = vrot.slane %v8284_v62, %v2637_v28  ;;  %v5486_v28 = vrot.slane %v8284_v62, %v2750_v43 }
0x1a3e   :  { %v5109_v35 = vpop.xlane.xlu1 %5108 }
0x1a3f   :  { %7284 = vrcp.f32 %v5109_v35 }
0x1a42   :  { %v5106_v18 = vpop.xlane.xlu1 %5105 }
0x1a43   :  { %7286 = vrcp.f32 %v5106_v18 }
0x1a46   :  { %v7141_v27 = vpop.permute.xlu1 %7140 }
0x1a47   :  { %v7143_v63 = vunpack.i.h.bf16 %v7141_v27  ;;  %v7142_v21 = vunpack.i.l.bf16 %v7141_v27  ;;  %v5359_v27 = vrot.slane %v8284_v62, %v2625_v5  ;;  %v5984_v5 = vld [vmem:[%s8395_s7 + $0x48] sm:$0xff] }
0x1a49   :  { %v6905_v1 = vpack.c.bf16 %v7143_v63, %v7142_v21  ;;  %v7285_v13 = vpop.eup %7284 }
0x1a4a   :  { %v5113_v49 = vmul.f32 %v7285_v13, %v7281_v8 }
0x1a4b   :  { %6906 = vmatprep.subr.bf16.mxu0 %v6905_v1 }
0x1a4c   :  { %6908 = vmatpush3.bf16.msra.mxu0 %v6905_v1 }
0x1a4d   :  { %v7287_v39 = vpop.eup %7286  ;;  %6634 = vmatprep.subr.mxu0 %v8179_v60 }
0x1a4e   :  { %v5111_v31 = vmul.f32 %v7287_v39, %v7283_v53 }
0x1a50   :  { %6631 = vmatprep.mubr.msk.f32.mxu0 %vm386_vm8, %v5111_v31 }
0x1a51   :  { %6632 = vmatmul.mubr.msk.f32.vlgmr.msra.gmra.mrb[42].mxu0 %vm386_vm8, %v5113_v49  ;;  %v5985_v49 = vld [vmem:[%s8395_s7 + $0x50] sm:$0xff] }
0x1a52   :  { %6635 = vmatpush3.msra.mxu0 %v8179_v60 }
0x1a77   :  { %v5301_v34 = vpop.xlane.xlu1 %5300 }
0x1a78   :  { %v5309_v60 = vmul.f32 0.03125, %v5301_v34 }
0x1a7a   :  { %v5313_v37 = vsub.f32 %v5293_v48, %v5309_v60 }
0x1a7c   :  { %v5317_v52 = vmul.f32 %v5313_v37, %v5313_v37 }
0x1b24   :  { %v6633_v20 = vpop.f32.mrb[42].mxu0 }
0x1b25   :  { %v5192_v6 = vpop.f32.mrb[43].mxu0 }
0x1b26   :  { %6636 = vmatprep.mubr.msk.f32.mxu0 %vm302_vm6, %v5192_v6  ;;  %v5986_v6 = vld [vmem:[%s8395_s7 + $0x58] sm:$0xff] }
0x1b27   :  { %6637 = vmatmul.mubr.msk.f32.vlgmr.msra.gmra.mrb[38].mxu0 %vm302_vm6, %v6633_v20  ;;  %v6917_v20 = vpack.c.bf16 %v5984_v5, %v5983_v4  ;;  %v6921_v24 = vpack.c.bf16 %v5986_v6, %v5985_v49  ;;  %v5628_v6 = vld [vmem:[%s8396_s8 + $0x8] sm:$0xff] }
0x1b29   :  { %6918 = vmatprep.subr.bf16.mxu0 %v6917_v20 }
0x1b2a   :  { %6920 = vmatpush3.bf16.msra.mxu0 %v6917_v20  ;;  %v5627_v20 = vld [vmem:[%s8396_s8] sm:$0xff] }
0x1b2b   :  { %6922 = vmatprep.subr.bf16.mxu0 %v6921_v24 }
0x1b2e   :  { %6924 = vmatpush3.bf16.msra.mxu0 %v6921_v24  ;;  %v6934_v24 = vpack.c.bf16 %v5628_v6, %v5627_v20 }
0x1bfa   :  { %v6638_v9 = vpop.f32.mrb[38].mxu0 }
0x1bfb   :  { %v5273_v14 = vpop.f32.mrb[39].mxu0  ;;  %v5291_v38 = vadd.f32 %v6638_v9, %v8222_v22  ;;  %v5987_v9 = vld [vmem:[%s8395_s7 + $0x60] sm:$0xff] }
0x1bfc   :  { %v5290_v33 = vadd.f32 %v8222_v22, %v5273_v14  ;;  %v5323_v22 = vsel %vm198_vm5, %v5317_v52, 0.0  ;;  %v5988_v14 = vld [vmem:[%s8395_s7 + $0x68] sm:$0xff] }
0x1bfd   :  { %v5295_v29 = vadd.f32 %v5291_v38, %v7997_v12  ;;  %v5976_v12 = vld [vmem:[%s8394_s6 + $0x28] sm:$0xff]  ;;  %v6925_v32 = vpack.c.bf16 %v5988_v14, %v5987_v9  ;;  %v5989_v38 = vld [vmem:[%s8395_s7 + $0x70] sm:$0xff]  ;;  %v7347_v9 = vmov 0.0|0.0  }
0x1bfe   :  { %v5294_v36 = vadd.f32 %v5290_v33, %v7994_v11  ;;  %v5975_v11 = vld [vmem:[%s8394_s6 + $0x20] sm:$0xff]  ;;  %v5990_v33 = vld [vmem:[%s8395_s7 + $0x78] sm:$0xff]  ;;  %v5629_v14 = vld [vmem:[%s8396_s8 + $0x10] sm:$0xff] }
0x1bff   :  { %v5305_v30 = vsel %vm198_vm5, %v5295_v29, 0.0  ;;  %v6909_v26 = vpack.c.bf16 %v5976_v12, %v5975_v11  ;;  %6926 = vmatprep.subr.bf16.mxu0 %v6925_v32  ;;  %v6929_v34 = vpack.c.bf16 %v5990_v33, %v5989_v38 }
0x1c00   :  { %v5302_v15 = vsel %vm198_vm5, %v5294_v36, 0.0  ;;  %6928 = vmatpush3.bf16.msra.mxu0 %v6925_v32  ;;  %v5630_v32 = vld [vmem:[%s8396_s8 + $0x18] sm:$0xff] }
0x1c01   :  { %5303 = vadd.xlane.f32.xlu0 %v5302_v15  ;;  %6910 = vmatprep.subr.bf16.mxu1 %v6909_v26  ;;  %v6937_v38 = vpack.c.bf16 %v5630_v32, %v5629_v14 }
0x1c02   :  { %6912 = vmatpush3.bf16.msra.mxu1 %v6909_v26  ;;  %6930 = vmatprep.subr.bf16.mxu0 %v6929_v34 }
0x1c03   :  { %6914 = vmatprep.subr.bf16.mxu1 %v6913_v57 }
0x1c04   :  { %6932 = vmatpush3.bf16.msra.mxu0 %v6929_v34 }
0x1c05   :  { %5306 = vadd.xlane.f32.xlu0 %v5305_v30 }
0x1c06   :  { %6916 = vmatpush3.bf16.msra.mxu1 %v6913_v57 }
0x1c07   :  { %6933 = vmatprep.subr.bf16.mxu1 %v7347_v9 }
0x1c09   :  { %5321 = vadd.xlane.f32.xlu0 %v5320_v50 }
0x1c0d   :  { %5324 = vadd.xlane.f32.xlu0 %v5323_v22 }
0x1c8e   :  { %v5304_v19 = vpop.xlane.xlu0 %5303 }
0x1c8f   :  { %v5310_v51 = vmul.f32 0.03125, %v5304_v19 }
0x1c91   :  { %v5314_v58 = vsub.f32 %v5294_v36, %v5310_v51 }
0x1c92   :  { %v5307_v25 = vpop.xlane.xlu0 %5306 }
0x1c93   :  { %v5311_v54 = vmul.f32 0.03125, %v5307_v25  ;;  %v5318_v42 = vmul.f32 %v5314_v58, %v5314_v58 }
0x1c95   :  { %v5315_v45 = vsub.f32 %v5295_v29, %v5311_v54  ;;  %v5326_v0 = vsel %vm198_vm5, %v5318_v42, 0.0 }
0x1c96   :  { %5327 = vadd.xlane.f32.xlu0 %v5326_v0  ;;  %v5322_v7 = vpop.xlane.xlu0 %5321 }
0x1c97   :  { %v5332_v8 = vmul.f32 0.03125, %v5322_v7  ;;  %v5319_v2 = vmul.f32 %v5315_v45, %v5315_v45 }
0x1c99   :  { %v5336_v53 = vadd.f32 1e-05, %v5332_v8  ;;  %v5329_v3 = vsel %vm198_vm5, %v5319_v2, 0.0 }
0x1c9a   :  { %5330 = vadd.xlane.f32.xlu1 %v5329_v3  ;;  %v5325_v10 = vpop.xlane.xlu0 %5324 }
0x1c9b   :  { %7288 = vrsqrt.f32 %v5336_v53  ;;  %v5333_v48 = vmul.f32 0.03125, %v5325_v10 }
0x1c9d   :  { %v5337_v41 = vadd.f32 1e-05, %v5333_v48 }
0x1c9f   :  { %7290 = vrsqrt.f32 %v5337_v41 }
0x1ca5   :  { %v7289_v35 = vpop.eup %7288 }
0x1ca6   :  { %v5344_v18 = vmul.f32 %v7289_v35, %v5312_v16 }
0x1ca8   :  { %v5352_v63 = vmul.f32 %v5351_v17, %v5344_v18 }
0x1ca9   :  { %v7291_v21 = vpop.eup %7290 }
0x1caa   :  { %v5345_v1 = vmul.f32 %v7291_v21, %v5313_v37  ;;  %v8292_v13 = vadd.f32 %v5359_v27, %v5352_v63 }
0x1cac   :  { %6647 = vmatprep.mubr.msk.f32.mxu1 %vm198_vm5, %v8292_v13  ;;  %v5353_v39 = vmul.f32 %v5351_v17, %v5345_v1 }
0x1cae   :  { %v5361_v31 = vadd.f32 %v5359_v27, %v5353_v39 }
0x1cb0   :  { %6648 = vmatmul.mubr.msk.f32.vlgmr.msra.gmra.mrb[50].mxu1 %vm198_vm5, %v5361_v31 }
0x1cb1   :  { %6935 = vmatpush3.bf16.msra.mxu1 %v6934_v24 }
0x1cb2   :  { %6936 = vmatprep.subr.bf16.mxu1 %v7347_v9 }
0x1cb5   :  { %6938 = vmatpush3.bf16.msra.mxu1 %v6937_v38 }
0x1cb6   :  { %6939 = vmatprep.subr.bf16.mxu1 %v7347_v9 }
0x1d23   :  { %v5328_v36 = vpop.xlane.xlu0 %5327 }
0x1d24   :  { %v5334_v16 = vmul.f32 0.03125, %v5328_v36 }
0x1d26   :  { %v5338_v60 = vadd.f32 1e-05, %v5334_v16 }
0x1d27   :  { %v5331_v29 = vpop.xlane.xlu1 %5330 }
0x1d28   :  { %7292 = vrsqrt.f32 %v5338_v60  ;;  %v5335_v15 = vmul.f32 0.03125, %v5331_v29 }
0x1d2a   :  { %v5339_v37 = vadd.f32 1e-05, %v5335_v15 }
0x1d2c   :  { %7294 = vrsqrt.f32 %v5339_v37  ;;  %v5613_v37 = vrot.slane %v8284_v62, %v2907_v61  ;;  %v5709_v61 = vld [vmem:[%s8397_s9] sm:$0xff]  ;;  %s7349_s9 = smov [#allocation2]  }
0x1d32   :  { %v7293_v30 = vpop.eup %7292 }
0x1d33   :  { %v5346_v44 = vmul.f32 %v7293_v30, %v5314_v58 }
0x1d35   :  { %v5354_v50 = vmul.f32 %v5351_v17, %v5346_v44 }
0x1d36   :  { %v7295_v52 = vpop.eup %7294 }
0x1d37   :  { %v5362_v22 = vadd.f32 %v5359_v27, %v5354_v50  ;;  %v5347_v11 = vmul.f32 %v7295_v52, %v5315_v45 }
0x1d39   :  { %6650 = vmatprep.mubr.msk.f32.mxu1 %vm198_vm5, %v5362_v22  ;;  %v5355_v12 = vmul.f32 %v5351_v17, %v5347_v11  ;;  %v5619_v11 = vrot.slane %v8284_v62, %v2915_v56  ;;  %v185_v56 = vld [vmem:[%s8398_s10 + $0x10] sm:$0x3]  ;;  %s5807_s10 = sshll.u32 %s7349_s9, 4  ;;  %s5808_s10 = int_to_ptr.vmem [resolvable:$true] %s5807_s10 }
0x1d3a   :  { %v5634_v62 = vrot.slane %v185_v56, %v7497_v47  ;;  %s7310_s16 = scalar_lea.vmem %s5808_s10, 32  ;;  %p7315_p1 = scmp.lt.s32.totalorder %s5808_s10, %s5808_s10 }
0x1d3b   :  { %v5363_v26 = vadd.f32 %v5359_v27, %v5355_v12  ;;  %p7311_p0 = scmp.ne.s32.totalorder %s5808_s10, %s7310_s16  ;;  %p7316_p2 = scmp.lt.s32.totalorder %s7310_s16, %s7310_s16 }
0x1d3d   :  { %6651 = vmatmul.mubr.msk.f32.gmra.mrb[52].mxu1 %vm198_vm5, %v5363_v26  ;;  %p7317_p3 = por %p7316_p2, %p7315_p1 }
0x1d3e   :  { %6683 = vmatprep.mubr.msk.f32.mxu1 %vm7348_vm9, %v7335_v23 }
0x1d3f   :  { %p7318_p4 = pnand %p7317_p3, %p7311_p0 }
0x1d83   :  { %v6649_v59 = vpop.f32.mrb[50].mxu1 }
0x1d84   :  { %v5457_v57 = vadd.f32 %v6649_v59, %v5372_v55  ;;  %v5451_v19 = vpop.f32.mrb[51].mxu1 }
0x1d85   :  { %v5452_v51 = vadd.f32 %v5451_v19, %v5372_v55 }
0x1d86   :  { %v5471_v58 = vmax.f32 %v5457_v57, 0.0  ;;  %v6940_v57 = vpack.c.bf16 %v5710_v46, %v5709_v61 }
0x1d87   :  { %v5470_v25 = vmax.f32 %v5452_v51, 0.0 }
0x1d89   :  { %6669 = vmatprep.mubr.msk.f32.mxu0 %vm81_vm0, %v5470_v25 }
0x1d8a   :  { %6670 = vmatmul.mubr.msk.f32.vlgmr.msra.gmra.mrb[44].mxu0 %vm81_vm0, %v5471_v58  ;;  %v5714_v58 = vrot.slane %v185_v56, %v7762_v40 }
0x1e10   :  { %v6652_v54 = vpop.f32.mrb[52].mxu1 }
0x1e11   :  { %v5467_v42 = vadd.f32 %v6652_v54, %v5372_v55  ;;  %v5461_v45 = vpop.f32.mrb[53].mxu1 }
0x1e12   :  { %v5462_v0 = vadd.f32 %v5461_v45, %v5372_v55 }
0x1e13   :  { %v5473_v8 = vmax.f32 %v5467_v42, 0.0 }
0x1e14   :  { %v5472_v7 = vmax.f32 %v5462_v0, 0.0 }
0x1e16   :  { %6672 = vmatprep.mubr.msk.f32.mxu0 %vm81_vm0, %v5472_v7 }
0x1e17   :  { %6673 = vmatmul.mubr.msk.f32.gmra.mrb[46].mxu0 %vm81_vm0, %v5473_v8 }
0x1e5d   :  { %v6671_v2 = vpop.f32.mrb[44].mxu0 }
0x1e5e   :  { %v5565_v53 = vpop.f32.mrb[45].mxu0 }
0x1e5f   :  { %v5566_v3 = vadd.f32 %v5565_v53, %v5486_v28 }
0x1e61   :  { %v5582_v10 = vadd.f32 %v5566_v3, %v8292_v13 }
0x1e63   :  { %v5584_v48 = vsel %vm198_vm5, %v5582_v10, 0.0 }
0x1e64   :  { %5585 = vadd.xlane.f32.xlu1 %v5584_v48 }
0x1eea   :  { %v6674_v41 = vpop.f32.mrb[46].mxu0 }
0x1eeb   :  { %v5574_v17 = vpop.f32.mrb[47].mxu0 }
0x1eec   :  { %v5575_v35 = vadd.f32 %v5574_v17, %v5486_v28 }
0x1eee   :  { %v5583_v18 = vadd.f32 %v5575_v35, %v5362_v22 }
0x1ef0   :  { %v5587_v27 = vsel %vm198_vm5, %v5583_v18, 0.0 }
0x1ef1   :  { %v5586_v63 = vpop.xlane.xlu1 %5585  ;;  %5588 = vadd.xlane.f32.xlu0 %v5587_v27 }
0x1ef2   :  { %v5590_v21 = vmul.f32 0.03125, %v5586_v63 }
0x1ef4   :  { %v5592_v1 = vsub.f32 %v5582_v10, %v5590_v21 }
0x1ef6   :  { %v5594_v39 = vmul.f32 %v5592_v1, %v5592_v1 }
0x1ef8   :  { %v5596_v43 = vsel %vm198_vm5, %v5594_v39, 0.0 }
0x1ef9   :  { %5597 = vadd.xlane.f32.xlu1 %v5596_v43 }
0x1f7e   :  { %v5589_v31 = vpop.xlane.xlu0 %5588 }
0x1f7f   :  { %v5591_v4 = vmul.f32 0.03125, %v5589_v31 }
0x1f81   :  { %v5593_v13 = vsub.f32 %v5583_v18, %v5591_v4 }
0x1f83   :  { %v5595_v5 = vmul.f32 %v5593_v13, %v5593_v13 }
0x1f85   :  { %v5599_v49 = vsel %vm198_vm5, %v5595_v5, 0.0 }
0x1f86   :  { %5600 = vadd.xlane.f32.xlu0 %v5599_v49  ;;  %v5598_v33 = vpop.xlane.xlu1 %5597 }
0x1f87   :  { %v5602_v34 = vmul.f32 0.03125, %v5598_v33 }
0x1f89   :  { %v5604_v36 = vadd.f32 1e-05, %v5602_v34 }
0x1f8b   :  { %7296 = vrsqrt.f32 %v5604_v36 }
0x1f95   :  { %v7297_v15 = vpop.eup %7296 }
0x1f96   :  { %v5608_v30 = vmul.f32 %v7297_v15, %v5592_v1 }
0x1f98   :  { %v5614_v52 = vmul.f32 %v5613_v37, %v5608_v30 }
0x1f9a   :  { %v5620_v26 = vadd.f32 %v5619_v11, %v5614_v52 }
0x2013   :  { %v5601_v16 = vpop.xlane.xlu0 %5600 }
0x2014   :  { %v5603_v60 = vmul.f32 0.03125, %v5601_v16 }
0x2016   :  { %v5605_v29 = vadd.f32 1e-05, %v5603_v60 }
0x2018   :  { %7298 = vrsqrt.f32 %v5605_v29 }
0x2022   :  { %v7299_v44 = vpop.eup %7298 }
0x2023   :  { %v5609_v50 = vmul.f32 %v7299_v44, %v5593_v13 }
0x2025   :  { %v5615_v22 = vmul.f32 %v5613_v37, %v5609_v50 }
0x2027   :  { %v5621_v12 = vadd.f32 %v5619_v11, %v5615_v22 }
0x2029   :  { %v5623_v55 = vrot.slane %v5621_v12, 7 }
0x202b   :  { %v5626_v59 = vsel %vm5625_vm10, %v5620_v26, %v5623_v55 }
0x202c   :  { %6684 = vmatmul.mubr.msk.f32.vlgmr.msra.gmra.mrb[54].mxu1 %vm198_vm5, %v5626_v59 }
0x202d   :  { %6690 = vmatprep.mubr.msk.f32.mxu1 %vm7348_vm9, %v7335_v23  ;;  %6941 = vmatpush3.bf16.msra.mxu1 %v6940_v57 }
0x20ff   :  { %v5704_v19 = vpop.f32.mrb[54].mxu1 }
0x2100   :  { %v5705_v51 = vadd.f32 %v5704_v19, %v5634_v62  ;;  %v6685_v25 = vpop.f32.mrb[55].mxu1 }
0x2102   :  { %v5708_v23 = vmax.f32 %v5705_v51, 0.0 }
0x2104   :  { %6691 = vmatmul.mubr.msk.f32.vlgmr.msra.gmra.mrb[56].mxu1 %vm386_vm8, %v5708_v23 }
0x21d7   :  { %v5784_v54 = vpop.f32.mrb[56].mxu1 }
0x21d8   :  { %v5785_v42 = vadd.f32 %v5784_v54, %v5714_v58  ;;  %v6692_v45 = vpop.f32.mrb[57].mxu1 }
0x21da   :  { %v5789_v0 = vsel %vm5788_vm11, %v5785_v42, -inf }
0x21db   :  { %5790 = vmax.xlane.f32.xlu0 %v5789_v0 }
0x2268   :  { %v5791_v7 = vpop.xlane.xlu0 %5790 }
0x2269   :  { %v5792_v8 = vsub.f32 %v5785_v42, %v5791_v7 }
0x226b   :  { %v5793_v28 = vmul.f32 1.442695, %v5792_v8 }
0x226d   :  { %7300 = vpow2.f32 %v5793_v28 }
0x2277   :  { %v7301_v47 = vpop.eup %7300 }
0x2278   :  { %v5795_v2 = vsel %vm5788_vm11, %v7301_v47, 0.0 }
0x2279   :  { %5796 = vadd.xlane.f32.xlu1 %v5795_v2 }
0x2306   :  { %v5797_v53 = vpop.xlane.xlu1 %5796 }
0x2307   :  { %7302 = vrcp.f32 %v5797_v53 }
0x2311   :  { %v7303_v40 = vpop.eup %7302 }
0x2312   :  { %v5799_v3 = vmul.f32 %v7303_v40, %v7301_v47 }
0x2314   :  { %5800 = vst.msk [vmem:[#allocation2] sm:$0x3] %vm5788_vm11, %v5799_v3 }
0x2315   :  { %7321 = shalt.err (!%p7318_p4)
}
0x2316   :  { %s7322_s22 = scalar_lea.hbm %s8399_s11, 32 }
0x2317   :  { %p7323_p5 = scmp.ne.s32.totalorder %s8399_s11, %s7322_s22  ;;  %p7326_p6 = scmp.lt.u32.totalorder %s7322_s22, %s8399_s11 }
0x2319   :  { %p7328_p7 = pnand %p7326_p6, %p7323_p5 }
0x231b   :  { %7331 = shalt.err (!%p7328_p7)
}
0x231c   :  { %5810 = dma.vmem_to_hbm [thread:$0]  %s5808_s10, 32, %s8399_s11, [#allocation3]  }
0x231d   :  { %7332 = dma.done.wait [#allocation3], 32  }
0x231e   :  { %7333 = vsyncadd [#allocation3], 4294967264 }
0x231f   :  { %5814 = vsyncpa [#allocation3], 1 }

</bundles_post_ra>
